<compile_context>
chip_gen: v7x
topology: tpu7x:2x2x1
jax: 0.10.0
libtpu: 0.0.40
codegen_flags: <defaults>
</compile_context>

<pallas_src>
import functools

import jax
import jax.numpy as jnp
from jax.experimental import pallas as pl
from jax.experimental.pallas import tpu as pltpu

IN_DIM = 32 * 32 * 3  # 3072
# Original 8 Linear layers.
LAYER_DIMS = [IN_DIM, 128, 64, 12, 3, 12, 64, 128, IN_DIM]
# Kernel layer dims after fusing the 12->3->12 bottleneck into one 12->12.
FUSED_DIMS = [IN_DIM, 128, 64, 12, 12, 64, 128, IN_DIM]
NUM_FUSED_LAYERS = len(FUSED_DIMS) - 1  # 7
_BATCH_ALIGN = 16  # sublane-safe tile rows for f32 and bf16 blocks


def _round_up(n, m):
    return ((n + m - 1) // m) * m


def fcn_autoencoder_kernel(x_ref, *refs):
    """All (fused) Linear layers + activations in one kernel invocation.

    refs = (w0, b0, w1, b1, ..., w6, b6, o_ref).
    Weights are (in, out); biases are (1, out). W0/W6 are bf16; x is cast to
    bf16 in-kernel. Every matmul accumulates in f32 on the MXU.
    """
    o_ref = refs[-1]
    p = refs[:-1]

    def linear(h, layer):
        w_ref, b_ref = p[2 * layer], p[2 * layer + 1]
        return (
            jnp.dot(h, w_ref[...], preferred_element_type=jnp.float32)
            + b_ref[...]
        )

    # Encoder: Linear(3072,128)+ReLU. The bf16 cast happens here (VPU op
    # hidden under the block DMA) instead of as a separate XLA op in HBM.
    h = jnp.maximum(linear(x_ref[...].astype(jnp.bfloat16), 0), 0.0)
    # Linear(128,64)+ReLU -> Linear(64,12)+ReLU (f32)
    h = jnp.maximum(linear(h, 1), 0.0)
    h = jnp.maximum(linear(h, 2), 0.0)
    # Fused bottleneck: Linear(12,3) -> Linear(3,12) == one (12,12) layer,
    # followed by the decoder's first ReLU.
    h = jnp.maximum(linear(h, 3), 0.0)
    # Decoder: Linear(12,64)+ReLU -> Linear(64,128)+ReLU
    h = jnp.maximum(linear(h, 4), 0.0)
    h = jnp.maximum(linear(h, 5), 0.0)
    # Final Linear(128,3072)+Tanh (bf16 matmul, f32 accumulation).
    h = linear(h.astype(jnp.bfloat16), 6)
    # TODO(synk): on v6e/v7x a bf16 tanh (EUP bf16) would shorten the in-step
    # serial tail; kept in f32 for v5e portability. Output store uses o_ref's
    # dtype, so a bf16 out_shape still halves the writeback bytes.
    o_ref[...] = jnp.tanh(h).astype(o_ref.dtype)


def prepare_params(params):
    """One-time conversion of the 8 (W_(in,out), b) pairs into the kernel's
    fused 7-layer flat list with kernel dtypes.

    - Fuses Linear(12,3) -> Linear(3,12): W34 = W3 @ W4, b34 = b3 @ W4 + b4
      (valid: no activation between them; latent code is not an output).
    - W0 / W6 (the two 3072-wide layers) in bf16; everything else f32.
    """
    assert len(params) == 8
    w3, b3 = params[3]
    w4, b4 = params[4]
    w34 = jnp.asarray(w3, jnp.float32) @ jnp.asarray(w4, jnp.float32)
    b34 = (jnp.asarray(b3, jnp.float32).reshape(1, -1)
           @ jnp.asarray(w4, jnp.float32)
           + jnp.asarray(b4, jnp.float32).reshape(1, -1))
    fused = [params[0], params[1], params[2], (w34, b34),
             params[5], params[6], params[7]]

    flat = []
    for idx, (w, b) in enumerate(fused):
        w_dtype = (jnp.bfloat16 if idx in (0, NUM_FUSED_LAYERS - 1)
                   else jnp.float32)
        flat.append(jnp.asarray(w, w_dtype))
        flat.append(jnp.asarray(b, jnp.float32).reshape(1, -1))
    return tuple(flat)


@functools.partial(
    jax.jit,
    static_argnames=("batch_tile", "out_dtype", "single_buffer_weights"),
)
def fcn_autoencoder_forward(x, flat_params, *, batch_tile=512,
                            out_dtype=jnp.float32,
                            single_buffer_weights=True):
    """x: (B, 3072) float32; flat_params: output of prepare_params()."""
    B, D = x.shape
    assert D == IN_DIM
    assert len(flat_params) == 2 * NUM_FUSED_LAYERS

    # Batch tiling: tiles are multiples of 16; batch is zero-padded to a whole
    # number of tiles and the pad rows are sliced off at the end.
    tile = max(_BATCH_ALIGN, min(batch_tile, _round_up(B, _BATCH_ALIGN)))
    tile = (tile // _BATCH_ALIGN) * _BATCH_ALIGN
    b_pad = _round_up(B, tile)

    x_p = x.astype(jnp.float32)  # no-op for f32 inputs; no bf16 HBM round-trip
    if b_pad != B:
        # TODO(synk): for ragged production batches prefer a tile dividing B;
        # this pad + final slice costs an extra HBM pass on a mem-bound kernel.
        x_p = jnp.pad(x_p, ((0, b_pad - B), (0, 0)))

    x_spec = pl.BlockSpec((tile, IN_DIM), lambda i: (i, 0))
    out_spec = pl.BlockSpec((tile, IN_DIM), lambda i: (i, 0))

    # Constant index_maps -> weights stay resident in VMEM, single-buffered.
    if single_buffer_weights:
        param_specs = [
            pl.BlockSpec(p.shape, lambda i: (0, 0),
                         pipeline_mode=pl.Buffered(1))
            for p in flat_params
        ]
    else:
        param_specs = [
            pl.BlockSpec(p.shape, lambda i: (0, 0)) for p in flat_params
        ]

    out_itemsize = jnp.dtype(out_dtype).itemsize
    param_bytes = sum(int(p.size) * p.dtype.itemsize for p in flat_params)
    flops = 2 * b_pad * sum(
        FUSED_DIMS[i] * FUSED_DIMS[i + 1] for i in range(NUM_FUSED_LAYERS)
    )
    cost = pl.CostEstimate(
        flops=int(flops),
        transcendentals=int(b_pad * IN_DIM),  # final tanh
        bytes_accessed=int(
            b_pad * IN_DIM * 4                  # f32 input
            + b_pad * IN_DIM * out_itemsize     # output
            + param_bytes
        ),
    )

    # VMEM budget: double-buffered (tile, 3072) input/output blocks + resident
    # weights + margin; capped at 56 MiB so it is safe on v7x's 64 MiB VMEM.
    vmem_need = 2 * tile * IN_DIM * (4 + out_itemsize) + param_bytes + (4 << 20)
    vmem_limit = int(min(max(vmem_need, 32 << 20), 56 << 20))

    out = pl.pallas_call(
        fcn_autoencoder_kernel,
        out_shape=jax.ShapeDtypeStruct((b_pad, IN_DIM), out_dtype),
        grid=(b_pad // tile,),
        in_specs=[x_spec] + param_specs,
        out_specs=out_spec,
        compiler_params=pltpu.CompilerParams(
            dimension_semantics=("parallel",),
            vmem_limit_bytes=vmem_limit,
        ),
        cost_estimate=cost,
    )(x_p, *flat_params)

    return out[:B] if b_pad != B else out


def init_params(key):
    """Deterministic synthetic parameters with the module's Linear shapes.

    PyTorch stores Linear weights as (out, in); we generate in that layout and
    transpose to (in, out) for the kernel's h @ W convention.
    """
    params = []
    for i in range(len(LAYER_DIMS) - 1):
        fan_in, fan_out = LAYER_DIMS[i], LAYER_DIMS[i + 1]
        key, kw, kb = jax.random.split(key, 3)
        bound = 1.0 / jnp.sqrt(fan_in)
        w_pt = jax.random.uniform(
            kw, (fan_out, fan_in), jnp.float32, minval=-bound, maxval=bound
        )
        b_pt = jax.random.uniform(
            kb, (fan_out,), jnp.float32, minval=-bound, maxval=bound
        )
        params.append((w_pt.T, b_pt.reshape(1, fan_out)))
    return params


def reference_forward(x, params):
    """Pure-JAX f32 reference mirroring the PyTorch forward exactly."""
    h = x
    for idx, (w, b) in enumerate(params):
        h = h @ w + b
        if idx == 7:
            h = jnp.tanh(h)        # decoder output Tanh
        elif idx != 3:
            h = jnp.maximum(h, 0)  # ReLU everywhere except the bottleneck
    return h


def reference_forward_mixed(x, params):
    """Pure-JAX reference with the kernel's bf16/f32 mixed precision
    (un-fused bottleneck: f32 reassociation drift is negligible)."""
    w0, b0 = params[0]
    h = jnp.dot(x.astype(jnp.bfloat16), w0.astype(jnp.bfloat16),
                preferred_element_type=jnp.float32) + b0
    h = jnp.maximum(h, 0.0)
    for idx in range(1, 7):
        w, b = params[idx]
        h = jnp.dot(h, w, preferred_element_type=jnp.float32) + b
        if idx != 3:
            h = jnp.maximum(h, 0.0)
    w7, b7 = params[7]
    h = jnp.dot(h.astype(jnp.bfloat16), w7.astype(jnp.bfloat16),
                preferred_element_type=jnp.float32) + b7
    return jnp.tanh(h)


if __name__ == "__main__":
    key = jax.random.PRNGKey(0)
    key, kx = jax.random.split(key)

    # Small test: B=40 with batch_tile=16 exercises a multi-step grid (3 tiles)
    # plus batch padding (40 -> 48). Production default is batch_tile=512.
    B = 40
    x = jax.random.normal(kx, (B, IN_DIM), dtype=jnp.float32)
    params = init_params(key)
    flat_params = prepare_params(params)

    sbw = True
    try:
        out = fcn_autoencoder_forward(x, flat_params, batch_tile=16)
        out = jax.block_until_ready(out)
    except Exception:
        # Fallback in case this Pallas build rejects single-buffered
        # (pipeline_mode=pl.Buffered(1)) weight specs.
        sbw = False
        out = fcn_autoencoder_forward(
            x, flat_params, batch_tile=16, single_buffer_weights=False
        )
        out = jax.block_until_ready(out)

    assert out.shape == (B, IN_DIM) and out.dtype == jnp.float32

    # Tight check vs a reference with identical mixed precision ...
    ref_mixed = reference_forward_mixed(x, params)
    err_mixed = float(jnp.max(jnp.abs(out - ref_mixed)))
    assert err_mixed < 2e-3, err_mixed
    # ... and a loose check vs the pure-f32 PyTorch-equivalent forward
    # (bf16 matmuls on the two 3072-wide layers -> ~1e-3..1e-2 abs error).
    ref_f32 = reference_forward(x, params)
    err_f32 = float(jnp.max(jnp.abs(out - ref_f32)))
    assert err_f32 < 5e-2, err_f32

    # Optional bf16-output path (halves the largest HBM stream; tanh output is
    # bounded so bf16 costs <= ~4e-3 abs error).
    out_bf16 = fcn_autoencoder_forward(
        x, flat_params, batch_tile=16, out_dtype=jnp.bfloat16,
        single_buffer_weights=sbw,
    )
    out_bf16 = jax.block_until_ready(out_bf16)
    assert out_bf16.dtype == jnp.bfloat16
    err_bf16 = float(jnp.max(jnp.abs(out_bf16.astype(jnp.float32) - ref_mixed)))
    assert err_bf16 < 1e-2, err_bf16

    print("KERNEL_OK")
</pallas_src>

<mosaic_0001>
module attributes {stable_mosaic.version = 11 : i64} {
  func.func @fcn_autoencoder_kernel(%arg0: i32, %arg1: memref<16x3072xf32, #tpu.memory_space<vmem>>, %arg2: memref<3072x128xbf16, #tpu.memory_space<vmem>>, %arg3: memref<1x128xf32, #tpu.memory_space<vmem>>, %arg4: memref<128x64xf32, #tpu.memory_space<vmem>>, %arg5: memref<1x64xf32, #tpu.memory_space<vmem>>, %arg6: memref<64x12xf32, #tpu.memory_space<vmem>>, %arg7: memref<1x12xf32, #tpu.memory_space<vmem>>, %arg8: memref<12x12xf32, #tpu.memory_space<vmem>>, %arg9: memref<1x12xf32, #tpu.memory_space<vmem>>, %arg10: memref<12x64xf32, #tpu.memory_space<vmem>>, %arg11: memref<1x64xf32, #tpu.memory_space<vmem>>, %arg12: memref<64x128xf32, #tpu.memory_space<vmem>>, %arg13: memref<1x128xf32, #tpu.memory_space<vmem>>, %arg14: memref<128x3072xbf16, #tpu.memory_space<vmem>>, %arg15: memref<1x3072xf32, #tpu.memory_space<vmem>>, %arg16: memref<16x3072xf32, #tpu.memory_space<vmem>>) attributes {dimension_semantics = [#tpu.dimension_semantics<parallel>], iteration_bounds = array<i64: 3>, scalar_prefetch = 0 : i64, scratch_operands = 0 : i64, tpu.core_type = #tpu.core_type<tc>, window_params = [{transform_indices = @transform_0, window_bounds = array<i64: 16, 3072>}, {pipeline_mode = #tpu.pipeline_mode<synchronous>, transform_indices = @transform_1, window_bounds = array<i64: 3072, 128>}, {pipeline_mode = #tpu.pipeline_mode<synchronous>, transform_indices = @transform_2, window_bounds = array<i64: 1, 128>}, {pipeline_mode = #tpu.pipeline_mode<synchronous>, transform_indices = @transform_3, window_bounds = array<i64: 128, 64>}, {pipeline_mode = #tpu.pipeline_mode<synchronous>, transform_indices = @transform_4, window_bounds = array<i64: 1, 64>}, {pipeline_mode = #tpu.pipeline_mode<synchronous>, transform_indices = @transform_5, window_bounds = array<i64: 64, 12>}, {pipeline_mode = #tpu.pipeline_mode<synchronous>, transform_indices = @transform_6, window_bounds = array<i64: 1, 12>}, {pipeline_mode = #tpu.pipeline_mode<synchronous>, transform_indices = @transform_7, window_bounds = array<i64: 12, 12>}, {pipeline_mode = #tpu.pipeline_mode<synchronous>, transform_indices = @transform_8, window_bounds = array<i64: 1, 12>}, {pipeline_mode = #tpu.pipeline_mode<synchronous>, transform_indices = @transform_9, window_bounds = array<i64: 12, 64>}, {pipeline_mode = #tpu.pipeline_mode<synchronous>, transform_indices = @transform_10, window_bounds = array<i64: 1, 64>}, {pipeline_mode = #tpu.pipeline_mode<synchronous>, transform_indices = @transform_11, window_bounds = array<i64: 64, 128>}, {pipeline_mode = #tpu.pipeline_mode<synchronous>, transform_indices = @transform_12, window_bounds = array<i64: 1, 128>}, {pipeline_mode = #tpu.pipeline_mode<synchronous>, transform_indices = @transform_13, window_bounds = array<i64: 128, 3072>}, {pipeline_mode = #tpu.pipeline_mode<synchronous>, transform_indices = @transform_14, window_bounds = array<i64: 1, 3072>}, {transform_indices = @transform_15, window_bounds = array<i64: 16, 3072>}]} {
    %c0 = arith.constant 0 : index
    %c0_0 = arith.constant 0 : index
    %0 = vector.load %arg1[%c0, %c0_0] : memref<16x3072xf32, #tpu.memory_space<vmem>>, vector<16x3072xf32>
    %1 = arith.truncf %0 : vector<16x3072xf32> to vector<16x3072xbf16>
    %c0_1 = arith.constant 0 : index
    %c0_2 = arith.constant 0 : index
    %2 = vector.load %arg2[%c0_1, %c0_2] : memref<3072x128xbf16, #tpu.memory_space<vmem>>, vector<3072x128xbf16>
    %cst = arith.constant dense<0.000000e+00> : vector<16x128xf32>
    %3 = tpu.matmul %1, %2, %cst {dimension_numbers = #tpu.dot_dimension_numbers<[1], [0], [0], [1], [0, 0, 1, 1], [], []>} : vector<16x3072xbf16>, vector<3072x128xbf16>, vector<16x128xf32> -> vector<16x128xf32>
    %c0_3 = arith.constant 0 : index
    %c0_4 = arith.constant 0 : index
    %4 = vector.load %arg3[%c0_3, %c0_4] : memref<1x128xf32, #tpu.memory_space<vmem>>, vector<1x128xf32>
    %5 = vector.broadcast %4 : vector<1x128xf32> to vector<16x128xf32>
    %6 = arith.addf %3, %5 : vector<16x128xf32>
    %cst_5 = arith.constant 0.000000e+00 : f32
    %7 = vector.broadcast %cst_5 : f32 to vector<16x128xf32>
    %8 = arith.maximumf %6, %7 : vector<16x128xf32>
    %c0_6 = arith.constant 0 : index
    %c0_7 = arith.constant 0 : index
    %9 = vector.load %arg4[%c0_6, %c0_7] : memref<128x64xf32, #tpu.memory_space<vmem>>, vector<128x64xf32>
    %cst_8 = arith.constant dense<0.000000e+00> : vector<16x64xf32>
    %10 = tpu.matmul %8, %9, %cst_8 {dimension_numbers = #tpu.dot_dimension_numbers<[1], [0], [0], [1], [0, 0, 1, 1], [], []>} : vector<16x128xf32>, vector<128x64xf32>, vector<16x64xf32> -> vector<16x64xf32>
    %c0_9 = arith.constant 0 : index
    %c0_10 = arith.constant 0 : index
    %11 = vector.load %arg5[%c0_9, %c0_10] : memref<1x64xf32, #tpu.memory_space<vmem>>, vector<1x64xf32>
    %12 = vector.broadcast %11 : vector<1x64xf32> to vector<16x64xf32>
    %13 = arith.addf %10, %12 : vector<16x64xf32>
    %cst_11 = arith.constant 0.000000e+00 : f32
    %14 = vector.broadcast %cst_11 : f32 to vector<16x64xf32>
    %15 = arith.maximumf %13, %14 : vector<16x64xf32>
    %c0_12 = arith.constant 0 : index
    %c0_13 = arith.constant 0 : index
    %16 = vector.load %arg6[%c0_12, %c0_13] : memref<64x12xf32, #tpu.memory_space<vmem>>, vector<64x12xf32>
    %cst_14 = arith.constant dense<0.000000e+00> : vector<16x12xf32>
    %17 = tpu.matmul %15, %16, %cst_14 {dimension_numbers = #tpu.dot_dimension_numbers<[1], [0], [0], [1], [0, 0, 1, 1], [], []>} : vector<16x64xf32>, vector<64x12xf32>, vector<16x12xf32> -> vector<16x12xf32>
    %c0_15 = arith.constant 0 : index
    %c0_16 = arith.constant 0 : index
    %18 = vector.load %arg7[%c0_15, %c0_16] : memref<1x12xf32, #tpu.memory_space<vmem>>, vector<1x12xf32>
    %19 = vector.broadcast %18 : vector<1x12xf32> to vector<16x12xf32>
    %20 = arith.addf %17, %19 : vector<16x12xf32>
    %cst_17 = arith.constant 0.000000e+00 : f32
    %21 = vector.broadcast %cst_17 : f32 to vector<16x12xf32>
    %22 = arith.maximumf %20, %21 : vector<16x12xf32>
    %c0_18 = arith.constant 0 : index
    %c0_19 = arith.constant 0 : index
    %23 = vector.load %arg8[%c0_18, %c0_19] : memref<12x12xf32, #tpu.memory_space<vmem>>, vector<12x12xf32>
    %cst_20 = arith.constant dense<0.000000e+00> : vector<16x12xf32>
    %24 = tpu.matmul %22, %23, %cst_20 {dimension_numbers = #tpu.dot_dimension_numbers<[1], [0], [0], [1], [0, 0, 1, 1], [], []>} : vector<16x12xf32>, vector<12x12xf32>, vector<16x12xf32> -> vector<16x12xf32>
    %c0_21 = arith.constant 0 : index
    %c0_22 = arith.constant 0 : index
    %25 = vector.load %arg9[%c0_21, %c0_22] : memref<1x12xf32, #tpu.memory_space<vmem>>, vector<1x12xf32>
    %26 = vector.broadcast %25 : vector<1x12xf32> to vector<16x12xf32>
    %27 = arith.addf %24, %26 : vector<16x12xf32>
    %cst_23 = arith.constant 0.000000e+00 : f32
    %28 = vector.broadcast %cst_23 : f32 to vector<16x12xf32>
    %29 = arith.maximumf %27, %28 : vector<16x12xf32>
    %c0_24 = arith.constant 0 : index
    %c0_25 = arith.constant 0 : index
    %30 = vector.load %arg10[%c0_24, %c0_25] : memref<12x64xf32, #tpu.memory_space<vmem>>, vector<12x64xf32>
    %cst_26 = arith.constant dense<0.000000e+00> : vector<16x64xf32>
    %31 = tpu.matmul %29, %30, %cst_26 {dimension_numbers = #tpu.dot_dimension_numbers<[1], [0], [0], [1], [0, 0, 1, 1], [], []>} : vector<16x12xf32>, vector<12x64xf32>, vector<16x64xf32> -> vector<16x64xf32>
    %c0_27 = arith.constant 0 : index
    %c0_28 = arith.constant 0 : index
    %32 = vector.load %arg11[%c0_27, %c0_28] : memref<1x64xf32, #tpu.memory_space<vmem>>, vector<1x64xf32>
    %33 = vector.broadcast %32 : vector<1x64xf32> to vector<16x64xf32>
    %34 = arith.addf %31, %33 : vector<16x64xf32>
    %cst_29 = arith.constant 0.000000e+00 : f32
    %35 = vector.broadcast %cst_29 : f32 to vector<16x64xf32>
    %36 = arith.maximumf %34, %35 : vector<16x64xf32>
    %c0_30 = arith.constant 0 : index
    %c0_31 = arith.constant 0 : index
    %37 = vector.load %arg12[%c0_30, %c0_31] : memref<64x128xf32, #tpu.memory_space<vmem>>, vector<64x128xf32>
    %cst_32 = arith.constant dense<0.000000e+00> : vector<16x128xf32>
    %38 = tpu.matmul %36, %37, %cst_32 {dimension_numbers = #tpu.dot_dimension_numbers<[1], [0], [0], [1], [0, 0, 1, 1], [], []>} : vector<16x64xf32>, vector<64x128xf32>, vector<16x128xf32> -> vector<16x128xf32>
    %c0_33 = arith.constant 0 : index
    %c0_34 = arith.constant 0 : index
    %39 = vector.load %arg13[%c0_33, %c0_34] : memref<1x128xf32, #tpu.memory_space<vmem>>, vector<1x128xf32>
    %40 = vector.broadcast %39 : vector<1x128xf32> to vector<16x128xf32>
    %41 = arith.addf %38, %40 : vector<16x128xf32>
    %cst_35 = arith.constant 0.000000e+00 : f32
    %42 = vector.broadcast %cst_35 : f32 to vector<16x128xf32>
    %43 = arith.maximumf %41, %42 : vector<16x128xf32>
    %44 = arith.truncf %43 : vector<16x128xf32> to vector<16x128xbf16>
    %c0_36 = arith.constant 0 : index
    %c0_37 = arith.constant 0 : index
    %45 = vector.load %arg14[%c0_36, %c0_37] : memref<128x3072xbf16, #tpu.memory_space<vmem>>, vector<128x3072xbf16>
    %cst_38 = arith.constant dense<0.000000e+00> : vector<16x3072xf32>
    %46 = tpu.matmul %44, %45, %cst_38 {dimension_numbers = #tpu.dot_dimension_numbers<[1], [0], [0], [1], [0, 0, 1, 1], [], []>} : vector<16x128xbf16>, vector<128x3072xbf16>, vector<16x3072xf32> -> vector<16x3072xf32>
    %c0_39 = arith.constant 0 : index
    %c0_40 = arith.constant 0 : index
    %47 = vector.load %arg15[%c0_39, %c0_40] : memref<1x3072xf32, #tpu.memory_space<vmem>>, vector<1x3072xf32>
    %48 = vector.broadcast %47 : vector<1x3072xf32> to vector<16x3072xf32>
    %49 = arith.addf %46, %48 : vector<16x3072xf32>
    %50 = math.tanh %49 : vector<16x3072xf32>
    %c0_41 = arith.constant 0 : index
    %c0_42 = arith.constant 0 : index
    %51 = vector.load %arg16[%c0_41, %c0_42] : memref<16x3072xf32, #tpu.memory_space<vmem>>, vector<16x3072xf32>
    tpu.vector_store %arg16[%c0_41, %c0_42], %50 {strides = array<i32>} : memref<16x3072xf32, #tpu.memory_space<vmem>>, vector<16x3072xf32>,
    return
  }
  func.func @transform_0(%arg0: i32) -> (i32, i32) {
    %c0_i32 = arith.constant 0 : i32
    %c0_i32_0 = arith.constant 0 : i32
    return %arg0, %c0_i32 : i32, i32
  }
  func.func @transform_1(%arg0: i32) -> (i32, i32) {
    %c0_i32 = arith.constant 0 : i32
    %c0_i32_0 = arith.constant 0 : i32
    %c0_i32_1 = arith.constant 0 : i32
    return %c0_i32, %c0_i32_0 : i32, i32
  }
  func.func @transform_2(%arg0: i32) -> (i32, i32) {
    %c0_i32 = arith.constant 0 : i32
    %c0_i32_0 = arith.constant 0 : i32
    %c0_i32_1 = arith.constant 0 : i32
    return %c0_i32, %c0_i32_0 : i32, i32
  }
  func.func @transform_3(%arg0: i32) -> (i32, i32) {
    %c0_i32 = arith.constant 0 : i32
    %c0_i32_0 = arith.constant 0 : i32
    %c0_i32_1 = arith.constant 0 : i32
    return %c0_i32, %c0_i32_0 : i32, i32
  }
  func.func @transform_4(%arg0: i32) -> (i32, i32) {
    %c0_i32 = arith.constant 0 : i32
    %c0_i32_0 = arith.constant 0 : i32
    %c0_i32_1 = arith.constant 0 : i32
    return %c0_i32, %c0_i32_0 : i32, i32
  }
  func.func @transform_5(%arg0: i32) -> (i32, i32) {
    %c0_i32 = arith.constant 0 : i32
    %c0_i32_0 = arith.constant 0 : i32
    %c0_i32_1 = arith.constant 0 : i32
    return %c0_i32, %c0_i32_0 : i32, i32
  }
  func.func @transform_6(%arg0: i32) -> (i32, i32) {
    %c0_i32 = arith.constant 0 : i32
    %c0_i32_0 = arith.constant 0 : i32
    %c0_i32_1 = arith.constant 0 : i32
    return %c0_i32, %c0_i32_0 : i32, i32
  }
  func.func @transform_7(%arg0: i32) -> (i32, i32) {
    %c0_i32 = arith.constant 0 : i32
    %c0_i32_0 = arith.constant 0 : i32
    %c0_i32_1 = arith.constant 0 : i32
    return %c0_i32, %c0_i32_0 : i32, i32
  }
  func.func @transform_8(%arg0: i32) -> (i32, i32) {
    %c0_i32 = arith.constant 0 : i32
    %c0_i32_0 = arith.constant 0 : i32
    %c0_i32_1 = arith.constant 0 : i32
    return %c0_i32, %c0_i32_0 : i32, i32
  }
  func.func @transform_9(%arg0: i32) -> (i32, i32) {
    %c0_i32 = arith.constant 0 : i32
    %c0_i32_0 = arith.constant 0 : i32
    %c0_i32_1 = arith.constant 0 : i32
    return %c0_i32, %c0_i32_0 : i32, i32
  }
  func.func @transform_10(%arg0: i32) -> (i32, i32) {
    %c0_i32 = arith.constant 0 : i32
    %c0_i32_0 = arith.constant 0 : i32
    %c0_i32_1 = arith.constant 0 : i32
    return %c0_i32, %c0_i32_0 : i32, i32
  }
  func.func @transform_11(%arg0: i32) -> (i32, i32) {
    %c0_i32 = arith.constant 0 : i32
    %c0_i32_0 = arith.constant 0 : i32
    %c0_i32_1 = arith.constant 0 : i32
    return %c0_i32, %c0_i32_0 : i32, i32
  }
  func.func @transform_12(%arg0: i32) -> (i32, i32) {
    %c0_i32 = arith.constant 0 : i32
    %c0_i32_0 = arith.constant 0 : i32
    %c0_i32_1 = arith.constant 0 : i32
    return %c0_i32, %c0_i32_0 : i32, i32
  }
  func.func @transform_13(%arg0: i32) -> (i32, i32) {
    %c0_i32 = arith.constant 0 : i32
    %c0_i32_0 = arith.constant 0 : i32
    %c0_i32_1 = arith.constant 0 : i32
    return %c0_i32, %c0_i32_0 : i32, i32
  }
  func.func @transform_14(%arg0: i32) -> (i32, i32) {
    %c0_i32 = arith.constant 0 : i32
    %c0_i32_0 = arith.constant 0 : i32
    %c0_i32_1 = arith.constant 0 : i32
    return %c0_i32, %c0_i32_0 : i32, i32
  }
  func.func @transform_15(%arg0: i32) -> (i32, i32) {
    %c0_i32 = arith.constant 0 : i32
    %c0_i32_0 = arith.constant 0 : i32
    return %arg0, %c0_i32 : i32, i32
  }
}

module attributes {stable_mosaic.version = 11 : i64} {
  func.func @fcn_autoencoder_kernel(%arg0: i32, %arg1: memref<16x3072xf32, #tpu.memory_space<vmem>>, %arg2: memref<3072x128xbf16, #tpu.memory_space<vmem>>, %arg3: memref<1x128xf32, #tpu.memory_space<vmem>>, %arg4: memref<128x64xf32, #tpu.memory_space<vmem>>, %arg5: memref<1x64xf32, #tpu.memory_space<vmem>>, %arg6: memref<64x12xf32, #tpu.memory_space<vmem>>, %arg7: memref<1x12xf32, #tpu.memory_space<vmem>>, %arg8: memref<12x12xf32, #tpu.memory_space<vmem>>, %arg9: memref<1x12xf32, #tpu.memory_space<vmem>>, %arg10: memref<12x64xf32, #tpu.memory_space<vmem>>, %arg11: memref<1x64xf32, #tpu.memory_space<vmem>>, %arg12: memref<64x128xf32, #tpu.memory_space<vmem>>, %arg13: memref<1x128xf32, #tpu.memory_space<vmem>>, %arg14: memref<128x3072xbf16, #tpu.memory_space<vmem>>, %arg15: memref<1x3072xf32, #tpu.memory_space<vmem>>, %arg16: memref<16x3072xf32, #tpu.memory_space<vmem>>) attributes {dimension_semantics = [#tpu.dimension_semantics<parallel>], iteration_bounds = array<i64: 3>, scalar_prefetch = 0 : i64, scratch_operands = 0 : i64, tpu.core_type = #tpu.core_type<tc>, window_params = [{transform_indices = @transform_0, window_bounds = array<i64: 16, 3072>}, {pipeline_mode = #tpu.pipeline_mode<synchronous>, transform_indices = @transform_1, window_bounds = array<i64: 3072, 128>}, {pipeline_mode = #tpu.pipeline_mode<synchronous>, transform_indices = @transform_2, window_bounds = array<i64: 1, 128>}, {pipeline_mode = #tpu.pipeline_mode<synchronous>, transform_indices = @transform_3, window_bounds = array<i64: 128, 64>}, {pipeline_mode = #tpu.pipeline_mode<synchronous>, transform_indices = @transform_4, window_bounds = array<i64: 1, 64>}, {pipeline_mode = #tpu.pipeline_mode<synchronous>, transform_indices = @transform_5, window_bounds = array<i64: 64, 12>}, {pipeline_mode = #tpu.pipeline_mode<synchronous>, transform_indices = @transform_6, window_bounds = array<i64: 1, 12>}, {pipeline_mode = #tpu.pipeline_mode<synchronous>, transform_indices = @transform_7, window_bounds = array<i64: 12, 12>}, {pipeline_mode = #tpu.pipeline_mode<synchronous>, transform_indices = @transform_8, window_bounds = array<i64: 1, 12>}, {pipeline_mode = #tpu.pipeline_mode<synchronous>, transform_indices = @transform_9, window_bounds = array<i64: 12, 64>}, {pipeline_mode = #tpu.pipeline_mode<synchronous>, transform_indices = @transform_10, window_bounds = array<i64: 1, 64>}, {pipeline_mode = #tpu.pipeline_mode<synchronous>, transform_indices = @transform_11, window_bounds = array<i64: 64, 128>}, {pipeline_mode = #tpu.pipeline_mode<synchronous>, transform_indices = @transform_12, window_bounds = array<i64: 1, 128>}, {pipeline_mode = #tpu.pipeline_mode<synchronous>, transform_indices = @transform_13, window_bounds = array<i64: 128, 3072>}, {pipeline_mode = #tpu.pipeline_mode<synchronous>, transform_indices = @transform_14, window_bounds = array<i64: 1, 3072>}, {transform_indices = @transform_15, window_bounds = array<i64: 16, 3072>}]} {
    %c0 = arith.constant 0 : index
    %c0_0 = arith.constant 0 : index
    %0 = vector.load %arg1[%c0, %c0_0] : memref<16x3072xf32, #tpu.memory_space<vmem>>, vector<16x3072xf32>
    %1 = arith.truncf %0 : vector<16x3072xf32> to vector<16x3072xbf16>
    %c0_1 = arith.constant 0 : index
    %c0_2 = arith.constant 0 : index
    %2 = vector.load %arg2[%c0_1, %c0_2] : memref<3072x128xbf16, #tpu.memory_space<vmem>>, vector<3072x128xbf16>
    %cst = arith.constant dense<0.000000e+00> : vector<16x128xf32>
    %3 = tpu.matmul %1, %2, %cst {dimension_numbers = #tpu.dot_dimension_numbers<[1], [0], [0], [1], [0, 0, 1, 1], [], []>} : vector<16x3072xbf16>, vector<3072x128xbf16>, vector<16x128xf32> -> vector<16x128xf32>
    %c0_3 = arith.constant 0 : index
    %c0_4 = arith.constant 0 : index
    %4 = vector.load %arg3[%c0_3, %c0_4] : memref<1x128xf32, #tpu.memory_space<vmem>>, vector<1x128xf32>
    %5 = vector.broadcast %4 : vector<1x128xf32> to vector<16x128xf32>
    %6 = arith.addf %3, %5 : vector<16x128xf32>
    %cst_5 = arith.constant 0.000000e+00 : f32
    %7 = vector.broadcast %cst_5 : f32 to vector<16x128xf32>
    %8 = arith.maximumf %6, %7 : vector<16x128xf32>
    %c0_6 = arith.constant 0 : index
    %c0_7 = arith.constant 0 : index
    %9 = vector.load %arg4[%c0_6, %c0_7] : memref<128x64xf32, #tpu.memory_space<vmem>>, vector<128x64xf32>
    %cst_8 = arith.constant dense<0.000000e+00> : vector<16x64xf32>
    %10 = tpu.matmul %8, %9, %cst_8 {dimension_numbers = #tpu.dot_dimension_numbers<[1], [0], [0], [1], [0, 0, 1, 1], [], []>} : vector<16x128xf32>, vector<128x64xf32>, vector<16x64xf32> -> vector<16x64xf32>
    %c0_9 = arith.constant 0 : index
    %c0_10 = arith.constant 0 : index
    %11 = vector.load %arg5[%c0_9, %c0_10] : memref<1x64xf32, #tpu.memory_space<vmem>>, vector<1x64xf32>
    %12 = vector.broadcast %11 : vector<1x64xf32> to vector<16x64xf32>
    %13 = arith.addf %10, %12 : vector<16x64xf32>
    %cst_11 = arith.constant 0.000000e+00 : f32
    %14 = vector.broadcast %cst_11 : f32 to vector<16x64xf32>
    %15 = arith.maximumf %13, %14 : vector<16x64xf32>
    %c0_12 = arith.constant 0 : index
    %c0_13 = arith.constant 0 : index
    %16 = vector.load %arg6[%c0_12, %c0_13] : memref<64x12xf32, #tpu.memory_space<vmem>>, vector<64x12xf32>
    %cst_14 = arith.constant dense<0.000000e+00> : vector<16x12xf32>
    %17 = tpu.matmul %15, %16, %cst_14 {dimension_numbers = #tpu.dot_dimension_numbers<[1], [0], [0], [1], [0, 0, 1, 1], [], []>} : vector<16x64xf32>, vector<64x12xf32>, vector<16x12xf32> -> vector<16x12xf32>
    %c0_15 = arith.constant 0 : index
    %c0_16 = arith.constant 0 : index
    %18 = vector.load %arg7[%c0_15, %c0_16] : memref<1x12xf32, #tpu.memory_space<vmem>>, vector<1x12xf32>
    %19 = vector.broadcast %18 : vector<1x12xf32> to vector<16x12xf32>
    %20 = arith.addf %17, %19 : vector<16x12xf32>
    %cst_17 = arith.constant 0.000000e+00 : f32
    %21 = vector.broadcast %cst_17 : f32 to vector<16x12xf32>
    %22 = arith.maximumf %20, %21 : vector<16x12xf32>
    %c0_18 = arith.constant 0 : index
    %c0_19 = arith.constant 0 : index
    %23 = vector.load %arg8[%c0_18, %c0_19] : memref<12x12xf32, #tpu.memory_space<vmem>>, vector<12x12xf32>
    %cst_20 = arith.constant dense<0.000000e+00> : vector<16x12xf32>
    %24 = tpu.matmul %22, %23, %cst_20 {dimension_numbers = #tpu.dot_dimension_numbers<[1], [0], [0], [1], [0, 0, 1, 1], [], []>} : vector<16x12xf32>, vector<12x12xf32>, vector<16x12xf32> -> vector<16x12xf32>
    %c0_21 = arith.constant 0 : index
    %c0_22 = arith.constant 0 : index
    %25 = vector.load %arg9[%c0_21, %c0_22] : memref<1x12xf32, #tpu.memory_space<vmem>>, vector<1x12xf32>
    %26 = vector.broadcast %25 : vector<1x12xf32> to vector<16x12xf32>
    %27 = arith.addf %24, %26 : vector<16x12xf32>
    %cst_23 = arith.constant 0.000000e+00 : f32
    %28 = vector.broadcast %cst_23 : f32 to vector<16x12xf32>
    %29 = arith.maximumf %27, %28 : vector<16x12xf32>
    %c0_24 = arith.constant 0 : index
    %c0_25 = arith.constant 0 : index
    %30 = vector.load %arg10[%c0_24, %c0_25] : memref<12x64xf32, #tpu.memory_space<vmem>>, vector<12x64xf32>
    %cst_26 = arith.constant dense<0.000000e+00> : vector<16x64xf32>
    %31 = tpu.matmul %29, %30, %cst_26 {dimension_numbers = #tpu.dot_dimension_numbers<[1], [0], [0], [1], [0, 0, 1, 1], [], []>} : vector<16x12xf32>, vector<12x64xf32>, vector<16x64xf32> -> vector<16x64xf32>
    %c0_27 = arith.constant 0 : index
    %c0_28 = arith.constant 0 : index
    %32 = vector.load %arg11[%c0_27, %c0_28] : memref<1x64xf32, #tpu.memory_space<vmem>>, vector<1x64xf32>
    %33 = vector.broadcast %32 : vector<1x64xf32> to vector<16x64xf32>
    %34 = arith.addf %31, %33 : vector<16x64xf32>
    %cst_29 = arith.constant 0.000000e+00 : f32
    %35 = vector.broadcast %cst_29 : f32 to vector<16x64xf32>
    %36 = arith.maximumf %34, %35 : vector<16x64xf32>
    %c0_30 = arith.constant 0 : index
    %c0_31 = arith.constant 0 : index
    %37 = vector.load %arg12[%c0_30, %c0_31] : memref<64x128xf32, #tpu.memory_space<vmem>>, vector<64x128xf32>
    %cst_32 = arith.constant dense<0.000000e+00> : vector<16x128xf32>
    %38 = tpu.matmul %36, %37, %cst_32 {dimension_numbers = #tpu.dot_dimension_numbers<[1], [0], [0], [1], [0, 0, 1, 1], [], []>} : vector<16x64xf32>, vector<64x128xf32>, vector<16x128xf32> -> vector<16x128xf32>
    %c0_33 = arith.constant 0 : index
    %c0_34 = arith.constant 0 : index
    %39 = vector.load %arg13[%c0_33, %c0_34] : memref<1x128xf32, #tpu.memory_space<vmem>>, vector<1x128xf32>
    %40 = vector.broadcast %39 : vector<1x128xf32> to vector<16x128xf32>
    %41 = arith.addf %38, %40 : vector<16x128xf32>
    %cst_35 = arith.constant 0.000000e+00 : f32
    %42 = vector.broadcast %cst_35 : f32 to vector<16x128xf32>
    %43 = arith.maximumf %41, %42 : vector<16x128xf32>
    %44 = arith.truncf %43 : vector<16x128xf32> to vector<16x128xbf16>
    %c0_36 = arith.constant 0 : index
    %c0_37 = arith.constant 0 : index
    %45 = vector.load %arg14[%c0_36, %c0_37] : memref<128x3072xbf16, #tpu.memory_space<vmem>>, vector<128x3072xbf16>
    %cst_38 = arith.constant dense<0.000000e+00> : vector<16x3072xf32>
    %46 = tpu.matmul %44, %45, %cst_38 {dimension_numbers = #tpu.dot_dimension_numbers<[1], [0], [0], [1], [0, 0, 1, 1], [], []>} : vector<16x128xbf16>, vector<128x3072xbf16>, vector<16x3072xf32> -> vector<16x3072xf32>
    %c0_39 = arith.constant 0 : index
    %c0_40 = arith.constant 0 : index
    %47 = vector.load %arg15[%c0_39, %c0_40] : memref<1x3072xf32, #tpu.memory_space<vmem>>, vector<1x3072xf32>
    %48 = vector.broadcast %47 : vector<1x3072xf32> to vector<16x3072xf32>
    %49 = arith.addf %46, %48 : vector<16x3072xf32>
    %50 = math.tanh %49 : vector<16x3072xf32>
    %c0_41 = arith.constant 0 : index
    %c0_42 = arith.constant 0 : index
    %51 = vector.load %arg16[%c0_41, %c0_42] : memref<16x3072xf32, #tpu.memory_space<vmem>>, vector<16x3072xf32>
    tpu.vector_store %arg16[%c0_41, %c0_42], %50 {strides = array<i32>} : memref<16x3072xf32, #tpu.memory_space<vmem>>, vector<16x3072xf32>,
    return
  }
  func.func @transform_0(%arg0: i32) -> (i32, i32) {
    %c0_i32 = arith.constant 0 : i32
    %c0_i32_0 = arith.constant 0 : i32
    return %arg0, %c0_i32 : i32, i32
  }
  func.func @transform_1(%arg0: i32) -> (i32, i32) {
    %c0_i32 = arith.constant 0 : i32
    %c0_i32_0 = arith.constant 0 : i32
    %c0_i32_1 = arith.constant 0 : i32
    return %c0_i32, %c0_i32_0 : i32, i32
  }
  func.func @transform_2(%arg0: i32) -> (i32, i32) {
    %c0_i32 = arith.constant 0 : i32
    %c0_i32_0 = arith.constant 0 : i32
    %c0_i32_1 = arith.constant 0 : i32
    return %c0_i32, %c0_i32_0 : i32, i32
  }
  func.func @transform_3(%arg0: i32) -> (i32, i32) {
    %c0_i32 = arith.constant 0 : i32
    %c0_i32_0 = arith.constant 0 : i32
    %c0_i32_1 = arith.constant 0 : i32
    return %c0_i32, %c0_i32_0 : i32, i32
  }
  func.func @transform_4(%arg0: i32) -> (i32, i32) {
    %c0_i32 = arith.constant 0 : i32
    %c0_i32_0 = arith.constant 0 : i32
    %c0_i32_1 = arith.constant 0 : i32
    return %c0_i32, %c0_i32_0 : i32, i32
  }
  func.func @transform_5(%arg0: i32) -> (i32, i32) {
    %c0_i32 = arith.constant 0 : i32
    %c0_i32_0 = arith.constant 0 : i32
    %c0_i32_1 = arith.constant 0 : i32
    return %c0_i32, %c0_i32_0 : i32, i32
  }
  func.func @transform_6(%arg0: i32) -> (i32, i32) {
    %c0_i32 = arith.constant 0 : i32
    %c0_i32_0 = arith.constant 0 : i32
    %c0_i32_1 = arith.constant 0 : i32
    return %c0_i32, %c0_i32_0 : i32, i32
  }
  func.func @transform_7(%arg0: i32) -> (i32, i32) {
    %c0_i32 = arith.constant 0 : i32
    %c0_i32_0 = arith.constant 0 : i32
    %c0_i32_1 = arith.constant 0 : i32
    return %c0_i32, %c0_i32_0 : i32, i32
  }
  func.func @transform_8(%arg0: i32) -> (i32, i32) {
    %c0_i32 = arith.constant 0 : i32
    %c0_i32_0 = arith.constant 0 : i32
    %c0_i32_1 = arith.constant 0 : i32
    return %c0_i32, %c0_i32_0 : i32, i32
  }
  func.func @transform_9(%arg0: i32) -> (i32, i32) {
    %c0_i32 = arith.constant 0 : i32
    %c0_i32_0 = arith.constant 0 : i32
    %c0_i32_1 = arith.constant 0 : i32
    return %c0_i32, %c0_i32_0 : i32, i32
  }
  func.func @transform_10(%arg0: i32) -> (i32, i32) {
    %c0_i32 = arith.constant 0 : i32
    %c0_i32_0 = arith.constant 0 : i32
    %c0_i32_1 = arith.constant 0 : i32
    return %c0_i32, %c0_i32_0 : i32, i32
  }
  func.func @transform_11(%arg0: i32) -> (i32, i32) {
    %c0_i32 = arith.constant 0 : i32
    %c0_i32_0 = arith.constant 0 : i32
    %c0_i32_1 = arith.constant 0 : i32
    return %c0_i32, %c0_i32_0 : i32, i32
  }
  func.func @transform_12(%arg0: i32) -> (i32, i32) {
    %c0_i32 = arith.constant 0 : i32
    %c0_i32_0 = arith.constant 0 : i32
    %c0_i32_1 = arith.constant 0 : i32
    return %c0_i32, %c0_i32_0 : i32, i32
  }
  func.func @transform_13(%arg0: i32) -> (i32, i32) {
    %c0_i32 = arith.constant 0 : i32
    %c0_i32_0 = arith.constant 0 : i32
    %c0_i32_1 = arith.constant 0 : i32
    return %c0_i32, %c0_i32_0 : i32, i32
  }
  func.func @transform_14(%arg0: i32) -> (i32, i32) {
    %c0_i32 = arith.constant 0 : i32
    %c0_i32_0 = arith.constant 0 : i32
    %c0_i32_1 = arith.constant 0 : i32
    return %c0_i32, %c0_i32_0 : i32, i32
  }
  func.func @transform_15(%arg0: i32) -> (i32, i32) {
    %c0_i32 = arith.constant 0 : i32
    %c0_i32_0 = arith.constant 0 : i32
    return %arg0, %c0_i32 : i32, i32
  }
}

</mosaic_0001>

<bundles_post_ra>
// kernel: fcn_autoencoder_forward.1
= control target key start
LH: loop header
LB: loop body
LE: loop exit
PB: predicated region body
PF: predicated region fallthrough
CT: control target
= control target key end

     0   :  { %20 = vsyncpa [#allocation3], 0  ;;  %s6401_s18 = smov 0   ;;  %s7364_s0 = inlined_call_operand.vmem [shape: f32[48,3072], index: 0, kind: input, shape index: {}]   ;;  %s7365_s1 = inlined_call_operand.vmem [shape: bf16[3072,128], index: 1, kind: input, shape index: {}]   ;;  %s7366_s2 = inlined_call_operand.vmem [shape: f32[1,128], index: 2, kind: input, shape index: {}]   ;;  %s7367_s3 = inlined_call_operand.vmem [shape: f32[128,64], index: 3, kind: input, shape index: {}]   ;;  %s7368_s4 = inlined_call_operand.vmem [shape: f32[1,64], index: 4, kind: input, shape index: {}]   ;;  %s7369_s5 = inlined_call_operand.vmem [shape: f32[64,12], index: 5, kind: input, shape index: {}]   ;;  %s7370_s6 = inlined_call_operand.vmem [shape: f32[1,12], index: 6, kind: input, shape index: {}]   ;;  %s7371_s7 = inlined_call_operand.vmem [shape: f32[12,12], index: 7, kind: input, shape index: {}]   ;;  %s7372_s8 = inlined_call_operand.vmem [shape: f32[1,12], index: 8, kind: input, shape index: {}]   ;;  %s7373_s9 = inlined_call_operand.vmem [shape: f32[12,64], index: 9, kind: input, shape index: {}]   ;;  %s7374_s10 = inlined_call_operand.vmem [shape: f32[1,64], index: 10, kind: input, shape index: {}]   ;;  %s7375_s11 = inlined_call_operand.vmem [shape: f32[64,128], index: 11, kind: input, shape index: {}]   ;;  %s7376_s12 = inlined_call_operand.vmem [shape: f32[1,128], index: 12, kind: input, shape index: {}]   ;;  %s7377_s13 = inlined_call_operand.hbm [shape: bf16[128,3072], index: 13, kind: input, shape index: {}]   ;;  %s7378_s14 = inlined_call_operand.vmem [shape: f32[1,3072], index: 14, kind: input, shape index: {}]   ;;  %s7379_s15 = inlined_call_operand.vmem [shape: f32[48,3072], index: 15, kind: output, shape index: {}]  }
   0x1 LB: > { %s5078_s19 = sadd.s32 4294967295, %s6314_s18   ;;  %p5080_p0 = scmp.ge.s32.totalorder %s6314_s18, 1  ;;  %s6314_s18 = sphi %s6401_s18, %s26_s18  }
   0x2   : > { %p377_p1 = scmp.lt.s32.totalorder %s6314_s18, 4  ;;  %s6316_s20 = smov [#allocation2]  }
   0x3   : > { %s425_s21 = sshll.u32 %s6316_s20, 4  ;;  %p6415_p3 = scmp.eq.s32.totalorder %s5078_s19, 0  ;;  %s426_s21 = int_to_ptr.vmem [resolvable:$true] %s425_s21 }
   0x4   : > { %p6409_p2 = pnand %p5080_p0, %p377_p1  ;;  %s6276_s27 = scalar_lea.hbm %s7377_s13, 24576 }
   0x5   : > { %s7384_s23 = scalar_select %p6415_p3, 1, 0 }
   0x6   : > { %s7383_s22 = scalar_select %p6409_p2, 1, 0 }
   0x7   : > { %p5969_p4 = pneg %p6409_p2  ;;  %p6277_p6 = scmp.ne.s32.totalorder %s7377_s13, %s6276_s27 }
   0x8   : > { %p6283_p10 = scmp.lt.u32.totalorder %s6276_s27, %s7377_s13 }
   0x9   : > { %p6423_p5 = pnand %p6415_p3, %p5969_p4 }
   0xb   : > { %p6278_p7 = pneg %p6423_p5 }
   0xd   : > { %p6279_p8 = pnand %p6278_p7, %p6277_p6 }
   0xf   : > { %p6280_p9 = pneg %p6279_p8 }
  0x11   : > { %p6285_p11 = pnand %p6283_p10, %p6280_p9 }
  0x13   : > { %6288 = shalt.err (!%p6285_p11)
}
  0x14   : > { %s6289_s17 = scalar_lea.vmem %s426_s21, 24576  ;;  %p6297_p1 = scmp.lt.s32.totalorder %s426_s21, %s426_s21 }
  0x15   : > { %p6290_p12 = scmp.ne.s32.totalorder %s426_s21, %s6289_s17  ;;  %p6298_p4 = scmp.lt.s32.totalorder %s6289_s17, %s6289_s17 }
  0x17   : > { %p6292_p13 = pnand %p6290_p12, %p6278_p7  ;;  %p6299_p3 = por %p6298_p4, %p6297_p1 }
  0x19   : > { %p6293_p0 = pneg %p6292_p13 }
  0x1b   : > { %p6300_p2 = pnand %p6299_p3, %p6293_p0 }
  0x1d   : > { %6303 = shalt.err (!%p6300_p2)
}
  0x1e   : > { %s6317_s20 = smov 1536   ;;  %s6318_s25 = smov 96  }
  0x1f   : > { %5972 = dma.hbm_to_vmem [thread:$0]  (!%p6423_p5), %s7377_s13, 24576, %s426_s21, [#allocation3], %s6317_s20, %s6317_s20, %s6318_s25  }
  0x20   : > { %p7386_p6 = scmp.ne.s32.totalorder %s7383_s22, 0 }
  0x21   : > { %p7387_p8 = scmp.ne.s32.totalorder (!%p7386_p6), %s7384_s23, 0 }
  0x22   : > { %454 = sbr.rel (%p7386_p6) target bundleno = 1943 (0x797), region = 80 }
  0x29   : > { %6309 = dma.done.wait (%p7387_p8), [#allocation3], 24576  }
  0x2a   : > { %6311 = vsyncadd (%p7387_p8), [#allocation3], 4294942720  ;;  %v5988_v0 = vld [vmem:[%s7365_s1 + $0x40] sm:$0xff]   ;;  %v5992_v4 = vld [vmem:[%s7365_s1 + $0x48] sm:$0xff]   ;;  %s5085_s24 = sshll.u32 %s5078_s19, 1  ;;  %vm2743_vm0 = vcmask 523264  }
  0x2b   : > { %v5989_v1 = vld [vmem:[%s7365_s1 + $0xc0] sm:$0xff]   ;;  %5491 = vmatprep.subr.bf16.mxu0 %v5988_v0  ;;  %v5993_v5 = vld [vmem:[%s7365_s1 + $0xc8] sm:$0xff]   ;;  %v5996_v8 = vld [vmem:[%s7365_s1 + $0x50] sm:$0xff]   ;;  %p505_p2 = scmp.lt.s32.totalorder %s5085_s24, 5  ;;  %vm2843_vm1 = vcmask 1043456   ;;  %vm6319_vm2 = vmmov 1  }
  0x2c   : > { %v5990_v2 = vld [vmem:[%s7365_s1] sm:$0xff]   ;;  %5513 = vmatprep.subr.bf16.mxu1 %v5989_v1  ;;  %v5994_v6 = vld [vmem:[%s7365_s1 + $0x8] sm:$0xff]   ;;  %v5997_v9 = vld [vmem:[%s7365_s1 + $0xd0] sm:$0xff]   ;;  %vm2836_vm4 = vcmask 97280  }
  0x2d   : > { %v5991_v3 = vld [vmem:[%s7365_s1 + $0x80] sm:$0xff]   ;;  %5492 = vmatpush3.bf16.msra.mxu0 %v5990_v2  ;;  %v5995_v7 = vld [vmem:[%s7365_s1 + $0x88] sm:$0xff]   ;;  %v5998_v10 = vld [vmem:[%s7365_s1 + $0x10] sm:$0xff]   ;;  %s7391_s24 = smov (!%p505_p2, %s5085_s24), 5 }
  0x2e   : > { %5514 = vmatpush3.bf16.msra.mxu1 %v5991_v3  ;;  %5493 = vmatprep.subr.bf16.mxu0 %v5992_v4  ;;  %v5999_v11 = vld [vmem:[%s7365_s1 + $0x90] sm:$0xff]   ;;  %v6000_v12 = vld [vmem:[%s7365_s1 + $0x58] sm:$0xff]   ;;  %v6004_v16 = vld [vmem:[%s7365_s1 + $0x60] sm:$0xff]   ;;  %s5964_s27 = smul.u32 192, %s7391_s24 }
  0x2f   : > { %5515 = vmatprep.subr.bf16.mxu1 %v5993_v5  ;;  %v6001_v13 = vld [vmem:[%s7365_s1 + $0xd8] sm:$0xff]   ;;  %v6005_v17 = vld [vmem:[%s7365_s1 + $0xe0] sm:$0xff]   ;;  %v6008_v20 = vld [vmem:[%s7365_s1 + $0x68] sm:$0xff]  }
  0x30   : > { %v6002_v14 = vld [vmem:[%s7365_s1 + $0x18] sm:$0xff]   ;;  %v6006_v18 = vld [vmem:[%s7365_s1 + $0x20] sm:$0xff]   ;;  %v6009_v21 = vld [vmem:[%s7365_s1 + $0xe8] sm:$0xff]   ;;  %s6549_s28 = scalar_lea.vmem %s7364_s0, %s5964_s27  ;;  %s7277_s20 = scalar_lea.vmem %s7379_s15, %s5964_s27 }
  0x31   : > { %5494 = vmatpush3.bf16.msra.mxu0 %v5994_v6  ;;  %v6003_v15 = vld [vmem:[%s7365_s1 + $0x98] sm:$0xff]   ;;  %v6007_v19 = vld [vmem:[%s7365_s1 + $0xa0] sm:$0xff]   ;;  %v6010_v22 = vld [vmem:[%s7365_s1 + $0x28] sm:$0xff]  }
  0x32   : > { %5516 = vmatpush3.bf16.msra.mxu1 %v5995_v7  ;;  %5495 = vmatprep.subr.bf16.mxu0 %v5996_v8  ;;  %v6011_v23 = vld [vmem:[%s7365_s1 + $0xa8] sm:$0xff]   ;;  %v6012_v24 = vld [vmem:[%s7365_s1 + $0x70] sm:$0xff]   ;;  %v6016_v28 = vld [vmem:[%s7365_s1 + $0x78] sm:$0xff]  }
  0x33   : > { %5517 = vmatprep.subr.bf16.mxu1 %v5997_v9  ;;  %v6013_v25 = vld [vmem:[%s7365_s1 + $0xf0] sm:$0xff]   ;;  %v6017_v29 = vld [vmem:[%s7365_s1 + $0xf8] sm:$0xff]   ;;  %v520_v32 = vld [vmem:[%s6549_s28 + $0x8] sm:$0xff] }
  0x34   : > { %v6014_v26 = vld [vmem:[%s7365_s1 + $0x30] sm:$0xff]   ;;  %v6018_v30 = vld [vmem:[%s7365_s1 + $0x38] sm:$0xff]   ;;  %v544_v33 = vld [vmem:[%s6549_s28 + $0xc8] sm:$0xff] }
  0x35   : > { %5496 = vmatpush3.bf16.msra.mxu0 %v5998_v10  ;;  %v6015_v27 = vld [vmem:[%s7365_s1 + $0xb0] sm:$0xff]   ;;  %v6019_v31 = vld [vmem:[%s7365_s1 + $0xb8] sm:$0xff]   ;;  %v568_v35 = vpack.c.bf16 %v544_v33, %v520_v32  ;;  %v519_v37 = vld [vmem:[%s6549_s28] sm:$0xff] }
  0x36   : > { %5518 = vmatpush3.bf16.msra.mxu1 %v5999_v11  ;;  %5497 = vmatprep.subr.bf16.mxu0 %v6000_v12  ;;  %v522_v34 = vld [vmem:[%s6549_s28 + $0x18] sm:$0xff]  ;;  %v543_v38 = vld [vmem:[%s6549_s28 + $0xc0] sm:$0xff]  ;;  %v521_v41 = vld [vmem:[%s6549_s28 + $0x10] sm:$0xff] }
  0x37   : > { %5519 = vmatprep.subr.bf16.mxu1 %v6001_v13  ;;  %v546_v36 = vld [vmem:[%s6549_s28 + $0xd8] sm:$0xff]  ;;  %v567_v40 = vpack.c.bf16 %v543_v38, %v519_v37  ;;  %v545_v42 = vld [vmem:[%s6549_s28 + $0xd0] sm:$0xff]  ;;  %2166 = vmatprep.mubr.bf16.mxu0 %v568_v35  ;;  %v6020_v44 = vld [vmem:[%s7365_s1 + $0x140] sm:$0xff]  }
  0x38   : > { %v570_v39 = vpack.c.bf16 %v546_v36, %v522_v34  ;;  %v569_v43 = vpack.c.bf16 %v545_v42, %v521_v41  ;;  %v6021_v45 = vld [vmem:[%s7365_s1 + $0x1c0] sm:$0xff]   ;;  %v6024_v48 = vld [vmem:[%s7365_s1 + $0x148] sm:$0xff]   ;;  %v6028_v52 = vld [vmem:[%s7365_s1 + $0x150] sm:$0xff]  }
  0x39   : > { %5498 = vmatpush3.bf16.msra.mxu0 %v6002_v14  ;;  %v6022_v46 = vld [vmem:[%s7365_s1 + $0x100] sm:$0xff]   ;;  %v6025_v49 = vld [vmem:[%s7365_s1 + $0x1c8] sm:$0xff]   ;;  %v6029_v53 = vld [vmem:[%s7365_s1 + $0x1d0] sm:$0xff]  }
  0x3a   : > { %5520 = vmatpush3.bf16.msra.mxu1 %v6003_v15  ;;  %5499 = vmatprep.subr.bf16.mxu0 %v6004_v16  ;;  %v6023_v47 = vld [vmem:[%s7365_s1 + $0x180] sm:$0xff]   ;;  %v6026_v50 = vld [vmem:[%s7365_s1 + $0x108] sm:$0xff]   ;;  %v6030_v54 = vld [vmem:[%s7365_s1 + $0x110] sm:$0xff]  }
  0x3b   : > { %5521 = vmatprep.subr.bf16.mxu1 %v6005_v17  ;;  %2207 = vmatprep.mubr.bf16.mxu1 %v570_v39  ;;  %v6027_v51 = vld [vmem:[%s7365_s1 + $0x188] sm:$0xff]   ;;  %v6031_v55 = vld [vmem:[%s7365_s1 + $0x190] sm:$0xff]   ;;  %v6032_v56 = vld [vmem:[%s7365_s1 + $0x158] sm:$0xff]  }
  0x3c   : > { %v6033_v57 = vld [vmem:[%s7365_s1 + $0x1d8] sm:$0xff]   ;;  %v6036_v60 = vld [vmem:[%s7365_s1 + $0x160] sm:$0xff]   ;;  %v6040_v0 = vld [vmem:[%s7365_s1 + $0x168] sm:$0xff]  }
  0x3d   : > { %5500 = vmatpush3.bf16.msra.mxu0 %v6006_v18  ;;  %v6034_v58 = vld [vmem:[%s7365_s1 + $0x118] sm:$0xff]   ;;  %v6037_v61 = vld [vmem:[%s7365_s1 + $0x1e0] sm:$0xff]   ;;  %v6041_v1 = vld [vmem:[%s7365_s1 + $0x1e8] sm:$0xff]  }
  0x3e   : > { %5522 = vmatpush3.bf16.msra.mxu1 %v6007_v19  ;;  %5501 = vmatprep.subr.bf16.mxu0 %v6008_v20  ;;  %v6035_v59 = vld [vmem:[%s7365_s1 + $0x198] sm:$0xff]   ;;  %v6038_v62 = vld [vmem:[%s7365_s1 + $0x120] sm:$0xff]   ;;  %v6042_v2 = vld [vmem:[%s7365_s1 + $0x128] sm:$0xff]  }
  0x3f   : > { %5523 = vmatprep.subr.bf16.mxu1 %v6009_v21  ;;  %v6039_v63 = vld [vmem:[%s7365_s1 + $0x1a0] sm:$0xff]   ;;  %v6043_v3 = vld [vmem:[%s7365_s1 + $0x1a8] sm:$0xff]   ;;  %v6044_v4 = vld [vmem:[%s7365_s1 + $0x170] sm:$0xff]  }
  0x40   : > { %v6045_v5 = vld [vmem:[%s7365_s1 + $0x1f0] sm:$0xff]   ;;  %v6048_v8 = vld [vmem:[%s7365_s1 + $0x178] sm:$0xff]   ;;  %v524_v12 = vld [vmem:[%s6549_s28 + $0x28] sm:$0xff] }
  0x41   : > { %5502 = vmatpush3.bf16.msra.mxu0 %v6010_v22  ;;  %v6046_v6 = vld [vmem:[%s7365_s1 + $0x130] sm:$0xff]   ;;  %v6049_v9 = vld [vmem:[%s7365_s1 + $0x1f8] sm:$0xff]   ;;  %v548_v13 = vld [vmem:[%s6549_s28 + $0xe8] sm:$0xff] }
  0x42   : > { %5524 = vmatpush3.bf16.msra.mxu1 %v6011_v23  ;;  %5503 = vmatprep.subr.bf16.mxu0 %v6012_v24  ;;  %v6047_v7 = vld [vmem:[%s7365_s1 + $0x1b0] sm:$0xff]   ;;  %v6050_v10 = vld [vmem:[%s7365_s1 + $0x138] sm:$0xff]   ;;  %v572_v16 = vpack.c.bf16 %v548_v13, %v524_v12  ;;  %v523_v18 = vld [vmem:[%s6549_s28 + $0x20] sm:$0xff] }
  0x43   : > { %5525 = vmatprep.subr.bf16.mxu1 %v6013_v25  ;;  %v6051_v11 = vld [vmem:[%s7365_s1 + $0x1b8] sm:$0xff]   ;;  %v547_v19 = vld [vmem:[%s6549_s28 + $0xe0] sm:$0xff]  ;;  %v525_v20 = vld [vmem:[%s6549_s28 + $0x30] sm:$0xff] }
  0x44   : > { %v526_v14 = vld [vmem:[%s6549_s28 + $0x38] sm:$0xff]  ;;  %v571_v21 = vpack.c.bf16 %v547_v19, %v523_v18  ;;  %v549_v22 = vld [vmem:[%s6549_s28 + $0xf0] sm:$0xff]  ;;  %v6052_v24 = vld [vmem:[%s7365_s1 + $0x240] sm:$0xff]  }
  0x45   : > { %5504 = vmatpush3.bf16.msra.mxu0 %v6014_v26  ;;  %v550_v15 = vld [vmem:[%s6549_s28 + $0xf8] sm:$0xff]  ;;  %v573_v23 = vpack.c.bf16 %v549_v22, %v525_v20  ;;  %v6053_v25 = vld [vmem:[%s7365_s1 + $0x2c0] sm:$0xff]   ;;  %v6060_v32 = vld [vmem:[%s7365_s1 + $0x250] sm:$0xff]  }
  0x46   : > { %5526 = vmatpush3.bf16.msra.mxu1 %v6015_v27  ;;  %5505 = vmatprep.subr.bf16.mxu0 %v6016_v28  ;;  %v574_v17 = vpack.c.bf16 %v550_v15, %v526_v14  ;;  %v6054_v26 = vld [vmem:[%s7365_s1 + $0x200] sm:$0xff]   ;;  %v6056_v28 = vld [vmem:[%s7365_s1 + $0x248] sm:$0xff]   ;;  %v6061_v33 = vld [vmem:[%s7365_s1 + $0x2d0] sm:$0xff]  }
  0x47   : > { %5527 = vmatprep.subr.bf16.mxu1 %v6017_v29  ;;  %v6055_v27 = vld [vmem:[%s7365_s1 + $0x280] sm:$0xff]   ;;  %v6057_v29 = vld [vmem:[%s7365_s1 + $0x2c8] sm:$0xff]   ;;  %v6062_v34 = vld [vmem:[%s7365_s1 + $0x210] sm:$0xff]  }
  0x48   : > { %v6063_v35 = vld [vmem:[%s7365_s1 + $0x290] sm:$0xff]   ;;  %v6064_v36 = vld [vmem:[%s7365_s1 + $0x258] sm:$0xff]   ;;  %v6069_v41 = vld [vmem:[%s7365_s1 + $0x2e0] sm:$0xff]  }
  0x49   : > { %5506 = vmatpush3.bf16.msra.mxu0 %v6018_v30  ;;  %v6058_v30 = vld [vmem:[%s7365_s1 + $0x208] sm:$0xff]   ;;  %v6065_v37 = vld [vmem:[%s7365_s1 + $0x2d8] sm:$0xff]   ;;  %v6070_v42 = vld [vmem:[%s7365_s1 + $0x220] sm:$0xff]  }
  0x4a   : > { %5528 = vmatpush3.bf16.msra.mxu1 %v6019_v31  ;;  %5535 = vmatprep.subr.bf16.mxu0 %v6020_v44  ;;  %v6059_v31 = vld [vmem:[%s7365_s1 + $0x288] sm:$0xff]   ;;  %v6066_v38 = vld [vmem:[%s7365_s1 + $0x218] sm:$0xff]   ;;  %v6092_v12 = vld [vmem:[%s7365_s1 + $0x350] sm:$0xff]  }
  0x4b   : > { %5557 = vmatprep.subr.bf16.mxu1 %v6021_v45  ;;  %v6067_v39 = vld [vmem:[%s7365_s1 + $0x298] sm:$0xff]   ;;  %v6072_v44 = vld [vmem:[%s7365_s1 + $0x268] sm:$0xff]   ;;  %v6093_v13 = vld [vmem:[%s7365_s1 + $0x3d0] sm:$0xff]  }
  0x4c   : > { %2167 = vmatmul.mubr.bf16.vlgmr.msra.gmra.mrb[0].mxu0 %v567_v40  ;;  %v6068_v40 = vld [vmem:[%s7365_s1 + $0x260] sm:$0xff]   ;;  %v6073_v45 = vld [vmem:[%s7365_s1 + $0x2e8] sm:$0xff]   ;;  %v6094_v14 = vld [vmem:[%s7365_s1 + $0x310] sm:$0xff]  }
  0x4d   : > { %2208 = vmatmul.mubr.bf16.vlgmr.msra.gmra.mrb[0].mxu1 %v569_v43  ;;  %5536 = vmatpush3.bf16.msra.mxu0 %v6022_v46  ;;  %v6071_v43 = vld [vmem:[%s7365_s1 + $0x2a0] sm:$0xff]   ;;  %v6074_v46 = vld [vmem:[%s7365_s1 + $0x228] sm:$0xff]   ;;  %v6095_v15 = vld [vmem:[%s7365_s1 + $0x390] sm:$0xff]  }
  0x4e   : > { %5558 = vmatpush3.bf16.msra.mxu1 %v6023_v47  ;;  %5537 = vmatprep.subr.bf16.mxu0 %v6024_v48  ;;  %v6075_v47 = vld [vmem:[%s7365_s1 + $0x2a8] sm:$0xff]   ;;  %v6076_v48 = vld [vmem:[%s7365_s1 + $0x270] sm:$0xff]   ;;  %v6098_v18 = vld [vmem:[%s7365_s1 + $0x318] sm:$0xff]  }
  0x4f   : > { %5559 = vmatprep.subr.bf16.mxu1 %v6025_v49  ;;  %2248 = vmatprep.mubr.bf16.mxu0 %v572_v16  ;;  %v6077_v49 = vld [vmem:[%s7365_s1 + $0x2f0] sm:$0xff]   ;;  %v6096_v16 = vld [vmem:[%s7365_s1 + $0x358] sm:$0xff]   ;;  %v6100_v20 = vld [vmem:[%s7365_s1 + $0x360] sm:$0xff]  }
  0x50   : > { %2289 = vmatprep.mubr.bf16.mxu1 %v574_v17  ;;  %v6097_v17 = vld [vmem:[%s7365_s1 + $0x3d8] sm:$0xff]   ;;  %v6102_v22 = vld [vmem:[%s7365_s1 + $0x320] sm:$0xff]   ;;  %vm7171_vm3 = vmpackc.low %vm2843_vm1, %vm6319_vm2 }
  0x51   : > { %5538 = vmatpush3.bf16.msra.mxu0 %v6026_v50  ;;  %v6078_v50 = vld [vmem:[%s7365_s1 + $0x230] sm:$0xff]   ;;  %v6099_v19 = vld [vmem:[%s7365_s1 + $0x398] sm:$0xff]  }
  0x52   : > { %5560 = vmatpush3.bf16.msra.mxu1 %v6027_v51  ;;  %5539 = vmatprep.subr.bf16.mxu0 %v6028_v52  ;;  %v6079_v51 = vld [vmem:[%s7365_s1 + $0x2b0] sm:$0xff]   ;;  %v6080_v52 = vld [vmem:[%s7365_s1 + $0x278] sm:$0xff]  }
  0x53   : > { %5561 = vmatprep.subr.bf16.mxu1 %v6029_v53  ;;  %v6081_v53 = vld [vmem:[%s7365_s1 + $0x2f8] sm:$0xff]  }
  0x55   : > { %5540 = vmatpush3.bf16.msra.mxu0 %v6030_v54  ;;  %v6082_v54 = vld [vmem:[%s7365_s1 + $0x238] sm:$0xff]  }
  0x56   : > { %5562 = vmatpush3.bf16.msra.mxu1 %v6031_v55  ;;  %5541 = vmatprep.subr.bf16.mxu0 %v6032_v56  ;;  %v6083_v55 = vld [vmem:[%s7365_s1 + $0x2b8] sm:$0xff]   ;;  %v528_v56 = vld [vmem:[%s6549_s28 + $0x48] sm:$0xff] }
  0x57   : > { %5563 = vmatprep.subr.bf16.mxu1 %v6033_v57  ;;  %v552_v57 = vld [vmem:[%s6549_s28 + $0x108] sm:$0xff] }
  0x59   : > { %5542 = vmatpush3.bf16.msra.mxu0 %v6034_v58  ;;  %v576_v58 = vpack.c.bf16 %v552_v57, %v528_v56  ;;  %v6124_v56 = vld [vmem:[%s7365_s1 + $0x450] sm:$0xff]  }
  0x5a   : > { %5564 = vmatpush3.bf16.msra.mxu1 %v6035_v59  ;;  %5543 = vmatprep.subr.bf16.mxu0 %v6036_v60  ;;  %v530_v59 = vld [vmem:[%s6549_s28 + $0x58] sm:$0xff]  ;;  %v6125_v57 = vld [vmem:[%s7365_s1 + $0x4d0] sm:$0xff]  }
  0x5b   : > { %5565 = vmatprep.subr.bf16.mxu1 %v6037_v61  ;;  %v554_v60 = vld [vmem:[%s6549_s28 + $0x118] sm:$0xff]  ;;  %v527_v61 = vld [vmem:[%s6549_s28 + $0x40] sm:$0xff] }
  0x5d   : > { %5544 = vmatpush3.bf16.msra.mxu0 %v6038_v62  ;;  %v578_v62 = vpack.c.bf16 %v554_v60, %v530_v59  ;;  %v6127_v59 = vld [vmem:[%s7365_s1 + $0x490] sm:$0xff]   ;;  %v6128_v60 = vld [vmem:[%s7365_s1 + $0x458] sm:$0xff]  }
  0x5e   : > { %5566 = vmatpush3.bf16.msra.mxu1 %v6039_v63  ;;  %5545 = vmatprep.subr.bf16.mxu0 %v6040_v0  ;;  %v551_v63 = vld [vmem:[%s6549_s28 + $0x100] sm:$0xff]  ;;  %v529_v0 = vld [vmem:[%s6549_s28 + $0x50] sm:$0xff] }
  0x5f   : > { %5567 = vmatprep.subr.bf16.mxu1 %v6041_v1  ;;  %v553_v1 = vld [vmem:[%s6549_s28 + $0x110] sm:$0xff] }
  0x61   : > { %5546 = vmatpush3.bf16.msra.mxu0 %v6042_v2  ;;  %v575_v2 = vpack.c.bf16 %v551_v63, %v527_v61  ;;  %v6129_v61 = vld [vmem:[%s7365_s1 + $0x4d8] sm:$0xff]  }
  0x62   : > { %5568 = vmatpush3.bf16.msra.mxu1 %v6043_v3  ;;  %5547 = vmatprep.subr.bf16.mxu0 %v6044_v4  ;;  %v577_v3 = vpack.c.bf16 %v553_v1, %v529_v0  ;;  %v6084_v4 = vld [vmem:[%s7365_s1 + $0x340] sm:$0xff]   ;;  %v6131_v63 = vld [vmem:[%s7365_s1 + $0x498] sm:$0xff]  }
  0x63   : > { %5569 = vmatprep.subr.bf16.mxu1 %v6045_v5  ;;  %v6085_v5 = vld [vmem:[%s7365_s1 + $0x3c0] sm:$0xff]  }
  0x64   : > { %v6132_v0 = vld [vmem:[%s7365_s1 + $0x460] sm:$0xff]  }
  0x65   : > { %5548 = vmatpush3.bf16.msra.mxu0 %v6046_v6  ;;  %v6086_v6 = vld [vmem:[%s7365_s1 + $0x300] sm:$0xff]  }
  0x66   : > { %5570 = vmatpush3.bf16.msra.mxu1 %v6047_v7  ;;  %5549 = vmatprep.subr.bf16.mxu0 %v6048_v8  ;;  %v6087_v7 = vld [vmem:[%s7365_s1 + $0x380] sm:$0xff]   ;;  %v6088_v8 = vld [vmem:[%s7365_s1 + $0x348] sm:$0xff]  }
  0x67   : > { %5571 = vmatprep.subr.bf16.mxu1 %v6049_v9  ;;  %v6089_v9 = vld [vmem:[%s7365_s1 + $0x3c8] sm:$0xff]   ;;  %v6133_v1 = vld [vmem:[%s7365_s1 + $0x4e0] sm:$0xff]  }
  0x69   : > { %5550 = vmatpush3.bf16.msra.mxu0 %v6050_v10  ;;  %v6090_v10 = vld [vmem:[%s7365_s1 + $0x308] sm:$0xff]  }
  0x6a   : > { %5572 = vmatpush3.bf16.msra.mxu1 %v6051_v11  ;;  %5579 = vmatprep.subr.bf16.mxu0 %v6052_v24  ;;  %v6091_v11 = vld [vmem:[%s7365_s1 + $0x388] sm:$0xff]  }
  0x6b   : > { %5601 = vmatprep.subr.bf16.mxu1 %v6053_v25  ;;  %v6104_v24 = vld [vmem:[%s7365_s1 + $0x368] sm:$0xff]  }
  0x6c   : > { %2249 = vmatmul.mubr.bf16.vlgmr.msra.gmra.mrb[4].mxu0 %v571_v21  ;;  %v6101_v21 = vld [vmem:[%s7365_s1 + $0x3e0] sm:$0xff]   ;;  %v6105_v25 = vld [vmem:[%s7365_s1 + $0x3e8] sm:$0xff]  }
  0x6d   : > { %2290 = vmatmul.mubr.bf16.vlgmr.msra.gmra.mrb[4].mxu1 %v573_v23  ;;  %5580 = vmatpush3.bf16.msra.mxu0 %v6054_v26  ;;  %v6103_v23 = vld [vmem:[%s7365_s1 + $0x3a0] sm:$0xff]   ;;  %v6106_v26 = vld [vmem:[%s7365_s1 + $0x328] sm:$0xff]  }
  0x6e   : > { %5602 = vmatpush3.bf16.msra.mxu1 %v6055_v27  ;;  %5581 = vmatprep.subr.bf16.mxu0 %v6056_v28  ;;  %v6107_v27 = vld [vmem:[%s7365_s1 + $0x3a8] sm:$0xff]   ;;  %v6108_v28 = vld [vmem:[%s7365_s1 + $0x370] sm:$0xff]  }
  0x6f   : > { %5603 = vmatprep.subr.bf16.mxu1 %v6057_v29  ;;  %2330 = vmatprep.mubr.bf16.mxu0 %v576_v58  ;;  %v6109_v29 = vld [vmem:[%s7365_s1 + $0x3f0] sm:$0xff]  }
  0x70   : > { %2371 = vmatprep.mubr.bf16.mxu1 %v578_v62  ;;  %v6126_v58 = vld [vmem:[%s7365_s1 + $0x410] sm:$0xff]   ;;  %v6130_v62 = vld [vmem:[%s7365_s1 + $0x418] sm:$0xff]  }
  0x71   : > { %5582 = vmatpush3.bf16.msra.mxu0 %v6058_v30  ;;  %v6110_v30 = vld [vmem:[%s7365_s1 + $0x330] sm:$0xff]  }
  0x72   : > { %5604 = vmatpush3.bf16.msra.mxu1 %v6059_v31  ;;  %5583 = vmatprep.subr.bf16.mxu0 %v6060_v32  ;;  %v6111_v31 = vld [vmem:[%s7365_s1 + $0x3b0] sm:$0xff]   ;;  %v6112_v32 = vld [vmem:[%s7365_s1 + $0x378] sm:$0xff]  }
  0x73   : > { %5605 = vmatprep.subr.bf16.mxu1 %v6061_v33  ;;  %v6113_v33 = vld [vmem:[%s7365_s1 + $0x3f8] sm:$0xff]  }
  0x75   : > { %5584 = vmatpush3.bf16.msra.mxu0 %v6062_v34  ;;  %v6114_v34 = vld [vmem:[%s7365_s1 + $0x338] sm:$0xff]  }
  0x76   : > { %5606 = vmatpush3.bf16.msra.mxu1 %v6063_v35  ;;  %5585 = vmatprep.subr.bf16.mxu0 %v6064_v36  ;;  %v6115_v35 = vld [vmem:[%s7365_s1 + $0x3b8] sm:$0xff]   ;;  %v532_v36 = vld [vmem:[%s6549_s28 + $0x68] sm:$0xff] }
  0x77   : > { %5607 = vmatprep.subr.bf16.mxu1 %v6065_v37  ;;  %v556_v37 = vld [vmem:[%s6549_s28 + $0x128] sm:$0xff] }
  0x79   : > { %5586 = vmatpush3.bf16.msra.mxu0 %v6066_v38  ;;  %v534_v38 = vld [vmem:[%s6549_s28 + $0x78] sm:$0xff] }
  0x7a   : > { %5608 = vmatpush3.bf16.msra.mxu1 %v6067_v39  ;;  %5587 = vmatprep.subr.bf16.mxu0 %v6068_v40  ;;  %v580_v39 = vpack.c.bf16 %v556_v37, %v532_v36  ;;  %v558_v40 = vld [vmem:[%s6549_s28 + $0x138] sm:$0xff]  ;;  %v6156_v36 = vld [vmem:[%s7365_s1 + $0x550] sm:$0xff]  }
  0x7b   : > { %5609 = vmatprep.subr.bf16.mxu1 %v6069_v41  ;;  %v531_v41 = vld [vmem:[%s6549_s28 + $0x60] sm:$0xff]  ;;  %v6157_v37 = vld [vmem:[%s7365_s1 + $0x5d0] sm:$0xff]  }
  0x7d   : > { %5588 = vmatpush3.bf16.msra.mxu0 %v6070_v42  ;;  %v555_v42 = vld [vmem:[%s6549_s28 + $0x120] sm:$0xff] }
  0x7e   : > { %5610 = vmatpush3.bf16.msra.mxu1 %v6071_v43  ;;  %5589 = vmatprep.subr.bf16.mxu0 %v6072_v44  ;;  %v582_v43 = vpack.c.bf16 %v558_v40, %v534_v38  ;;  %v579_v44 = vpack.c.bf16 %v555_v42, %v531_v41  ;;  %v6158_v38 = vld [vmem:[%s7365_s1 + $0x510] sm:$0xff]   ;;  %v6160_v40 = vld [vmem:[%s7365_s1 + $0x558] sm:$0xff]  }
  0x7f   : > { %5611 = vmatprep.subr.bf16.mxu1 %v6073_v45  ;;  %v533_v45 = vld [vmem:[%s6549_s28 + $0x70] sm:$0xff]  ;;  %v6161_v41 = vld [vmem:[%s7365_s1 + $0x5d8] sm:$0xff]  }
  0x80   : > { %v6162_v42 = vld [vmem:[%s7365_s1 + $0x518] sm:$0xff]  }
  0x81   : > { %5590 = vmatpush3.bf16.msra.mxu0 %v6074_v46  ;;  %v557_v46 = vld [vmem:[%s6549_s28 + $0x130] sm:$0xff] }
  0x82   : > { %5612 = vmatpush3.bf16.msra.mxu1 %v6075_v47  ;;  %5591 = vmatprep.subr.bf16.mxu0 %v6076_v48  ;;  %v581_v47 = vpack.c.bf16 %v557_v46, %v533_v45  ;;  %v6116_v48 = vld [vmem:[%s7365_s1 + $0x440] sm:$0xff]  }
  0x83   : > { %5613 = vmatprep.subr.bf16.mxu1 %v6077_v49  ;;  %v6117_v49 = vld [vmem:[%s7365_s1 + $0x4c0] sm:$0xff]  }
  0x84   : > { %v6165_v45 = vld [vmem:[%s7365_s1 + $0x5e0] sm:$0xff]  }
  0x85   : > { %5592 = vmatpush3.bf16.msra.mxu0 %v6078_v50  ;;  %v6118_v50 = vld [vmem:[%s7365_s1 + $0x400] sm:$0xff]  }
  0x86   : > { %5614 = vmatpush3.bf16.msra.mxu1 %v6079_v51  ;;  %5593 = vmatprep.subr.bf16.mxu0 %v6080_v52  ;;  %v6119_v51 = vld [vmem:[%s7365_s1 + $0x480] sm:$0xff]   ;;  %v6120_v52 = vld [vmem:[%s7365_s1 + $0x448] sm:$0xff]  }
  0x87   : > { %5615 = vmatprep.subr.bf16.mxu1 %v6081_v53  ;;  %v6121_v53 = vld [vmem:[%s7365_s1 + $0x4c8] sm:$0xff]   ;;  %v6166_v46 = vld [vmem:[%s7365_s1 + $0x520] sm:$0xff]  }
  0x89   : > { %5594 = vmatpush3.bf16.msra.mxu0 %v6082_v54  ;;  %v6122_v54 = vld [vmem:[%s7365_s1 + $0x408] sm:$0xff]  }
  0x8a   : > { %5616 = vmatpush3.bf16.msra.mxu1 %v6083_v55  ;;  %5623 = vmatprep.subr.bf16.mxu0 %v6084_v4  ;;  %v6123_v55 = vld [vmem:[%s7365_s1 + $0x488] sm:$0xff]  }
  0x8b   : > { %5645 = vmatprep.subr.bf16.mxu1 %v6085_v5  ;;  %v6136_v4 = vld [vmem:[%s7365_s1 + $0x468] sm:$0xff]  }
  0x8c   : > { %2331 = vmatmul.mubr.bf16.vlgmr.msra.gmra.mrb[8].mxu0 %v575_v2  ;;  %v6134_v2 = vld [vmem:[%s7365_s1 + $0x420] sm:$0xff]   ;;  %v6137_v5 = vld [vmem:[%s7365_s1 + $0x4e8] sm:$0xff]  }
  0x8d   : > { %2372 = vmatmul.mubr.bf16.vlgmr.msra.gmra.mrb[8].mxu1 %v577_v3  ;;  %5624 = vmatpush3.bf16.msra.mxu0 %v6086_v6  ;;  %v6135_v3 = vld [vmem:[%s7365_s1 + $0x4a0] sm:$0xff]   ;;  %v6138_v6 = vld [vmem:[%s7365_s1 + $0x428] sm:$0xff]  }
  0x8e   : > { %5646 = vmatpush3.bf16.msra.mxu1 %v6087_v7  ;;  %5625 = vmatprep.subr.bf16.mxu0 %v6088_v8  ;;  %v6139_v7 = vld [vmem:[%s7365_s1 + $0x4a8] sm:$0xff]   ;;  %v6140_v8 = vld [vmem:[%s7365_s1 + $0x470] sm:$0xff]  }
  0x8f   : > { %5647 = vmatprep.subr.bf16.mxu1 %v6089_v9  ;;  %2412 = vmatprep.mubr.bf16.mxu0 %v580_v39  ;;  %v6141_v9 = vld [vmem:[%s7365_s1 + $0x4f0] sm:$0xff]  }
  0x90   : > { %2453 = vmatprep.mubr.bf16.mxu1 %v582_v43  ;;  %v6159_v39 = vld [vmem:[%s7365_s1 + $0x590] sm:$0xff]   ;;  %v6163_v43 = vld [vmem:[%s7365_s1 + $0x598] sm:$0xff]  }
  0x91   : > { %5626 = vmatpush3.bf16.msra.mxu0 %v6090_v10  ;;  %v6142_v10 = vld [vmem:[%s7365_s1 + $0x430] sm:$0xff]  }
  0x92   : > { %5648 = vmatpush3.bf16.msra.mxu1 %v6091_v11  ;;  %5627 = vmatprep.subr.bf16.mxu0 %v6092_v12  ;;  %v6143_v11 = vld [vmem:[%s7365_s1 + $0x4b0] sm:$0xff]   ;;  %v6144_v12 = vld [vmem:[%s7365_s1 + $0x478] sm:$0xff]  }
  0x93   : > { %5649 = vmatprep.subr.bf16.mxu1 %v6093_v13  ;;  %v6145_v13 = vld [vmem:[%s7365_s1 + $0x4f8] sm:$0xff]  }
  0x95   : > { %5628 = vmatpush3.bf16.msra.mxu0 %v6094_v14  ;;  %v6146_v14 = vld [vmem:[%s7365_s1 + $0x438] sm:$0xff]  }
  0x96   : > { %5650 = vmatpush3.bf16.msra.mxu1 %v6095_v15  ;;  %5629 = vmatprep.subr.bf16.mxu0 %v6096_v16  ;;  %v6147_v15 = vld [vmem:[%s7365_s1 + $0x4b8] sm:$0xff]   ;;  %v536_v16 = vld [vmem:[%s6549_s28 + $0x88] sm:$0xff] }
  0x97   : > { %5651 = vmatprep.subr.bf16.mxu1 %v6097_v17  ;;  %v560_v17 = vld [vmem:[%s6549_s28 + $0x148] sm:$0xff] }
  0x99   : > { %5630 = vmatpush3.bf16.msra.mxu0 %v6098_v18  ;;  %v538_v18 = vld [vmem:[%s6549_s28 + $0x98] sm:$0xff] }
  0x9a   : > { %5652 = vmatpush3.bf16.msra.mxu1 %v6099_v19  ;;  %5631 = vmatprep.subr.bf16.mxu0 %v6100_v20  ;;  %v562_v19 = vld [vmem:[%s6549_s28 + $0x158] sm:$0xff]  ;;  %v584_v20 = vpack.c.bf16 %v560_v17, %v536_v16 }
  0x9b   : > { %5653 = vmatprep.subr.bf16.mxu1 %v6101_v21  ;;  %v586_v21 = vpack.c.bf16 %v562_v19, %v538_v18 }
  0x9d   : > { %5632 = vmatpush3.bf16.msra.mxu0 %v6102_v22  ;;  %v535_v22 = vld [vmem:[%s6549_s28 + $0x80] sm:$0xff] }
  0x9e   : > { %5654 = vmatpush3.bf16.msra.mxu1 %v6103_v23  ;;  %5633 = vmatprep.subr.bf16.mxu0 %v6104_v24  ;;  %v559_v23 = vld [vmem:[%s6549_s28 + $0x140] sm:$0xff]  ;;  %v537_v24 = vld [vmem:[%s6549_s28 + $0x90] sm:$0xff] }
  0x9f   : > { %5655 = vmatprep.subr.bf16.mxu1 %v6105_v25  ;;  %v583_v25 = vpack.c.bf16 %v559_v23, %v535_v22 }
  0xa1   : > { %5634 = vmatpush3.bf16.msra.mxu0 %v6106_v26  ;;  %v561_v26 = vld [vmem:[%s6549_s28 + $0x150] sm:$0xff] }
  0xa2   : > { %5656 = vmatpush3.bf16.msra.mxu1 %v6107_v27  ;;  %5635 = vmatprep.subr.bf16.mxu0 %v6108_v28  ;;  %v585_v27 = vpack.c.bf16 %v561_v26, %v537_v24  ;;  %v6148_v28 = vld [vmem:[%s7365_s1 + $0x540] sm:$0xff]   ;;  %v2629_v26 = vld [vmem:[%s7367_s3 + $0x8] sm:$0xff] }
  0xa3   : > { %5657 = vmatprep.subr.bf16.mxu1 %v6109_v29  ;;  %v6149_v29 = vld [vmem:[%s7365_s1 + $0x5c0] sm:$0xff]  }
  0xa5   : > { %5636 = vmatpush3.bf16.msra.mxu0 %v6110_v30  ;;  %v6150_v30 = vld [vmem:[%s7365_s1 + $0x500] sm:$0xff]  }
  0xa6   : > { %5658 = vmatpush3.bf16.msra.mxu1 %v6111_v31  ;;  %5637 = vmatprep.subr.bf16.mxu0 %v6112_v32  ;;  %v6151_v31 = vld [vmem:[%s7365_s1 + $0x580] sm:$0xff]   ;;  %v6152_v32 = vld [vmem:[%s7365_s1 + $0x548] sm:$0xff]  }
  0xa7   : > { %5659 = vmatprep.subr.bf16.mxu1 %v6113_v33  ;;  %v6153_v33 = vld [vmem:[%s7365_s1 + $0x5c8] sm:$0xff]  }
  0xa9   : > { %5638 = vmatpush3.bf16.msra.mxu0 %v6114_v34  ;;  %v6154_v34 = vld [vmem:[%s7365_s1 + $0x508] sm:$0xff]  }
  0xaa   : > { %5660 = vmatpush3.bf16.msra.mxu1 %v6115_v35  ;;  %5667 = vmatprep.subr.bf16.mxu0 %v6116_v48  ;;  %v6155_v35 = vld [vmem:[%s7365_s1 + $0x588] sm:$0xff]  }
  0xab   : > { %5689 = vmatprep.subr.bf16.mxu1 %v6117_v49  ;;  %v6168_v48 = vld [vmem:[%s7365_s1 + $0x568] sm:$0xff]  }
  0xac   : > { %2413 = vmatmul.mubr.bf16.vlgmr.msra.gmra.mrb[12].mxu0 %v579_v44  ;;  %v6164_v44 = vld [vmem:[%s7365_s1 + $0x560] sm:$0xff]   ;;  %v6169_v49 = vld [vmem:[%s7365_s1 + $0x5e8] sm:$0xff]  }
  0xad   : > { %2454 = vmatmul.mubr.bf16.vlgmr.msra.gmra.mrb[12].mxu1 %v581_v47  ;;  %5668 = vmatpush3.bf16.msra.mxu0 %v6118_v50  ;;  %v6167_v47 = vld [vmem:[%s7365_s1 + $0x5a0] sm:$0xff]   ;;  %v6170_v50 = vld [vmem:[%s7365_s1 + $0x528] sm:$0xff]  }
  0xae   : > { %5690 = vmatpush3.bf16.msra.mxu1 %v6119_v51  ;;  %5669 = vmatprep.subr.bf16.mxu0 %v6120_v52  ;;  %v6171_v51 = vld [vmem:[%s7365_s1 + $0x5a8] sm:$0xff]   ;;  %v6172_v52 = vld [vmem:[%s7365_s1 + $0x570] sm:$0xff]  }
  0xaf   : > { %5691 = vmatprep.subr.bf16.mxu1 %v6121_v53  ;;  %2494 = vmatprep.mubr.bf16.mxu0 %v584_v20  ;;  %v6173_v53 = vld [vmem:[%s7365_s1 + $0x5f0] sm:$0xff]  }
  0xb0   : > { %2535 = vmatprep.mubr.bf16.mxu1 %v586_v21 }
  0xb1   : > { %5670 = vmatpush3.bf16.msra.mxu0 %v6122_v54  ;;  %v6174_v54 = vld [vmem:[%s7365_s1 + $0x530] sm:$0xff]  }
  0xb2   : > { %5692 = vmatpush3.bf16.msra.mxu1 %v6123_v55  ;;  %5671 = vmatprep.subr.bf16.mxu0 %v6124_v56  ;;  %v6175_v55 = vld [vmem:[%s7365_s1 + $0x5b0] sm:$0xff]   ;;  %v6176_v56 = vld [vmem:[%s7365_s1 + $0x578] sm:$0xff]  }
  0xb3   : > { %5693 = vmatprep.subr.bf16.mxu1 %v6125_v57  ;;  %v6177_v57 = vld [vmem:[%s7365_s1 + $0x5f8] sm:$0xff]  }
  0xb5   : > { %5672 = vmatpush3.bf16.msra.mxu0 %v6126_v58  ;;  %v6178_v58 = vld [vmem:[%s7365_s1 + $0x538] sm:$0xff]  }
  0xb6   : > { %5694 = vmatpush3.bf16.msra.mxu1 %v6127_v59  ;;  %5673 = vmatprep.subr.bf16.mxu0 %v6128_v60  ;;  %v6179_v59 = vld [vmem:[%s7365_s1 + $0x5b8] sm:$0xff]   ;;  %v540_v60 = vld [vmem:[%s6549_s28 + $0xa8] sm:$0xff] }
  0xb7   : > { %5695 = vmatprep.subr.bf16.mxu1 %v6129_v61  ;;  %v564_v61 = vld [vmem:[%s6549_s28 + $0x168] sm:$0xff] }
  0xb9   : > { %5674 = vmatpush3.bf16.msra.mxu0 %v6130_v62  ;;  %v588_v62 = vpack.c.bf16 %v564_v61, %v540_v60  ;;  %v2641_v60 = vld [vmem:[%s7367_s3 + $0x68] sm:$0xff] }
  0xba   : > { %5696 = vmatpush3.bf16.msra.mxu1 %v6131_v63  ;;  %5675 = vmatprep.subr.bf16.mxu0 %v6132_v0  ;;  %v542_v63 = vld [vmem:[%s6549_s28 + $0xb8] sm:$0xff] }
  0xbb   : > { %5697 = vmatprep.subr.bf16.mxu1 %v6133_v1  ;;  %v566_v0 = vld [vmem:[%s6549_s28 + $0x178] sm:$0xff]  ;;  %v539_v1 = vld [vmem:[%s6549_s28 + $0xa0] sm:$0xff] }
  0xbd   : > { %5676 = vmatpush3.bf16.msra.mxu0 %v6134_v2  ;;  %v590_v2 = vpack.c.bf16 %v566_v0, %v542_v63  ;;  %v2643_v63 = vld [vmem:[%s7367_s3 + $0x78] sm:$0xff] }
  0xbe   : > { %5698 = vmatpush3.bf16.msra.mxu1 %v6135_v3  ;;  %5677 = vmatprep.subr.bf16.mxu0 %v6136_v4  ;;  %v563_v3 = vld [vmem:[%s6549_s28 + $0x160] sm:$0xff]  ;;  %v541_v4 = vld [vmem:[%s6549_s28 + $0xb0] sm:$0xff] }
  0xbf   : > { %5699 = vmatprep.subr.bf16.mxu1 %v6137_v5  ;;  %v565_v5 = vld [vmem:[%s6549_s28 + $0x170] sm:$0xff] }
  0xc1   : > { %5678 = vmatpush3.bf16.msra.mxu0 %v6138_v6  ;;  %v587_v6 = vpack.c.bf16 %v563_v3, %v539_v1  ;;  %v2728_v1 = vld [vmem:[%s7369_s5] sm:$0xff]  ;;  %v2730_v3 = vld [vmem:[%s7369_s5 + $0x10] sm:$0xff] }
  0xc2   : > { %5700 = vmatpush3.bf16.msra.mxu1 %v6139_v7  ;;  %5679 = vmatprep.subr.bf16.mxu0 %v6140_v8  ;;  %v589_v7 = vpack.c.bf16 %v565_v5, %v541_v4  ;;  %v2731_v5 = vld [vmem:[%s7369_s5 + $0x18] sm:$0xff] }
  0xc3   : > { %5701 = vmatprep.subr.bf16.mxu1 %v6141_v9 }
  0xc5   : > { %5680 = vmatpush3.bf16.msra.mxu0 %v6142_v10  ;;  %v5089_v10 = vld [vmem:[%s7366_s2] ss:$0 sm:$0xff] }
  0xc6   : > { %5702 = vmatpush3.bf16.msra.mxu1 %v6143_v11  ;;  %5681 = vmatprep.subr.bf16.mxu0 %v6144_v12 }
  0xc7   : > { %5703 = vmatprep.subr.bf16.mxu1 %v6145_v13 }
  0xc9   : > { %5682 = vmatpush3.bf16.msra.mxu0 %v6146_v14 }
  0xca   : > { %5704 = vmatpush3.bf16.msra.mxu1 %v6147_v15  ;;  %5711 = vmatprep.subr.bf16.mxu0 %v6148_v28 }
  0xcb   : > { %5733 = vmatprep.subr.bf16.mxu1 %v6149_v29  ;;  %v2631_v29 = vld [vmem:[%s7367_s3 + $0x18] sm:$0xff] }
  0xcc   : > { %2495 = vmatmul.mubr.bf16.vlgmr.msra.gmra.mrb[16].mxu0 %v583_v25  ;;  %v2628_v25 = vld [vmem:[%s7367_s3] sm:$0xff] }
  0xcd   : > { %2536 = vmatmul.mubr.bf16.vlgmr.msra.gmra.mrb[16].mxu1 %v585_v27  ;;  %5712 = vmatpush3.bf16.msra.mxu0 %v6150_v30  ;;  %v2630_v27 = vld [vmem:[%s7367_s3 + $0x10] sm:$0xff]  ;;  %v5888_v28 = vpack.c.bf16 %v2629_v26, %v2628_v25 }
  0xce   : > { %5734 = vmatpush3.bf16.msra.mxu1 %v6151_v31  ;;  %5713 = vmatprep.subr.bf16.mxu0 %v6152_v32  ;;  %v5892_v30 = vpack.c.bf16 %v2631_v29, %v2630_v27  ;;  %v2632_v31 = vld [vmem:[%s7367_s3 + $0x20] sm:$0xff]  ;;  %v2633_v32 = vld [vmem:[%s7367_s3 + $0x28] sm:$0xff] }
  0xcf   : > { %5735 = vmatprep.subr.bf16.mxu1 %v6153_v33  ;;  %2576 = vmatprep.mubr.bf16.mxu0 %v588_v62  ;;  %v5896_v33 = vpack.c.bf16 %v2633_v32, %v2632_v31  ;;  %v2642_v62 = vld [vmem:[%s7367_s3 + $0x70] sm:$0xff] }
  0xd0   : > { %2617 = vmatprep.mubr.bf16.mxu1 %v590_v2  ;;  %v5916_v0 = vpack.c.bf16 %v2643_v63, %v2642_v62  ;;  %v2729_v2 = vld [vmem:[%s7369_s5 + $0x8] sm:$0xff] }
  0xd1   : > { %5714 = vmatpush3.bf16.msra.mxu0 %v6154_v34  ;;  %v2634_v34 = vld [vmem:[%s7367_s3 + $0x30] sm:$0xff]  ;;  %v5920_v4 = vpack.c.bf16 %v2729_v2, %v2728_v1 }
  0xd2   : > { %5736 = vmatpush3.bf16.msra.mxu1 %v6155_v35  ;;  %5715 = vmatprep.subr.bf16.mxu0 %v6156_v36  ;;  %v2635_v35 = vld [vmem:[%s7367_s3 + $0x38] sm:$0xff] }
  0xd3   : > { %5737 = vmatprep.subr.bf16.mxu1 %v6157_v37  ;;  %v5900_v36 = vpack.c.bf16 %v2635_v35, %v2634_v34  ;;  %v2636_v37 = vld [vmem:[%s7367_s3 + $0x40] sm:$0xff] }
  0xd5   : > { %5716 = vmatpush3.bf16.msra.mxu0 %v6158_v38  ;;  %v2637_v38 = vld [vmem:[%s7367_s3 + $0x48] sm:$0xff] }
  0xd6   : > { %5738 = vmatpush3.bf16.msra.mxu1 %v6159_v39  ;;  %5717 = vmatprep.subr.bf16.mxu0 %v6160_v40  ;;  %v5904_v39 = vpack.c.bf16 %v2637_v38, %v2636_v37 }
  0xd7   : > { %5739 = vmatprep.subr.bf16.mxu1 %v6161_v41 }
  0xd9   : > { %5718 = vmatpush3.bf16.msra.mxu0 %v6162_v42 }
  0xda   : > { %5740 = vmatpush3.bf16.msra.mxu1 %v6163_v43  ;;  %5719 = vmatprep.subr.bf16.mxu0 %v6164_v44 }
  0xdb   : > { %5741 = vmatprep.subr.bf16.mxu1 %v6165_v45 }
  0xdd   : > { %5720 = vmatpush3.bf16.msra.mxu0 %v6166_v46 }
  0xde   : > { %5742 = vmatpush3.bf16.msra.mxu1 %v6167_v47  ;;  %5721 = vmatprep.subr.bf16.mxu0 %v6168_v48 }
  0xdf   : > { %5743 = vmatprep.subr.bf16.mxu1 %v6169_v49 }
  0xe1   : > { %5722 = vmatpush3.bf16.msra.mxu0 %v6170_v50 }
  0xe2   : > { %5744 = vmatpush3.bf16.msra.mxu1 %v6171_v51  ;;  %5723 = vmatprep.subr.bf16.mxu0 %v6172_v52 }
  0xe3   : > { %5745 = vmatprep.subr.bf16.mxu1 %v6173_v53 }
  0xe5   : > { %5724 = vmatpush3.bf16.msra.mxu0 %v6174_v54 }
  0xe6   : > { %5746 = vmatpush3.bf16.msra.mxu1 %v6175_v55  ;;  %5725 = vmatprep.subr.bf16.mxu0 %v6176_v56  ;;  %v2638_v56 = vld [vmem:[%s7367_s3 + $0x50] sm:$0xff] }
  0xe7   : > { %5747 = vmatprep.subr.bf16.mxu1 %v6177_v57  ;;  %v2639_v57 = vld [vmem:[%s7367_s3 + $0x58] sm:$0xff] }
  0xe9   : > { %5726 = vmatpush3.bf16.msra.mxu0 %v6178_v58  ;;  %v5908_v58 = vpack.c.bf16 %v2639_v57, %v2638_v56 }
  0xea   : > { %5748 = vmatpush3.bf16.msra.mxu1 %v6179_v59  ;;  %5889 = vmatprep.subr.bf16.mxu0 %v5888_v28  ;;  %v2640_v59 = vld [vmem:[%s7367_s3 + $0x60] sm:$0xff] }
  0xeb   : > { %v5912_v61 = vpack.c.bf16 %v2641_v60, %v2640_v59  ;;  %5921 = vmatprep.subr.bf16.mxu1 %v5920_v4 }
  0xec   : > { %2577 = vmatmul.mubr.bf16.vlgmr.msra.gmra.mrb[20].mxu0 %v587_v6  ;;  %v5924_v6 = vpack.c.bf16 %v2731_v5, %v2730_v3 }
  0xed   : > { %2618 = vmatmul.mubr.bf16.vlgmr.msra.gmra.mrb[20].mxu1 %v589_v7  ;;  %5891 = vmatpush3.bf16.msra.mxu0 %v5888_v28  ;;  %v2732_v7 = vld [vmem:[%s7369_s5 + $0x20] sm:$0xff] }
  0xee   : > { %5893 = vmatprep.subr.bf16.mxu0 %v5892_v30  ;;  %5923 = vmatpush3.bf16.msra.mxu1 %v5920_v4 }
  0xef   : > { %5925 = vmatprep.subr.bf16.mxu1 %v5924_v6 }
  0xf1   : > { %5895 = vmatpush3.bf16.msra.mxu0 %v5892_v30 }
  0xf2   : > { %5897 = vmatprep.subr.bf16.mxu0 %v5896_v33  ;;  %5927 = vmatpush3.bf16.msra.mxu1 %v5924_v6 }
  0xf5   : > { %5899 = vmatpush3.bf16.msra.mxu0 %v5896_v33 }
  0xf6   : > { %5901 = vmatprep.subr.bf16.mxu0 %v5900_v36 }
  0xf9   : > { %5903 = vmatpush3.bf16.msra.mxu0 %v5900_v36 }
  0xfa   : > { %5905 = vmatprep.subr.bf16.mxu0 %v5904_v39 }
  0xfd   : > { %5907 = vmatpush3.bf16.msra.mxu0 %v5904_v39 }
  0xfe   : > { %5909 = vmatprep.subr.bf16.mxu0 %v5908_v58 }
 0x101   : > { %5911 = vmatpush3.bf16.msra.mxu0 %v5908_v58 }
 0x102   : > { %5913 = vmatprep.subr.bf16.mxu0 %v5912_v61 }
 0x105   : > { %5915 = vmatpush3.bf16.msra.mxu0 %v5912_v61 }
 0x106   : > { %5917 = vmatprep.subr.bf16.mxu0 %v5916_v0 }
 0x109   : > { %5919 = vmatpush3.bf16.msra.mxu0 %v5916_v0 }
 0x11f   : > { %v5507_v8 = vpop.f32.mrb[0].mxu0 }
 0x120   : > { %v5529_v9 = vpop.f32.mrb[0].mxu1  ;;  %v5508_v11 = vpop.f32.mrb[1].mxu0 }
 0x121   : > { %v5509_v12 = vadd.f32 %v5508_v11, %v5507_v8  ;;  %v5530_v13 = vpop.f32.mrb[1].mxu1  ;;  %v5510_v14 = vpop.f32.mrb[2].mxu0  ;;  %v2733_v8 = vld [vmem:[%s7369_s5 + $0x28] sm:$0xff] }
 0x122   : > { %v5531_v15 = vadd.f32 %v5530_v13, %v5529_v9  ;;  %v5532_v16 = vpop.f32.mrb[2].mxu1  ;;  %v5511_v17 = vpop.f32.mrb[3].mxu0  ;;  %v5928_v9 = vpack.c.bf16 %v2733_v8, %v2732_v7 }
 0x123   : > { %v2169_v18 = vadd.f32 %v5509_v12, %v5089_v10  ;;  %v5512_v19 = vadd.f32 %v5511_v17, %v5510_v14  ;;  %v5533_v20 = vpop.f32.mrb[3].mxu1 }
 0x124   : > { %v5534_v21 = vadd.f32 %v5533_v20, %v5532_v16  ;;  %5929 = vmatprep.subr.bf16.mxu1 %v5928_v9 }
 0x125   : > { %v2210_v22 = vadd.f32 %v5531_v15, %v2169_v18  ;;  %v2172_v23 = vadd.f32 %v5512_v19, %v5089_v10  ;;  %5931 = vmatpush3.bf16.msra.mxu1 %v5928_v9 }
 0x127   : > { %v2213_v24 = vadd.f32 %v5534_v21, %v2172_v23 }
 0x13f   : > { %v5551_v40 = vpop.f32.mrb[4].mxu0 }
 0x140   : > { %v5573_v41 = vpop.f32.mrb[4].mxu1  ;;  %v5552_v42 = vpop.f32.mrb[5].mxu0 }
 0x141   : > { %v5553_v43 = vadd.f32 %v5552_v42, %v5551_v40  ;;  %v5574_v44 = vpop.f32.mrb[5].mxu1  ;;  %v5554_v45 = vpop.f32.mrb[6].mxu0 }
 0x142   : > { %v5575_v46 = vadd.f32 %v5574_v44, %v5573_v41  ;;  %v5576_v47 = vpop.f32.mrb[6].mxu1  ;;  %v5555_v48 = vpop.f32.mrb[7].mxu0 }
 0x143   : > { %v2251_v49 = vadd.f32 %v5553_v43, %v2210_v22  ;;  %v5556_v50 = vadd.f32 %v5555_v48, %v5554_v45  ;;  %v5577_v51 = vpop.f32.mrb[7].mxu1 }
 0x144   : > { %v5578_v52 = vadd.f32 %v5577_v51, %v5576_v47 }
 0x145   : > { %v2292_v53 = vadd.f32 %v5575_v46, %v2251_v49  ;;  %v2254_v54 = vadd.f32 %v5556_v50, %v2213_v24 }
 0x147   : > { %v2295_v55 = vadd.f32 %v5578_v52, %v2254_v54 }
 0x15f   : > { %v5595_v10 = vpop.f32.mrb[8].mxu0 }
 0x160   : > { %v5617_v11 = vpop.f32.mrb[8].mxu1  ;;  %v5596_v12 = vpop.f32.mrb[9].mxu0 }
 0x161   : > { %v5618_v13 = vpop.f32.mrb[9].mxu1  ;;  %v5597_v14 = vadd.f32 %v5596_v12, %v5595_v10  ;;  %v5598_v16 = vpop.f32.mrb[10].mxu0  ;;  %v2734_v12 = vld [vmem:[%s7369_s5 + $0x30] sm:$0xff] }
 0x162   : > { %v5619_v15 = vadd.f32 %v5618_v13, %v5617_v11  ;;  %v5620_v17 = vpop.f32.mrb[10].mxu1  ;;  %v5599_v18 = vpop.f32.mrb[11].mxu0  ;;  %v2735_v13 = vld [vmem:[%s7369_s5 + $0x38] sm:$0xff] }
 0x163   : > { %v5621_v19 = vpop.f32.mrb[11].mxu1  ;;  %v2333_v20 = vadd.f32 %v5597_v14, %v2292_v53  ;;  %v5600_v21 = vadd.f32 %v5599_v18, %v5598_v16  ;;  %v5932_v14 = vpack.c.bf16 %v2735_v13, %v2734_v12  ;;  %v3226_v12 = vld [vmem:[#allocation2 + $0x360] sm:$0xff] }
 0x164   : > { %v5622_v22 = vadd.f32 %v5621_v19, %v5620_v17 }
 0x165   : > { %v2374_v23 = vadd.f32 %v5619_v15, %v2333_v20  ;;  %v2336_v24 = vadd.f32 %v5600_v21, %v2295_v55  ;;  %5933 = vmatprep.subr.bf16.mxu1 %v5932_v14  ;;  %v5282_v15 = vld [vmem:[%s7368_s4] ss:$0 sm:$0xff] }
 0x166   : > { %5935 = vmatpush3.bf16.msra.mxu1 %v5932_v14 }
 0x167   : > { %v2377_v25 = vadd.f32 %v5622_v22, %v2336_v24  ;;  %v2827_v22 = vld [vmem:[%s7371_s7] sm:$0xff] }
 0x17f   : > { %v5639_v26 = vpop.f32.mrb[12].mxu0 }
 0x180   : > { %v5661_v27 = vpop.f32.mrb[12].mxu1  ;;  %v5640_v28 = vpop.f32.mrb[13].mxu0 }
 0x181   : > { %v5641_v29 = vadd.f32 %v5640_v28, %v5639_v26  ;;  %v5662_v30 = vpop.f32.mrb[13].mxu1  ;;  %v5642_v31 = vpop.f32.mrb[14].mxu0  ;;  %v5283_v26 = vld [vmem:[%s7370_s6] ss:$0 sm:$0xff] }
 0x182   : > { %v5663_v32 = vadd.f32 %v5662_v30, %v5661_v27  ;;  %v5664_v33 = vpop.f32.mrb[14].mxu1  ;;  %v5643_v34 = vpop.f32.mrb[15].mxu0 }
 0x183   : > { %v2415_v35 = vadd.f32 %v5641_v29, %v2374_v23  ;;  %v5644_v36 = vadd.f32 %v5643_v34, %v5642_v31  ;;  %v5665_v37 = vpop.f32.mrb[15].mxu1  ;;  %v2828_v23 = vld [vmem:[%s7371_s7 + $0x8] sm:$0xf] }
 0x184   : > { %v5666_v38 = vadd.f32 %v5665_v37, %v5664_v33  ;;  %v5936_v24 = vpack.c.bf16 %v2828_v23, %v2827_v22  ;;  %v2924_v33 = vld [vmem:[%s7373_s9] sm:$0xff]  ;;  %v2925_v34 = vld [vmem:[%s7373_s9 + $0x8] sm:$0xf] }
 0x185   : > { %v2456_v39 = vadd.f32 %v5663_v32, %v2415_v35  ;;  %v2418_v40 = vadd.f32 %v5644_v36, %v2377_v25  ;;  %v5942_v35 = vpack.c.bf16 %v2925_v34, %v2924_v33  ;;  %v3019_v36 = vld [vmem:[%s7375_s11] sm:$0xff]  ;;  %v3020_v37 = vld [vmem:[%s7375_s11 + $0x8] sm:$0xff] }
 0x186   : > { %5938 = vmatprep.subr.msk.bf16.mxu0 %vm7171_vm3, %v5936_v24  ;;  %v5290_v23 = vld [vmem:[%s7374_s10] ss:$0 sm:$0xff]  ;;  %v3167_v33 = vld [vmem:[#allocation2 + $0x188] sm:$0xff] }
 0x187   : > { %v2459_v41 = vadd.f32 %v5666_v38, %v2418_v40  ;;  %5944 = vmatprep.subr.msk.bf16.mxu1 %vm7171_vm3, %v5942_v35  ;;  %v5948_v38 = vpack.c.bf16 %v3020_v37, %v3019_v36  ;;  %v3179_v34 = vld [vmem:[#allocation2 + $0x1e8] sm:$0xff] }
 0x188   : > { %v5348_v36 = vcombine.high %v3167_v33, %v3179_v34  ;;  %v3191_v37 = vld [vmem:[#allocation2 + $0x248] sm:$0xff] }
 0x19f   : > { %v5683_v42 = vpop.f32.mrb[16].mxu0 }
 0x1a0   : > { %v5705_v43 = vpop.f32.mrb[16].mxu1  ;;  %v5684_v44 = vpop.f32.mrb[17].mxu0 }
 0x1a1   : > { %v5685_v45 = vadd.f32 %v5684_v44, %v5683_v42  ;;  %v5706_v46 = vpop.f32.mrb[17].mxu1  ;;  %v5686_v47 = vpop.f32.mrb[18].mxu0  ;;  %v3021_v44 = vld [vmem:[%s7375_s11 + $0x10] sm:$0xff] }
 0x1a2   : > { %v5707_v48 = vadd.f32 %v5706_v46, %v5705_v43  ;;  %v5708_v49 = vpop.f32.mrb[18].mxu1  ;;  %v5687_v50 = vpop.f32.mrb[19].mxu0 }
 0x1a3   : > { %v2497_v51 = vadd.f32 %v5685_v45, %v2456_v39  ;;  %v5688_v52 = vadd.f32 %v5687_v50, %v5686_v47  ;;  %v5709_v53 = vpop.f32.mrb[19].mxu1  ;;  %v5286_v39 = vld [vmem:[%s7372_s8] ss:$0 sm:$0xff]  ;;  %v3022_v45 = vld [vmem:[%s7375_s11 + $0x18] sm:$0xff]  ;;  %v3024_v50 = vld [vmem:[%s7375_s11 + $0x28] sm:$0xff] }
 0x1a4   : > { %v5710_v54 = vadd.f32 %v5709_v53, %v5708_v49  ;;  %v3023_v49 = vld [vmem:[%s7375_s11 + $0x20] sm:$0xff]  ;;  %v3026_v53 = vld [vmem:[%s7375_s11 + $0x38] sm:$0xff] }
 0x1a5   : > { %v2538_v55 = vadd.f32 %v5707_v48, %v2497_v51  ;;  %v2500_v56 = vadd.f32 %v5688_v52, %v2459_v41  ;;  %v5952_v48 = vpack.c.bf16 %v3022_v45, %v3021_v44  ;;  %v5956_v51 = vpack.c.bf16 %v3024_v50, %v3023_v49  ;;  %v3025_v52 = vld [vmem:[%s7375_s11 + $0x30] sm:$0xff]  ;;  %v3239_v45 = vld [vmem:[#allocation2 + $0x3c8] sm:$0xff] }
 0x1a6   : > { %v3263_v49 = vld [vmem:[#allocation2 + $0x488] sm:$0xff] }
 0x1a7   : > { %v2541_v57 = vadd.f32 %v5710_v54, %v2500_v56  ;;  %v5960_v54 = vpack.c.bf16 %v3026_v53, %v3025_v52  ;;  %v3130_v56 = vld [vmem:[#allocation2 + $0x60] sm:$0xff]  ;;  %v3275_v50 = vld [vmem:[#allocation2 + $0x4e8] sm:$0xff] }
 0x1a8   : > { %v5444_v52 = vcombine.high %v3263_v49, %v3275_v50  ;;  %v5443_v53 = vcombine.low %v3263_v49, %v3275_v50 }
 0x1bf   : > { %v5727_v58 = vpop.f32.mrb[20].mxu0 }
 0x1c0   : > { %v5749_v59 = vpop.f32.mrb[20].mxu1  ;;  %v5728_v60 = vpop.f32.mrb[21].mxu0 }
 0x1c1   : > { %v5750_v61 = vpop.f32.mrb[21].mxu1  ;;  %v5729_v62 = vadd.f32 %v5728_v60, %v5727_v58  ;;  %v5730_v0 = vpop.f32.mrb[22].mxu0  ;;  %v3131_v60 = vld [vmem:[#allocation2 + $0x68] sm:$0xff] }
 0x1c2   : > { %v5751_v63 = vadd.f32 %v5750_v61, %v5749_v59  ;;  %v5752_v1 = vpop.f32.mrb[22].mxu1  ;;  %v5731_v2 = vpop.f32.mrb[23].mxu0  ;;  %v3142_v61 = vld [vmem:[#allocation2 + $0xc0] sm:$0xff] }
 0x1c3   : > { %v5753_v3 = vpop.f32.mrb[23].mxu1  ;;  %v2579_v4 = vadd.f32 %v5729_v62, %v2538_v55  ;;  %v5732_v5 = vadd.f32 %v5731_v2, %v5730_v0  ;;  %v3118_v55 = vld [vmem:[#allocation2] sm:$0xff] }
 0x1c4   : > { %v5754_v6 = vadd.f32 %v5753_v3, %v5752_v1  ;;  %v5297_v58 = vcombine.low %v3118_v55, %v3130_v56  ;;  %v5298_v59 = vcombine.high %v3118_v55, %v3130_v56  ;;  %v3154_v62 = vld [vmem:[#allocation2 + $0x120] sm:$0xff] }
 0x1c5   : > { %v2620_v7 = vadd.f32 %v5751_v63, %v2579_v4  ;;  %v2582_v8 = vadd.f32 %v5732_v5, %v2541_v57  ;;  %v3119_v57 = vld [vmem:[#allocation2 + $0x8] sm:$0xff]  ;;  %v5322_v1 = vcombine.high %v3142_v61, %v3154_v62  ;;  %v5321_v2 = vcombine.low %v3142_v61, %v3154_v62  ;;  %v3166_v3 = vld [vmem:[#allocation2 + $0x180] sm:$0xff]  ;;  %v3120_v62 = vld [vmem:[#allocation2 + $0x10] sm:$0xff] }
 0x1c6   : > { %v5299_v63 = vcombine.low %v3119_v57, %v3131_v60  ;;  %v5300_v0 = vcombine.high %v3119_v57, %v3131_v60  ;;  %v3178_v4 = vld [vmem:[#allocation2 + $0x1e0] sm:$0xff]  ;;  %v3287_v57 = vld [vmem:[#allocation2 + $0x548] sm:$0xff] }
 0x1c7   : > { %v2626_v9 = vmax.f32 %v2620_v7, 0.0  ;;  %v2623_v10 = vadd.f32 %v5754_v6, %v2582_v8  ;;  %v5346_v5 = vcombine.high %v3166_v3, %v3178_v4  ;;  %v5345_v6 = vcombine.low %v3166_v3, %v3178_v4  ;;  %v3190_v7 = vld [vmem:[#allocation2 + $0x240] sm:$0xff] }
 0x1c8   : > { %v3202_v8 = vld [vmem:[#allocation2 + $0x2a0] sm:$0xff] }
 0x1c9   : > { %v2627_v11 = vmax.f32 %v2623_v10, 0.0  ;;  %5833 = vmatprep.mubr.f32.mxu0 %v2626_v9  ;;  %v5370_v9 = vcombine.high %v3190_v7, %v3202_v8  ;;  %v5369_v10 = vcombine.low %v3190_v7, %v3202_v8  ;;  %v3298_v55 = vld [vmem:[#allocation2 + $0x5a0] sm:$0xff] }
 0x1ca   : > { %v5294_v7 = vld [vmem:[%s7376_s12] ss:$0 sm:$0xff] }
 0x1cb   : > { %5834 = vmatmul.mubr.f32.vlgmr.msra.gmra.mrb[24].mxu0 %v2627_v11  ;;  %v3214_v11 = vld [vmem:[#allocation2 + $0x300] sm:$0xff] }
 0x1cc   : > { %5941 = vmatpush3.bf16.msk.msra.mxu0 %vm7171_vm3, %v5936_v24  ;;  %v5394_v13 = vcombine.high %v3214_v11, %v3226_v12  ;;  %v5393_v14 = vcombine.low %v3214_v11, %v3226_v12  ;;  %v3144_v12 = vld [vmem:[#allocation2 + $0xd0] sm:$0xff] }
 0x1cd   : > { %4396 = vmatprep.subr.bf16.mxu0 %v5298_v59 }
 0x29e   : > { %v5835_v16 = vpop.f32.mrb[24].mxu0 }
 0x29f   : > { %v2723_v17 = vadd.f32 %v5835_v16, %v5282_v15  ;;  %v2717_v18 = vpop.f32.mrb[25].mxu0  ;;  %v3250_v16 = vld [vmem:[#allocation2 + $0x420] sm:$0xff] }
 0x2a0   : > { %v2718_v19 = vadd.f32 %v5282_v15, %v2717_v18  ;;  %v3238_v15 = vld [vmem:[#allocation2 + $0x3c0] sm:$0xff] }
 0x2a1   : > { %v2727_v21 = vmax.f32 %v2723_v17, 0.0  ;;  %v5418_v17 = vcombine.high %v3238_v15, %v3250_v16  ;;  %v5417_v18 = vcombine.low %v3238_v15, %v3250_v16  ;;  %v3145_v15 = vld [vmem:[#allocation2 + $0xd8] sm:$0xff] }
 0x2a2   : > { %v2726_v20 = vmax.f32 %v2718_v19, 0.0  ;;  %v3262_v19 = vld [vmem:[#allocation2 + $0x480] sm:$0xff]  ;;  %v3157_v16 = vld [vmem:[#allocation2 + $0x138] sm:$0xff] }
 0x2a4   : > { %5852 = vmatprep.mubr.msk.f32.mxu1 %vm2743_vm0, %v2726_v20  ;;  %v3274_v20 = vld [vmem:[#allocation2 + $0x4e0] sm:$0xff] }
 0x2a5   : > { %5853 = vmatmul.mubr.msk.f32.vlgmr.msra.gmra.mrb[24].mxu1 %vm2743_vm0, %v2727_v21  ;;  %v5442_v21 = vcombine.high %v3262_v19, %v3274_v20  ;;  %v5441_v22 = vcombine.low %v3262_v19, %v3274_v20  ;;  %v5328_v20 = vcombine.high %v3145_v15, %v3157_v16 }
 0x2a6   : > { %5947 = vmatpush3.bf16.msk.msra.mxu1 %vm7171_vm3, %v5942_v35 }
 0x2a7   : > { %5949 = vmatprep.subr.bf16.mxu1 %v5948_v38 }
 0x378   : > { %v5854_v27 = vpop.f32.mrb[24].mxu1 }
 0x379   : > { %v2822_v28 = vadd.f32 %v5854_v27, %v5283_v26  ;;  %v2816_v29 = vpop.f32.mrb[25].mxu1 }
 0x37a   : > { %v2817_v30 = vadd.f32 %v5283_v26, %v2816_v29  ;;  %v3155_v29 = vld [vmem:[#allocation2 + $0x128] sm:$0xff] }
 0x37b   : > { %v2826_v32 = vmax.f32 %v2822_v28, 0.0  ;;  %v3143_v28 = vld [vmem:[#allocation2 + $0xc8] sm:$0xff] }
 0x37c   : > { %v2825_v31 = vmax.f32 %v2817_v30, 0.0  ;;  %v5323_v35 = vcombine.low %v3143_v28, %v3155_v29 }
 0x37e   : > { %5859 = vmatprep.mubr.msk.f32.mxu0 %vm2836_vm4, %v2825_v31 }
 0x37f   : > { %5860 = vmatmul.mubr.msk.f32.vlgmr.msra.gmra.mrb[26].mxu0 %vm2836_vm4, %v2826_v32  ;;  %v5324_v32 = vcombine.high %v3143_v28, %v3155_v29  ;;  %v3192_v29 = vld [vmem:[#allocation2 + $0x250] sm:$0xff] }
 0x380   : > { %4397 = vmatpush1.bf16.msra.mxu0 %v5297_v58  ;;  %v3299_v58 = vld [vmem:[#allocation2 + $0x5a8] sm:$0xff] }
 0x381   : > { %4398 = vmatprep.subr.bf16.mxu0 %v5322_v1  ;;  %v5467_v60 = vcombine.low %v3287_v57, %v3299_v58  ;;  %v5468_v61 = vcombine.high %v3287_v57, %v3299_v58 }
 0x384   : > { %4399 = vmatpush1.bf16.msra.mxu0 %v5321_v2  ;;  %v3133_v2 = vld [vmem:[#allocation2 + $0x78] sm:$0xff] }
 0x385   : > { %4400 = vmatprep.subr.bf16.mxu0 %v5346_v5 }
 0x388   : > { %4401 = vmatpush1.bf16.msra.mxu0 %v5345_v6  ;;  %v6320_v6 = vmov 0  }
 0x389   : > { %4402 = vmatprep.subr.bf16.mxu0 %v5370_v9  ;;  %4428 = vmatprep.mubr.bf16.mxu0 %v6320_v6 }
 0x38c   : > { %4403 = vmatpush1.bf16.msra.mxu0 %v5369_v10 }
 0x38d   : > { %4404 = vmatprep.subr.bf16.mxu0 %v5394_v13 }
 0x390   : > { %4405 = vmatpush1.bf16.msra.mxu0 %v5393_v14  ;;  %v3156_v14 = vld [vmem:[#allocation2 + $0x130] sm:$0xff] }
 0x391   : > { %4406 = vmatprep.subr.bf16.mxu0 %v5418_v17  ;;  %v5326_v19 = vcombine.high %v3144_v12, %v3156_v14 }
 0x394   : > { %4407 = vmatpush1.bf16.msra.mxu0 %v5417_v18 }
 0x395   : > { %4408 = vmatprep.subr.bf16.mxu0 %v5442_v21  ;;  %v3168_v21 = vld [vmem:[#allocation2 + $0x190] sm:$0xff] }
 0x398   : > { %4409 = vmatpush1.bf16.msra.mxu0 %v5441_v22  ;;  %v3180_v22 = vld [vmem:[#allocation2 + $0x1f0] sm:$0xff] }
 0x452   : > { %v5861_v40 = vpop.f32.mrb[26].mxu0 }
 0x453   : > { %v2919_v41 = vadd.f32 %v5861_v40, %v5286_v39  ;;  %v2913_v42 = vpop.f32.mrb[27].mxu0 }
 0x454   : > { %v2914_v43 = vadd.f32 %v5286_v39, %v2913_v42  ;;  %v5347_v39 = vcombine.low %v3167_v33, %v3179_v34  ;;  %v3227_v42 = vld [vmem:[#allocation2 + $0x368] sm:$0xff]  ;;  %v5349_v33 = vcombine.low %v3168_v21, %v3180_v22 }
 0x455   : > { %v2923_v47 = vmax.f32 %v2919_v41, 0.0  ;;  %v3215_v41 = vld [vmem:[#allocation2 + $0x308] sm:$0xff] }
 0x456   : > { %v2922_v46 = vmax.f32 %v2914_v43, 0.0  ;;  %v5396_v44 = vcombine.high %v3215_v41, %v3227_v42 }
 0x458   : > { %5866 = vmatprep.mubr.msk.f32.mxu1 %vm2836_vm4, %v2922_v46  ;;  %v3251_v46 = vld [vmem:[#allocation2 + $0x428] sm:$0xff] }
 0x459   : > { %5867 = vmatmul.mubr.msk.f32.vlgmr.msra.gmra.mrb[26].mxu1 %vm2836_vm4, %v2923_v47  ;;  %v5395_v47 = vcombine.low %v3215_v41, %v3227_v42 }
 0x45a   : > { %5951 = vmatpush3.bf16.msra.mxu1 %v5948_v38  ;;  %v3203_v38 = vld [vmem:[#allocation2 + $0x2a8] sm:$0xff] }
 0x45b   : > { %5953 = vmatprep.subr.bf16.mxu1 %v5952_v48  ;;  %v5372_v40 = vcombine.high %v3191_v37, %v3203_v38  ;;  %v5371_v43 = vcombine.low %v3191_v37, %v3203_v38  ;;  %v3216_v37 = vld [vmem:[#allocation2 + $0x310] sm:$0xff] }
 0x45c   : > { %v3228_v38 = vld [vmem:[#allocation2 + $0x370] sm:$0xff] }
 0x45d   : > { %v5397_v49 = vcombine.low %v3216_v37, %v3228_v38 }
 0x45e   : > { %5955 = vmatpush3.bf16.msra.mxu1 %v5952_v48  ;;  %v5420_v48 = vcombine.high %v3239_v45, %v3251_v46 }
 0x45f   : > { %5957 = vmatprep.subr.bf16.mxu1 %v5956_v51 }
 0x462   : > { %5959 = vmatpush3.bf16.msra.mxu1 %v5956_v51  ;;  %v5419_v51 = vcombine.low %v3239_v45, %v3251_v46  ;;  %v3240_v45 = vld [vmem:[#allocation2 + $0x3d0] sm:$0xff] }
 0x463   : > { %5961 = vmatprep.subr.bf16.mxu1 %v5960_v54  ;;  %v3252_v46 = vld [vmem:[#allocation2 + $0x430] sm:$0xff] }
 0x464   : > { %v5421_v57 = vcombine.low %v3240_v45, %v3252_v46 }
 0x466   : > { %5963 = vmatpush3.bf16.msra.mxu1 %v5960_v54  ;;  %v3286_v54 = vld [vmem:[#allocation2 + $0x540] sm:$0xff] }
 0x467   : > { %4439 = vmatprep.subr.bf16.mxu1 %v5300_v0  ;;  %v5466_v56 = vcombine.high %v3286_v54, %v3298_v55  ;;  %v5465_v59 = vcombine.low %v3286_v54, %v3298_v55  ;;  %v3121_v0 = vld [vmem:[#allocation2 + $0x18] sm:$0xff]  ;;  %v3276_v54 = vld [vmem:[#allocation2 + $0x4f0] sm:$0xff] }
 0x468   : > { %v5303_v4 = vcombine.low %v3121_v0, %v3133_v2  ;;  %v5304_v5 = vcombine.high %v3121_v0, %v3133_v2  ;;  %v3265_v55 = vld [vmem:[#allocation2 + $0x498] sm:$0xff] }
 0x469   : > { %4410 = vmatprep.subr.bf16.mxu0 %v5466_v56  ;;  %v3277_v56 = vld [vmem:[#allocation2 + $0x4f8] sm:$0xff] }
 0x46a   : > { %4411 = vmatpush1.bf16.msra.mxu0 %v5465_v59  ;;  %v3301_v0 = vld [vmem:[#allocation2 + $0x5b8] sm:$0xff]  ;;  %v5447_v2 = vcombine.low %v3265_v55, %v3277_v56 }
 0x52c   : > { %v5868_v24 = vpop.f32.mrb[26].mxu1 }
 0x52d   : > { %v3014_v25 = vadd.f32 %v5868_v24, %v5290_v23  ;;  %v3008_v26 = vpop.f32.mrb[27].mxu1  ;;  %v3181_v24 = vld [vmem:[#allocation2 + $0x1f8] sm:$0xff] }
 0x52e   : > { %v3009_v27 = vadd.f32 %v5290_v23, %v3008_v26  ;;  %v3169_v23 = vld [vmem:[#allocation2 + $0x198] sm:$0xff]  ;;  %v5327_v26 = vcombine.low %v3145_v15, %v3157_v16  ;;  %v3158_v15 = vld [vmem:[#allocation2 + $0x140] sm:$0xff]  ;;  %v3147_v16 = vld [vmem:[#allocation2 + $0xe8] sm:$0xff] }
 0x52f   : > { %v3018_v31 = vmax.f32 %v3014_v25, 0.0  ;;  %v5325_v25 = vcombine.low %v3144_v12, %v3156_v14  ;;  %v5352_v28 = vcombine.high %v3169_v23, %v3181_v24  ;;  %v5351_v34 = vcombine.low %v3169_v23, %v3181_v24  ;;  %v3146_v14 = vld [vmem:[#allocation2 + $0xe0] sm:$0xff] }
 0x530   : > { %v3017_v30 = vmax.f32 %v3009_v27, 0.0  ;;  %v5350_v27 = vcombine.high %v3168_v21, %v3180_v22  ;;  %v5330_v21 = vcombine.high %v3146_v14, %v3158_v15  ;;  %v3170_v23 = vld [vmem:[#allocation2 + $0x1a0] sm:$0xff] }
 0x531   : > { %v3182_v24 = vld [vmem:[#allocation2 + $0x200] sm:$0xff] }
 0x532   : > { %5885 = vmatprep.mubr.msk.f32.mxu1 %vm2743_vm0, %v3017_v30  ;;  %v3204_v30 = vld [vmem:[#allocation2 + $0x2b0] sm:$0xff] }
 0x533   : > { %5886 = vmatmul.mubr.msk.f32.vlgmr.msra.gmra.mrb[28].mxu1 %vm2743_vm0, %v3018_v31  ;;  %v3193_v31 = vld [vmem:[#allocation2 + $0x258] sm:$0xff]  ;;  %v5373_v41 = vcombine.low %v3192_v29, %v3204_v30 }
 0x534   : > { %4440 = vmatpush1.bf16.msra.mxu1 %v5299_v63  ;;  %v3132_v63 = vld [vmem:[#allocation2 + $0x70] sm:$0xff]  ;;  %4471 = vmatprep.mubr.bf16.mxu1 %v6320_v6 }
 0x535   : > { %4441 = vmatprep.subr.bf16.mxu1 %v5324_v32  ;;  %v5302_v1 = vcombine.high %v3120_v62, %v3132_v63  ;;  %v5301_v3 = vcombine.low %v3120_v62, %v3132_v63  ;;  %v3205_v32 = vld [vmem:[#allocation2 + $0x2b8] sm:$0xff]  ;;  %v3300_v62 = vld [vmem:[#allocation2 + $0x5b0] sm:$0xff] }
 0x536   : > { %v5375_v42 = vcombine.low %v3193_v31, %v3205_v32  ;;  %v3289_v63 = vld [vmem:[#allocation2 + $0x558] sm:$0xff] }
 0x537   : > { %4482 = vmatprep.subr.bf16.mxu0 %v5302_v1 }
 0x538   : > { %4442 = vmatpush1.bf16.msra.mxu1 %v5323_v35  ;;  %v5374_v35 = vcombine.high %v3192_v29, %v3204_v30  ;;  %v5354_v29 = vcombine.high %v3170_v23, %v3182_v24 }
 0x539   : > { %4443 = vmatprep.subr.bf16.mxu1 %v5348_v36  ;;  %v5376_v36 = vcombine.high %v3193_v31, %v3205_v32  ;;  %v3194_v31 = vld [vmem:[#allocation2 + $0x260] sm:$0xff] }
 0x53a   : > { %v3206_v32 = vld [vmem:[#allocation2 + $0x2c0] sm:$0xff] }
 0x53c   : > { %4444 = vmatpush1.bf16.msra.mxu1 %v5347_v39  ;;  %v3217_v39 = vld [vmem:[#allocation2 + $0x318] sm:$0xff] }
 0x53d   : > { %4445 = vmatprep.subr.bf16.mxu1 %v5372_v40  ;;  %v3229_v40 = vld [vmem:[#allocation2 + $0x378] sm:$0xff] }
 0x53e   : > { %v5399_v50 = vcombine.low %v3217_v39, %v3229_v40 }
 0x540   : > { %4446 = vmatpush1.bf16.msra.mxu1 %v5371_v43  ;;  %v5398_v43 = vcombine.high %v3216_v37, %v3228_v38  ;;  %v5378_v37 = vcombine.high %v3194_v31, %v3206_v32 }
 0x541   : > { %4447 = vmatprep.subr.bf16.mxu1 %v5396_v44  ;;  %v5400_v44 = vcombine.high %v3217_v39, %v3229_v40  ;;  %v3218_v39 = vld [vmem:[#allocation2 + $0x320] sm:$0xff] }
 0x542   : > { %v3230_v40 = vld [vmem:[#allocation2 + $0x380] sm:$0xff] }
 0x544   : > { %4448 = vmatpush1.bf16.msra.mxu1 %v5395_v47  ;;  %v3241_v47 = vld [vmem:[#allocation2 + $0x3d8] sm:$0xff] }
 0x545   : > { %4449 = vmatprep.subr.bf16.mxu1 %v5420_v48  ;;  %v3253_v48 = vld [vmem:[#allocation2 + $0x438] sm:$0xff] }
 0x546   : > { %v5423_v58 = vcombine.low %v3241_v47, %v3253_v48 }
 0x548   : > { %4450 = vmatpush1.bf16.msra.mxu1 %v5419_v51  ;;  %v5422_v51 = vcombine.high %v3240_v45, %v3252_v46  ;;  %v5402_v45 = vcombine.high %v3218_v39, %v3230_v40 }
 0x549   : > { %4451 = vmatprep.subr.bf16.mxu1 %v5444_v52  ;;  %v5424_v52 = vcombine.high %v3241_v47, %v3253_v48  ;;  %v3242_v47 = vld [vmem:[#allocation2 + $0x3e0] sm:$0xff] }
 0x54a   : > { %v3254_v48 = vld [vmem:[#allocation2 + $0x440] sm:$0xff] }
 0x54c   : > { %4452 = vmatpush1.bf16.msra.mxu1 %v5443_v53  ;;  %v3264_v53 = vld [vmem:[#allocation2 + $0x490] sm:$0xff] }
 0x54d   : > { %4453 = vmatprep.subr.bf16.mxu1 %v5468_v61  ;;  %v5446_v59 = vcombine.high %v3264_v53, %v3276_v54  ;;  %v3288_v61 = vld [vmem:[#allocation2 + $0x550] sm:$0xff]  ;;  %v5445_v1 = vcombine.low %v3264_v53, %v3276_v54  ;;  %v5426_v53 = vcombine.high %v3242_v47, %v3254_v48 }
 0x550   : > { %4454 = vmatpush1.bf16.msra.mxu1 %v5467_v60  ;;  %v5448_v60 = vcombine.high %v3265_v55, %v3277_v56  ;;  %v3266_v55 = vld [vmem:[#allocation2 + $0x4a0] sm:$0xff] }
 0x551   : > { %4525 = vmatprep.subr.bf16.mxu1 %v5304_v5  ;;  %v3122_v5 = vld [vmem:[#allocation2 + $0x20] sm:$0xff] }
 0x552   : > { %v3278_v56 = vld [vmem:[#allocation2 + $0x500] sm:$0xff] }
 0x606   : > { %v5887_v8 = vpop.f32.mrb[28].mxu1 }
 0x607   : > { %v3112_v9 = vadd.f32 %v5887_v8, %v5294_v7  ;;  %v3106_v10 = vpop.f32.mrb[29].mxu1  ;;  %v3123_v8 = vld [vmem:[#allocation2 + $0x28] sm:$0xff] }
 0x608   : > { %v3107_v11 = vadd.f32 %v5294_v7, %v3106_v10  ;;  %v3134_v7 = vld [vmem:[#allocation2 + $0x80] sm:$0xff]  ;;  %v5469_v10 = vcombine.low %v3288_v61, %v3300_v62 }
 0x609   : > { %v3116_v13 = vmax.f32 %v3112_v9, 0.0  ;;  %v3135_v9 = vld [vmem:[#allocation2 + $0x88] sm:$0xff]  ;;  %v5306_v12 = vcombine.high %v3122_v5, %v3134_v7 }
 0x60a   : > { %v3115_v17 = vmax.f32 %v3107_v11, 0.0  ;;  %v5471_v11 = vcombine.low %v3289_v63, %v3301_v0 }
 0x60c   : > { %v7233_v18 = vpack.c.bf16 %v3116_v13, %v3115_v17  ;;  %v5308_v13 = vcombine.high %v3123_v8, %v3135_v9  ;;  %v3159_v17 = vld [vmem:[#allocation2 + $0x148] sm:$0xff] }
 0x60d   : > { %v5332_v22 = vcombine.high %v3147_v16, %v3159_v17 }
 0x60e   : > { %4429 = vmatmul.mubr.bf16.vlgmr.msra.gmra.mrb[28].mxu0 %v7233_v18  ;;  %4472 = vmatmul.mubr.bf16.vlgmr.msra.gmra.mrb[32].mxu1 %v7233_v18 }
 0x60f   : > { %4483 = vmatpush1.bf16.msra.mxu0 %v5301_v3  ;;  %4526 = vmatpush1.bf16.msra.mxu1 %v5303_v4  ;;  %v5470_v3 = vcombine.high %v3288_v61, %v3300_v62  ;;  %v5472_v4 = vcombine.high %v3289_v63, %v3301_v0  ;;  %v5450_v61 = vcombine.high %v3266_v55, %v3278_v56  ;;  %v3290_v63 = vld [vmem:[#allocation2 + $0x560] sm:$0xff] }
 0x610   : > { %4484 = vmatprep.subr.bf16.mxu0 %v5326_v19  ;;  %4527 = vmatprep.subr.bf16.mxu1 %v5328_v20  ;;  %v5305_v19 = vcombine.low %v3122_v5, %v3134_v7  ;;  %v5307_v20 = vcombine.low %v3123_v8, %v3135_v9  ;;  %v3302_v0 = vld [vmem:[#allocation2 + $0x5c0] sm:$0xff]  ;;  %v3124_v8 = vld [vmem:[#allocation2 + $0x30] sm:$0xff] }
 0x611   : > { %4514 = vmatprep.mubr.bf16.mxu0 %v6320_v6  ;;  %4557 = vmatprep.mubr.bf16.mxu1 %v6320_v6  ;;  %v5474_v5 = vcombine.high %v3290_v63, %v3302_v0  ;;  %v3136_v9 = vld [vmem:[#allocation2 + $0x90] sm:$0xff] }
 0x613   : > { %4485 = vmatpush1.bf16.msra.mxu0 %v5325_v25  ;;  %4528 = vmatpush1.bf16.msra.mxu1 %v5327_v26  ;;  %v3171_v25 = vld [vmem:[#allocation2 + $0x1a8] sm:$0xff] }
 0x614   : > { %4486 = vmatprep.subr.bf16.mxu0 %v5350_v27  ;;  %4529 = vmatprep.subr.bf16.mxu1 %v5352_v28  ;;  %v3183_v26 = vld [vmem:[#allocation2 + $0x208] sm:$0xff]  ;;  %v5329_v27 = vcombine.low %v3146_v14, %v3158_v15  ;;  %v5331_v28 = vcombine.low %v3147_v16, %v3159_v17  ;;  %v5310_v14 = vcombine.high %v3124_v8, %v3136_v9  ;;  %v3148_v16 = vld [vmem:[#allocation2 + $0xf0] sm:$0xff] }
 0x615   : > { %v5356_v30 = vcombine.high %v3171_v25, %v3183_v26  ;;  %v3160_v17 = vld [vmem:[#allocation2 + $0x150] sm:$0xff] }
 0x617   : > { %4487 = vmatpush1.bf16.msra.mxu0 %v5349_v33  ;;  %4530 = vmatpush1.bf16.msra.mxu1 %v5351_v34  ;;  %v3195_v33 = vld [vmem:[#allocation2 + $0x268] sm:$0xff] }
 0x618   : > { %4488 = vmatprep.subr.bf16.mxu0 %v5374_v35  ;;  %4531 = vmatprep.subr.bf16.mxu1 %v5376_v36  ;;  %v3207_v34 = vld [vmem:[#allocation2 + $0x2c8] sm:$0xff]  ;;  %v5353_v35 = vcombine.low %v3170_v23, %v3182_v24  ;;  %v5355_v36 = vcombine.low %v3171_v25, %v3183_v26  ;;  %v5334_v23 = vcombine.high %v3148_v16, %v3160_v17  ;;  %v3172_v25 = vld [vmem:[#allocation2 + $0x1b0] sm:$0xff] }
 0x619   : > { %v5380_v38 = vcombine.high %v3195_v33, %v3207_v34  ;;  %v3184_v26 = vld [vmem:[#allocation2 + $0x210] sm:$0xff] }
 0x61b   : > { %4489 = vmatpush1.bf16.msra.mxu0 %v5373_v41  ;;  %4532 = vmatpush1.bf16.msra.mxu1 %v5375_v42  ;;  %v3219_v41 = vld [vmem:[#allocation2 + $0x328] sm:$0xff] }
 0x61c   : > { %4490 = vmatprep.subr.bf16.mxu0 %v5398_v43  ;;  %4533 = vmatprep.subr.bf16.mxu1 %v5400_v44  ;;  %v3231_v42 = vld [vmem:[#allocation2 + $0x388] sm:$0xff]  ;;  %v5377_v43 = vcombine.low %v3194_v31, %v3206_v32  ;;  %v5379_v44 = vcombine.low %v3195_v33, %v3207_v34  ;;  %v5358_v31 = vcombine.high %v3172_v25, %v3184_v26  ;;  %v3196_v33 = vld [vmem:[#allocation2 + $0x270] sm:$0xff] }
 0x61d   : > { %v5404_v46 = vcombine.high %v3219_v41, %v3231_v42  ;;  %v3208_v34 = vld [vmem:[#allocation2 + $0x2d0] sm:$0xff] }
 0x61f   : > { %4491 = vmatpush1.bf16.msra.mxu0 %v5397_v49  ;;  %4534 = vmatpush1.bf16.msra.mxu1 %v5399_v50  ;;  %v3243_v49 = vld [vmem:[#allocation2 + $0x3e8] sm:$0xff] }
 0x620   : > { %4492 = vmatprep.subr.bf16.mxu0 %v5422_v51  ;;  %4535 = vmatprep.subr.bf16.mxu1 %v5424_v52  ;;  %v3255_v50 = vld [vmem:[#allocation2 + $0x448] sm:$0xff]  ;;  %v5401_v51 = vcombine.low %v3218_v39, %v3230_v40  ;;  %v5403_v52 = vcombine.low %v3219_v41, %v3231_v42  ;;  %v5382_v39 = vcombine.high %v3196_v33, %v3208_v34  ;;  %v3220_v41 = vld [vmem:[#allocation2 + $0x330] sm:$0xff] }
 0x621   : > { %v5428_v54 = vcombine.high %v3243_v49, %v3255_v50  ;;  %v3232_v42 = vld [vmem:[#allocation2 + $0x390] sm:$0xff] }
 0x623   : > { %4493 = vmatpush1.bf16.msra.mxu0 %v5421_v57  ;;  %4536 = vmatpush1.bf16.msra.mxu1 %v5423_v58  ;;  %v3267_v57 = vld [vmem:[#allocation2 + $0x4a8] sm:$0xff] }
 0x624   : > { %4494 = vmatprep.subr.bf16.mxu0 %v5446_v59  ;;  %4537 = vmatprep.subr.bf16.mxu1 %v5448_v60  ;;  %v3279_v58 = vld [vmem:[#allocation2 + $0x508] sm:$0xff]  ;;  %v5425_v59 = vcombine.low %v3242_v47, %v3254_v48  ;;  %v5427_v60 = vcombine.low %v3243_v49, %v3255_v50  ;;  %v5406_v47 = vcombine.high %v3220_v41, %v3232_v42  ;;  %v3244_v49 = vld [vmem:[#allocation2 + $0x3f0] sm:$0xff] }
 0x625   : > { %v5452_v62 = vcombine.high %v3267_v57, %v3279_v58  ;;  %v3256_v50 = vld [vmem:[#allocation2 + $0x450] sm:$0xff] }
 0x627   : > { %4495 = vmatpush1.bf16.msra.mxu0 %v5445_v1  ;;  %4538 = vmatpush1.bf16.msra.mxu1 %v5447_v2  ;;  %v3291_v1 = vld [vmem:[#allocation2 + $0x568] sm:$0xff] }
 0x628   : > { %4496 = vmatprep.subr.bf16.mxu0 %v5470_v3  ;;  %4539 = vmatprep.subr.bf16.mxu1 %v5472_v4  ;;  %v3303_v2 = vld [vmem:[#allocation2 + $0x5c8] sm:$0xff]  ;;  %v5449_v3 = vcombine.low %v3266_v55, %v3278_v56  ;;  %v5451_v4 = vcombine.low %v3267_v57, %v3279_v58  ;;  %v5430_v55 = vcombine.high %v3244_v49, %v3256_v50  ;;  %v3268_v57 = vld [vmem:[#allocation2 + $0x4b0] sm:$0xff] }
 0x629   : > { %v5476_v7 = vcombine.high %v3291_v1, %v3303_v2  ;;  %v3280_v58 = vld [vmem:[#allocation2 + $0x510] sm:$0xff] }
 0x62b   : > { %4497 = vmatpush1.bf16.msra.mxu0 %v5469_v10  ;;  %4540 = vmatpush1.bf16.msra.mxu1 %v5471_v11  ;;  %v3125_v10 = vld [vmem:[#allocation2 + $0x38] sm:$0xff] }
 0x62c   : > { %4568 = vmatprep.subr.bf16.mxu0 %v5306_v12  ;;  %4611 = vmatprep.subr.bf16.mxu1 %v5308_v13  ;;  %v3137_v11 = vld [vmem:[#allocation2 + $0x98] sm:$0xff]  ;;  %v5473_v12 = vcombine.low %v3290_v63, %v3302_v0  ;;  %v5475_v13 = vcombine.low %v3291_v1, %v3303_v2  ;;  %v5454_v63 = vcombine.high %v3268_v57, %v3280_v58  ;;  %v3292_v1 = vld [vmem:[#allocation2 + $0x570] sm:$0xff] }
 0x62d   : > { %v5312_v15 = vcombine.high %v3125_v10, %v3137_v11  ;;  %v3304_v2 = vld [vmem:[#allocation2 + $0x5d0] sm:$0xff] }
 0x62e   : > { %4515 = vmatmul.mubr.bf16.vlgmr.msra.gmra.mrb[32].mxu0 %v7233_v18  ;;  %4558 = vmatmul.mubr.bf16.vlgmr.msra.gmra.mrb[36].mxu1 %v7233_v18 }
 0x62f   : > { %4569 = vmatpush1.bf16.msra.mxu0 %v5305_v19  ;;  %4612 = vmatpush1.bf16.msra.mxu1 %v5307_v20  ;;  %v3149_v19 = vld [vmem:[#allocation2 + $0xf8] sm:$0xff] }
 0x630   : > { %4570 = vmatprep.subr.bf16.mxu0 %v5330_v21  ;;  %4613 = vmatprep.subr.bf16.mxu1 %v5332_v22  ;;  %v3161_v20 = vld [vmem:[#allocation2 + $0x158] sm:$0xff]  ;;  %v5309_v21 = vcombine.low %v3124_v8, %v3136_v9  ;;  %v5311_v22 = vcombine.low %v3125_v10, %v3137_v11  ;;  %v5478_v8 = vcombine.high %v3292_v1, %v3304_v2  ;;  %v3126_v10 = vld [vmem:[#allocation2 + $0x40] sm:$0xff] }
 0x631   : > { %4600 = vmatprep.mubr.bf16.mxu0 %v6320_v6  ;;  %4643 = vmatprep.mubr.bf16.mxu1 %v6320_v6  ;;  %v5336_v24 = vcombine.high %v3149_v19, %v3161_v20  ;;  %v3138_v11 = vld [vmem:[#allocation2 + $0xa0] sm:$0xff] }
 0x633   : > { %4571 = vmatpush1.bf16.msra.mxu0 %v5329_v27  ;;  %4614 = vmatpush1.bf16.msra.mxu1 %v5331_v28  ;;  %v3173_v27 = vld [vmem:[#allocation2 + $0x1b8] sm:$0xff] }
 0x634   : > { %4572 = vmatprep.subr.bf16.mxu0 %v5354_v29  ;;  %4615 = vmatprep.subr.bf16.mxu1 %v5356_v30  ;;  %v3185_v28 = vld [vmem:[#allocation2 + $0x218] sm:$0xff]  ;;  %v5333_v29 = vcombine.low %v3148_v16, %v3160_v17  ;;  %v5335_v30 = vcombine.low %v3149_v19, %v3161_v20  ;;  %v5314_v16 = vcombine.high %v3126_v10, %v3138_v11  ;;  %v3150_v19 = vld [vmem:[#allocation2 + $0x100] sm:$0xff] }
 0x635   : > { %v5360_v32 = vcombine.high %v3173_v27, %v3185_v28  ;;  %v3162_v20 = vld [vmem:[#allocation2 + $0x160] sm:$0xff] }
 0x637   : > { %4573 = vmatpush1.bf16.msra.mxu0 %v5353_v35  ;;  %4616 = vmatpush1.bf16.msra.mxu1 %v5355_v36  ;;  %v3197_v35 = vld [vmem:[#allocation2 + $0x278] sm:$0xff] }
 0x638   : > { %4574 = vmatprep.subr.bf16.mxu0 %v5378_v37  ;;  %4617 = vmatprep.subr.bf16.mxu1 %v5380_v38  ;;  %v3209_v36 = vld [vmem:[#allocation2 + $0x2d8] sm:$0xff]  ;;  %v5357_v37 = vcombine.low %v3172_v25, %v3184_v26  ;;  %v5359_v38 = vcombine.low %v3173_v27, %v3185_v28  ;;  %v5338_v25 = vcombine.high %v3150_v19, %v3162_v20  ;;  %v3174_v27 = vld [vmem:[#allocation2 + $0x1c0] sm:$0xff] }
 0x639   : > { %v5384_v40 = vcombine.high %v3197_v35, %v3209_v36  ;;  %v3186_v28 = vld [vmem:[#allocation2 + $0x220] sm:$0xff] }
 0x63b   : > { %4575 = vmatpush1.bf16.msra.mxu0 %v5377_v43  ;;  %4618 = vmatpush1.bf16.msra.mxu1 %v5379_v44  ;;  %v3221_v43 = vld [vmem:[#allocation2 + $0x338] sm:$0xff] }
 0x63c   : > { %4576 = vmatprep.subr.bf16.mxu0 %v5402_v45  ;;  %4619 = vmatprep.subr.bf16.mxu1 %v5404_v46  ;;  %v3233_v44 = vld [vmem:[#allocation2 + $0x398] sm:$0xff]  ;;  %v5381_v45 = vcombine.low %v3196_v33, %v3208_v34  ;;  %v5383_v46 = vcombine.low %v3197_v35, %v3209_v36  ;;  %v5362_v33 = vcombine.high %v3174_v27, %v3186_v28  ;;  %v3198_v35 = vld [vmem:[#allocation2 + $0x280] sm:$0xff] }
 0x63d   : > { %v5408_v48 = vcombine.high %v3221_v43, %v3233_v44  ;;  %v3210_v36 = vld [vmem:[#allocation2 + $0x2e0] sm:$0xff] }
 0x63f   : > { %4577 = vmatpush1.bf16.msra.mxu0 %v5401_v51  ;;  %4620 = vmatpush1.bf16.msra.mxu1 %v5403_v52  ;;  %v3245_v51 = vld [vmem:[#allocation2 + $0x3f8] sm:$0xff] }
 0x640   : > { %4578 = vmatprep.subr.bf16.mxu0 %v5426_v53  ;;  %4621 = vmatprep.subr.bf16.mxu1 %v5428_v54  ;;  %v3257_v52 = vld [vmem:[#allocation2 + $0x458] sm:$0xff]  ;;  %v5405_v53 = vcombine.low %v3220_v41, %v3232_v42  ;;  %v5407_v54 = vcombine.low %v3221_v43, %v3233_v44  ;;  %v5386_v41 = vcombine.high %v3198_v35, %v3210_v36  ;;  %v3222_v43 = vld [vmem:[#allocation2 + $0x340] sm:$0xff] }
 0x641   : > { %v5432_v56 = vcombine.high %v3245_v51, %v3257_v52  ;;  %v3234_v44 = vld [vmem:[#allocation2 + $0x3a0] sm:$0xff] }
 0x643   : > { %4579 = vmatpush1.bf16.msra.mxu0 %v5425_v59  ;;  %4622 = vmatpush1.bf16.msra.mxu1 %v5427_v60  ;;  %v3269_v59 = vld [vmem:[#allocation2 + $0x4b8] sm:$0xff] }
 0x644   : > { %4580 = vmatprep.subr.bf16.mxu0 %v5450_v61  ;;  %4623 = vmatprep.subr.bf16.mxu1 %v5452_v62  ;;  %v3281_v60 = vld [vmem:[#allocation2 + $0x518] sm:$0xff]  ;;  %v5429_v61 = vcombine.low %v3244_v49, %v3256_v50  ;;  %v5431_v62 = vcombine.low %v3245_v51, %v3257_v52  ;;  %v5410_v49 = vcombine.high %v3222_v43, %v3234_v44  ;;  %v3246_v51 = vld [vmem:[#allocation2 + $0x400] sm:$0xff] }
 0x645   : > { %v5456_v0 = vcombine.high %v3269_v59, %v3281_v60  ;;  %v3258_v52 = vld [vmem:[#allocation2 + $0x460] sm:$0xff] }
 0x647   : > { %4581 = vmatpush1.bf16.msra.mxu0 %v5449_v3  ;;  %4624 = vmatpush1.bf16.msra.mxu1 %v5451_v4  ;;  %v3293_v3 = vld [vmem:[#allocation2 + $0x578] sm:$0xff] }
 0x648   : > { %4582 = vmatprep.subr.bf16.mxu0 %v5474_v5  ;;  %4625 = vmatprep.subr.bf16.mxu1 %v5476_v7  ;;  %v3305_v4 = vld [vmem:[#allocation2 + $0x5d8] sm:$0xff]  ;;  %v5453_v5 = vcombine.low %v3268_v57, %v3280_v58  ;;  %v5455_v7 = vcombine.low %v3269_v59, %v3281_v60  ;;  %v5434_v57 = vcombine.high %v3246_v51, %v3258_v52  ;;  %v3270_v59 = vld [vmem:[#allocation2 + $0x4c0] sm:$0xff] }
 0x649   : > { %v5480_v9 = vcombine.high %v3293_v3, %v3305_v4  ;;  %v3282_v60 = vld [vmem:[#allocation2 + $0x520] sm:$0xff] }
 0x64b   : > { %4583 = vmatpush1.bf16.msra.mxu0 %v5473_v12  ;;  %4626 = vmatpush1.bf16.msra.mxu1 %v5475_v13  ;;  %v3127_v12 = vld [vmem:[#allocation2 + $0x48] sm:$0xff] }
 0x64c   : > { %4654 = vmatprep.subr.bf16.mxu0 %v5310_v14  ;;  %4697 = vmatprep.subr.bf16.mxu1 %v5312_v15  ;;  %v3139_v13 = vld [vmem:[#allocation2 + $0xa8] sm:$0xff]  ;;  %v5477_v14 = vcombine.low %v3292_v1, %v3304_v2  ;;  %v5479_v15 = vcombine.low %v3293_v3, %v3305_v4  ;;  %v5458_v1 = vcombine.high %v3270_v59, %v3282_v60  ;;  %v3294_v3 = vld [vmem:[#allocation2 + $0x580] sm:$0xff] }
 0x64d   : > { %v5316_v17 = vcombine.high %v3127_v12, %v3139_v13  ;;  %v3306_v4 = vld [vmem:[#allocation2 + $0x5e0] sm:$0xff] }
 0x64e   : > { %4601 = vmatmul.mubr.bf16.vlgmr.msra.gmra.mrb[36].mxu0 %v7233_v18  ;;  %4644 = vmatmul.mubr.bf16.vlgmr.msra.gmra.mrb[40].mxu1 %v7233_v18 }
 0x64f   : > { %4655 = vmatpush1.bf16.msra.mxu0 %v5309_v21  ;;  %4698 = vmatpush1.bf16.msra.mxu1 %v5311_v22  ;;  %v3151_v21 = vld [vmem:[#allocation2 + $0x108] sm:$0xff] }
 0x650   : > { %4656 = vmatprep.subr.bf16.mxu0 %v5334_v23  ;;  %4699 = vmatprep.subr.bf16.mxu1 %v5336_v24  ;;  %v3163_v22 = vld [vmem:[#allocation2 + $0x168] sm:$0xff]  ;;  %v5313_v23 = vcombine.low %v3126_v10, %v3138_v11  ;;  %v5315_v24 = vcombine.low %v3127_v12, %v3139_v13  ;;  %v5482_v10 = vcombine.high %v3294_v3, %v3306_v4  ;;  %v3128_v12 = vld [vmem:[#allocation2 + $0x50] sm:$0xff] }
 0x651   : > { %4686 = vmatprep.mubr.bf16.mxu0 %v6320_v6  ;;  %4729 = vmatprep.mubr.bf16.mxu1 %v6320_v6  ;;  %v5340_v26 = vcombine.high %v3151_v21, %v3163_v22  ;;  %v3140_v13 = vld [vmem:[#allocation2 + $0xb0] sm:$0xff] }
 0x653   : > { %4657 = vmatpush1.bf16.msra.mxu0 %v5333_v29  ;;  %4700 = vmatpush1.bf16.msra.mxu1 %v5335_v30  ;;  %v3175_v29 = vld [vmem:[#allocation2 + $0x1c8] sm:$0xff] }
 0x654   : > { %4658 = vmatprep.subr.bf16.mxu0 %v5358_v31  ;;  %4701 = vmatprep.subr.bf16.mxu1 %v5360_v32  ;;  %v3187_v30 = vld [vmem:[#allocation2 + $0x228] sm:$0xff]  ;;  %v5337_v31 = vcombine.low %v3150_v19, %v3162_v20  ;;  %v5339_v32 = vcombine.low %v3151_v21, %v3163_v22  ;;  %v5318_v19 = vcombine.high %v3128_v12, %v3140_v13  ;;  %v3152_v21 = vld [vmem:[#allocation2 + $0x110] sm:$0xff] }
 0x655   : > { %v5364_v34 = vcombine.high %v3175_v29, %v3187_v30  ;;  %v3164_v22 = vld [vmem:[#allocation2 + $0x170] sm:$0xff] }
 0x657   : > { %4659 = vmatpush1.bf16.msra.mxu0 %v5357_v37  ;;  %4702 = vmatpush1.bf16.msra.mxu1 %v5359_v38  ;;  %v3199_v37 = vld [vmem:[#allocation2 + $0x288] sm:$0xff] }
 0x658   : > { %4660 = vmatprep.subr.bf16.mxu0 %v5382_v39  ;;  %4703 = vmatprep.subr.bf16.mxu1 %v5384_v40  ;;  %v3211_v38 = vld [vmem:[#allocation2 + $0x2e8] sm:$0xff]  ;;  %v5361_v39 = vcombine.low %v3174_v27, %v3186_v28  ;;  %v5363_v40 = vcombine.low %v3175_v29, %v3187_v30  ;;  %v5342_v27 = vcombine.high %v3152_v21, %v3164_v22  ;;  %v3176_v29 = vld [vmem:[#allocation2 + $0x1d0] sm:$0xff] }
 0x659   : > { %v5388_v42 = vcombine.high %v3199_v37, %v3211_v38  ;;  %v3188_v30 = vld [vmem:[#allocation2 + $0x230] sm:$0xff] }
 0x65b   : > { %4661 = vmatpush1.bf16.msra.mxu0 %v5381_v45  ;;  %4704 = vmatpush1.bf16.msra.mxu1 %v5383_v46  ;;  %v3223_v45 = vld [vmem:[#allocation2 + $0x348] sm:$0xff] }
 0x65c   : > { %4662 = vmatprep.subr.bf16.mxu0 %v5406_v47  ;;  %4705 = vmatprep.subr.bf16.mxu1 %v5408_v48  ;;  %v3235_v46 = vld [vmem:[#allocation2 + $0x3a8] sm:$0xff]  ;;  %v5385_v47 = vcombine.low %v3198_v35, %v3210_v36  ;;  %v5387_v48 = vcombine.low %v3199_v37, %v3211_v38  ;;  %v5366_v35 = vcombine.high %v3176_v29, %v3188_v30  ;;  %v3200_v37 = vld [vmem:[#allocation2 + $0x290] sm:$0xff] }
 0x65d   : > { %v5412_v50 = vcombine.high %v3223_v45, %v3235_v46  ;;  %v3212_v38 = vld [vmem:[#allocation2 + $0x2f0] sm:$0xff] }
 0x65f   : > { %4663 = vmatpush1.bf16.msra.mxu0 %v5405_v53  ;;  %4706 = vmatpush1.bf16.msra.mxu1 %v5407_v54  ;;  %v3247_v53 = vld [vmem:[#allocation2 + $0x408] sm:$0xff] }
 0x660   : > { %4664 = vmatprep.subr.bf16.mxu0 %v5430_v55  ;;  %4707 = vmatprep.subr.bf16.mxu1 %v5432_v56  ;;  %v3259_v54 = vld [vmem:[#allocation2 + $0x468] sm:$0xff]  ;;  %v5409_v55 = vcombine.low %v3222_v43, %v3234_v44  ;;  %v5411_v56 = vcombine.low %v3223_v45, %v3235_v46  ;;  %v5390_v43 = vcombine.high %v3200_v37, %v3212_v38  ;;  %v3224_v45 = vld [vmem:[#allocation2 + $0x350] sm:$0xff] }
 0x661   : > { %v5436_v58 = vcombine.high %v3247_v53, %v3259_v54  ;;  %v3236_v46 = vld [vmem:[#allocation2 + $0x3b0] sm:$0xff] }
 0x663   : > { %4665 = vmatpush1.bf16.msra.mxu0 %v5429_v61  ;;  %4708 = vmatpush1.bf16.msra.mxu1 %v5431_v62  ;;  %v3271_v61 = vld [vmem:[#allocation2 + $0x4c8] sm:$0xff] }
 0x664   : > { %4666 = vmatprep.subr.bf16.mxu0 %v5454_v63  ;;  %4709 = vmatprep.subr.bf16.mxu1 %v5456_v0  ;;  %v3283_v62 = vld [vmem:[#allocation2 + $0x528] sm:$0xff]  ;;  %v5433_v63 = vcombine.low %v3246_v51, %v3258_v52  ;;  %v5435_v0 = vcombine.low %v3247_v53, %v3259_v54  ;;  %v5414_v51 = vcombine.high %v3224_v45, %v3236_v46  ;;  %v3248_v52 = vld [vmem:[#allocation2 + $0x410] sm:$0xff]  ;;  %v3249_v54 = vld [vmem:[#allocation2 + $0x418] sm:$0xff] }
 0x665   : > { %v5460_v2 = vcombine.high %v3271_v61, %v3283_v62  ;;  %v3260_v53 = vld [vmem:[#allocation2 + $0x470] sm:$0xff] }
 0x667   : > { %4667 = vmatpush1.bf16.msra.mxu0 %v5453_v5  ;;  %4710 = vmatpush1.bf16.msra.mxu1 %v5455_v7  ;;  %v3295_v5 = vld [vmem:[#allocation2 + $0x588] sm:$0xff] }
 0x668   : > { %4668 = vmatprep.subr.bf16.mxu0 %v5478_v8  ;;  %4711 = vmatprep.subr.bf16.mxu1 %v5480_v9  ;;  %v3307_v7 = vld [vmem:[#allocation2 + $0x5e8] sm:$0xff]  ;;  %v5457_v8 = vcombine.low %v3270_v59, %v3282_v60  ;;  %v5459_v9 = vcombine.low %v3271_v61, %v3283_v62  ;;  %v3272_v60 = vld [vmem:[#allocation2 + $0x4d0] sm:$0xff]  ;;  %v3273_v62 = vld [vmem:[#allocation2 + $0x4d8] sm:$0xff] }
 0x669   : > { %v5484_v11 = vcombine.high %v3295_v5, %v3307_v7  ;;  %v3284_v61 = vld [vmem:[#allocation2 + $0x530] sm:$0xff] }
 0x66b   : > { %4669 = vmatpush1.bf16.msra.mxu0 %v5477_v14  ;;  %4712 = vmatpush1.bf16.msra.mxu1 %v5479_v15  ;;  %v3129_v14 = vld [vmem:[#allocation2 + $0x58] sm:$0xff] }
 0x66c   : > { %4740 = vmatprep.subr.bf16.mxu0 %v5314_v16  ;;  %4783 = vmatprep.subr.bf16.mxu1 %v5316_v17  ;;  %v3141_v15 = vld [vmem:[#allocation2 + $0xb8] sm:$0xff]  ;;  %v5481_v16 = vcombine.low %v3294_v3, %v3306_v4  ;;  %v5483_v17 = vcombine.low %v3295_v5, %v3307_v7  ;;  %v3296_v4 = vld [vmem:[#allocation2 + $0x590] sm:$0xff] }
 0x66d   : > { %v5320_v20 = vcombine.high %v3129_v14, %v3141_v15  ;;  %v3308_v5 = vld [vmem:[#allocation2 + $0x5f0] sm:$0xff]  ;;  %v3297_v7 = vld [vmem:[#allocation2 + $0x598] sm:$0xff] }
 0x66e   : > { %4687 = vmatmul.mubr.bf16.vlgmr.msra.gmra.mrb[40].mxu0 %v7233_v18  ;;  %4730 = vmatmul.mubr.bf16.vlgmr.msra.gmra.mrb[44].mxu1 %v7233_v18 }
 0x66f   : > { %4741 = vmatpush1.bf16.msra.mxu0 %v5313_v23  ;;  %4784 = vmatpush1.bf16.msra.mxu1 %v5315_v24  ;;  %v3153_v23 = vld [vmem:[#allocation2 + $0x118] sm:$0xff] }
 0x670   : > { %4742 = vmatprep.subr.bf16.mxu0 %v5338_v25  ;;  %4785 = vmatprep.subr.bf16.mxu1 %v5340_v26  ;;  %v3165_v24 = vld [vmem:[#allocation2 + $0x178] sm:$0xff]  ;;  %v5317_v25 = vcombine.low %v3128_v12, %v3140_v13  ;;  %v5319_v26 = vcombine.low %v3129_v14, %v3141_v15  ;;  %v5485_v13 = vcombine.low %v3296_v4, %v3308_v5  ;;  %v3316_v15 = vlaneseq }
 0x671   : > { %4772 = vmatprep.mubr.bf16.mxu0 %v6320_v6  ;;  %4815 = vmatprep.mubr.bf16.mxu1 %v6320_v6  ;;  %v5344_v28 = vcombine.high %v3153_v23, %v3165_v24 }
 0x673   : > { %4743 = vmatpush1.bf16.msra.mxu0 %v5337_v31  ;;  %4786 = vmatpush1.bf16.msra.mxu1 %v5339_v32  ;;  %v3177_v31 = vld [vmem:[#allocation2 + $0x1d8] sm:$0xff] }
 0x674   : > { %4744 = vmatprep.subr.bf16.mxu0 %v5362_v33  ;;  %4787 = vmatprep.subr.bf16.mxu1 %v5364_v34  ;;  %v3189_v32 = vld [vmem:[#allocation2 + $0x238] sm:$0xff]  ;;  %v5341_v33 = vcombine.low %v3152_v21, %v3164_v22  ;;  %v5343_v34 = vcombine.low %v3153_v23, %v3165_v24 }
 0x675   : > { %v5368_v36 = vcombine.high %v3177_v31, %v3189_v32 }
 0x677   : > { %4745 = vmatpush1.bf16.msra.mxu0 %v5361_v39  ;;  %4788 = vmatpush1.bf16.msra.mxu1 %v5363_v40  ;;  %v3201_v39 = vld [vmem:[#allocation2 + $0x298] sm:$0xff] }
 0x678   : > { %4746 = vmatprep.subr.bf16.mxu0 %v5386_v41  ;;  %4789 = vmatprep.subr.bf16.mxu1 %v5388_v42  ;;  %v3213_v40 = vld [vmem:[#allocation2 + $0x2f8] sm:$0xff]  ;;  %v5365_v41 = vcombine.low %v3176_v29, %v3188_v30  ;;  %v5367_v42 = vcombine.low %v3177_v31, %v3189_v32 }
 0x679   : > { %v5392_v44 = vcombine.high %v3201_v39, %v3213_v40 }
 0x67b   : > { %4747 = vmatpush1.bf16.msra.mxu0 %v5385_v47  ;;  %4790 = vmatpush1.bf16.msra.mxu1 %v5387_v48  ;;  %v3225_v47 = vld [vmem:[#allocation2 + $0x358] sm:$0xff] }
 0x67c   : > { %4748 = vmatprep.subr.bf16.mxu0 %v5410_v49  ;;  %4791 = vmatprep.subr.bf16.mxu1 %v5412_v50  ;;  %v3237_v48 = vld [vmem:[#allocation2 + $0x3b8] sm:$0xff]  ;;  %v5389_v49 = vcombine.low %v3200_v37, %v3212_v38  ;;  %v5391_v50 = vcombine.low %v3201_v39, %v3213_v40 }
 0x67f   : > { %4749 = vmatpush1.bf16.msra.mxu0 %v5409_v55  ;;  %4792 = vmatpush1.bf16.msra.mxu1 %v5411_v56  ;;  %v3261_v55 = vld [vmem:[#allocation2 + $0x478] sm:$0xff]  ;;  %v5413_v56 = vcombine.low %v3224_v45, %v3236_v46 }
 0x680   : > { %4750 = vmatprep.subr.bf16.mxu0 %v5434_v57  ;;  %4793 = vmatprep.subr.bf16.mxu1 %v5436_v58  ;;  %v5415_v57 = vcombine.low %v3225_v47, %v3237_v48  ;;  %v5438_v58 = vcombine.high %v3248_v52, %v3260_v53  ;;  %v5440_v59 = vcombine.high %v3249_v54, %v3261_v55 }
 0x683   : > { %4751 = vmatpush1.bf16.msra.mxu0 %v5433_v63  ;;  %4794 = vmatpush1.bf16.msra.mxu1 %v5435_v0  ;;  %v3285_v63 = vld [vmem:[#allocation2 + $0x538] sm:$0xff]  ;;  %v5437_v0 = vcombine.low %v3248_v52, %v3260_v53 }
 0x684   : > { %4752 = vmatprep.subr.bf16.mxu0 %v5458_v1  ;;  %4795 = vmatprep.subr.bf16.mxu1 %v5460_v2  ;;  %v5439_v1 = vcombine.low %v3249_v54, %v3261_v55  ;;  %v5462_v2 = vcombine.high %v3272_v60, %v3284_v61  ;;  %v5464_v3 = vcombine.high %v3273_v62, %v3285_v63 }
 0x687   : > { %4753 = vmatpush1.bf16.msra.mxu0 %v5457_v8  ;;  %4796 = vmatpush1.bf16.msra.mxu1 %v5459_v9  ;;  %v3309_v8 = vld [vmem:[#allocation2 + $0x5f8] sm:$0xff]  ;;  %v5461_v9 = vcombine.low %v3272_v60, %v3284_v61 }
 0x688   : > { %4754 = vmatprep.subr.bf16.mxu0 %v5482_v10  ;;  %4797 = vmatprep.subr.bf16.mxu1 %v5484_v11  ;;  %v5463_v10 = vcombine.low %v3273_v62, %v3285_v63  ;;  %v5486_v11 = vcombine.high %v3296_v4, %v3308_v5  ;;  %v5488_v12 = vcombine.high %v3297_v7, %v3309_v8 }
 0x689   : > { %v5487_v14 = vcombine.low %v3297_v7, %v3309_v8 }
 0x68b   : > { %4755 = vmatpush1.bf16.msra.mxu0 %v5481_v16  ;;  %4798 = vmatpush1.bf16.msra.mxu1 %v5483_v17  ;;  %v3317_v16 = vshrl.u32 %v3316_v15, 7 }
 0x68c   : > { %4826 = vmatprep.subr.bf16.mxu0 %v5318_v19  ;;  %4869 = vmatprep.subr.bf16.mxu1 %v5320_v20  ;;  %v3310_v20 = vld [vmem:[%s7378_s14] sm:$0xff] }
 0x68d   : > { %v7257_v17 = vsub.s32 0, %v3317_v16  ;;  %v7259_v19 = vsub.s32 2, %v3317_v16  ;;  %v7264_v21 = vsub.s32 1, %v3317_v16  ;;  %v7266_v22 = vsub.s32 3, %v3317_v16 }
 0x68e   : > { %4773 = vmatmul.mubr.bf16.vlgmr.msra.gmra.mrb[44].mxu0 %v7233_v18  ;;  %4816 = vmatmul.mubr.bf16.vlgmr.msra.gmra.mrb[48].mxu1 %v7233_v18  ;;  %v7293_v52 = vsub.s32 7, %v3317_v16 }
 0x68f   : > { %4827 = vmatpush1.bf16.msra.mxu0 %v5317_v25  ;;  %4870 = vmatpush1.bf16.msra.mxu1 %v5319_v26  ;;  %v3319_v23 = vrot.slane %v3310_v20, %v7257_v17  ;;  %v3327_v24 = vrot.slane %v3310_v20, %v7259_v19  ;;  %v3331_v25 = vrot.slane %v3310_v20, %v7266_v22 }
 0x690   : > { %4828 = vmatprep.subr.bf16.mxu0 %v5342_v27  ;;  %4871 = vmatprep.subr.bf16.mxu1 %v5344_v28 }
 0x691   : > { %4858 = vmatprep.mubr.bf16.mxu0 %v6320_v6  ;;  %4901 = vmatprep.mubr.bf16.mxu1 %v6320_v6  ;;  %v5416_v6 = vcombine.high %v3225_v47, %v3237_v48 }
 0x693   : > { %4829 = vmatpush1.bf16.msra.mxu0 %v5341_v33  ;;  %4872 = vmatpush1.bf16.msra.mxu1 %v5343_v34 }
 0x694   : > { %4830 = vmatprep.subr.bf16.mxu0 %v5366_v35  ;;  %4873 = vmatprep.subr.bf16.mxu1 %v5368_v36 }
 0x697   : > { %4831 = vmatpush1.bf16.msra.mxu0 %v5365_v41  ;;  %4874 = vmatpush1.bf16.msra.mxu1 %v5367_v42 }
 0x698   : > { %4832 = vmatprep.subr.bf16.mxu0 %v5390_v43  ;;  %4875 = vmatprep.subr.bf16.mxu1 %v5392_v44 }
 0x69b   : > { %4833 = vmatpush1.bf16.msra.mxu0 %v5389_v49  ;;  %4876 = vmatpush1.bf16.msra.mxu1 %v5391_v50  ;;  %v7287_v50 = vsub.s32 4, %v3317_v16 }
 0x69c   : > { %4834 = vmatprep.subr.bf16.mxu0 %v5414_v51  ;;  %4877 = vmatprep.subr.bf16.mxu1 %v5416_v6  ;;  %v7289_v51 = vsub.s32 6, %v3317_v16  ;;  %v7291_v6 = vsub.s32 5, %v3317_v16 }
 0x69d   : > { %v3335_v53 = vrot.slane %v3310_v20, %v7287_v50 }
 0x69e   : > { %v3343_v54 = vrot.slane %v3310_v20, %v7289_v51  ;;  %v3339_v55 = vrot.slane %v3310_v20, %v7291_v6 }
 0x69f   : > { %4835 = vmatpush1.bf16.msra.mxu0 %v5413_v56  ;;  %4878 = vmatpush1.bf16.msra.mxu1 %v5415_v57  ;;  %v3347_v56 = vrot.slane %v3310_v20, %v7293_v52 }
 0x6a0   : > { %4836 = vmatprep.subr.bf16.mxu0 %v5438_v58  ;;  %4879 = vmatprep.subr.bf16.mxu1 %v5440_v59 }
 0x6a3   : > { %4837 = vmatpush1.bf16.msra.mxu0 %v5437_v0  ;;  %4880 = vmatpush1.bf16.msra.mxu1 %v5439_v1 }
 0x6a4   : > { %4838 = vmatprep.subr.bf16.mxu0 %v5462_v2  ;;  %4881 = vmatprep.subr.bf16.mxu1 %v5464_v3 }
 0x6a7   : > { %4839 = vmatpush1.bf16.msra.mxu0 %v5461_v9  ;;  %4882 = vmatpush1.bf16.msra.mxu1 %v5463_v10 }
 0x6a8   : > { %4840 = vmatprep.subr.bf16.mxu0 %v5486_v11  ;;  %4883 = vmatprep.subr.bf16.mxu1 %v5488_v12 }
 0x6ab   : > { %4841 = vmatpush1.bf16.msra.mxu0 %v5485_v13  ;;  %4884 = vmatpush1.bf16.msra.mxu1 %v5487_v14 }
 0x6ae   : > { %4859 = vmatmul.mubr.bf16.vlgmr.msra.gmra.mrb[48].mxu0 %v7233_v18  ;;  %4902 = vmatmul.mubr.bf16.vlgmr.msra.gmra.mrb[52].mxu1 %v7233_v18  ;;  %v3323_v18 = vrot.slane %v3310_v20, %v7264_v21 }
 0x6e1   : > { %v4430_v26 = vpop.f32.mrb[28].mxu0  ;;  %v4473_v27 = vpop.f32.mrb[32].mxu1 }
 0x6e2   : > { %v4431_v28 = vadd.f32 %v4430_v26, %v3319_v23  ;;  %v4474_v29 = vadd.f32 %v4473_v27, %v3327_v24  ;;  %v4432_v30 = vpop.f32.mrb[29].mxu0  ;;  %v4475_v31 = vpop.f32.mrb[33].mxu1 }
 0x6e3   : > { %v4433_v32 = vadd.f32 %v4432_v30, %v3323_v18  ;;  %v4476_v33 = vadd.f32 %v4475_v31, %v3331_v25  ;;  %v4434_v34 = vpop.f32.mrb[30].mxu0  ;;  %v4477_v35 = vpop.f32.mrb[34].mxu1 }
 0x6e4   : > { %6180 = vtanh.f32 %v4431_v28  ;;  %v4435_v36 = vadd.f32 %v4434_v34, %v3319_v23  ;;  %v4436_v37 = vpop.f32.mrb[31].mxu0  ;;  %v4479_v38 = vpop.f32.mrb[35].mxu1  ;;  %v4478_v39 = vadd.f32 %v4477_v35, %v3327_v24  ;;  %v3311_v23 = vld [vmem:[%s7378_s14 + $0x8] sm:$0xff] }
 0x6e5   : > { %6182 = vtanh.f32 %v4474_v29  ;;  %v4437_v40 = vadd.f32 %v4436_v37, %v3323_v18  ;;  %v4480_v41 = vadd.f32 %v4479_v38, %v3331_v25  ;;  %v3351_v24 = vrot.slane %v3311_v23, %v7257_v17 }
 0x6e6   : > { %6184 = vtanh.f32 %v4433_v32  ;;  %v3359_v18 = vrot.slane %v3311_v23, %v7259_v19  ;;  %v3355_v25 = vrot.slane %v3311_v23, %v7264_v21  ;;  %v3363_v26 = vrot.slane %v3311_v23, %v7266_v22 }
 0x6e7   : > { %6186 = vtanh.f32 %v4476_v33 }
 0x6e8   : > { %6188 = vtanh.f32 %v4435_v36 }
 0x6e9   : > { %6190 = vtanh.f32 %v4478_v39 }
 0x6ea   : > { %6192 = vtanh.f32 %v4437_v40 }
 0x6eb   : > { %6194 = vtanh.f32 %v4480_v41 }
 0x6ee   : > { %v6181_v42 = vpop.eup %6180 }
 0x6ef   : > { %v6183_v43 = vpop.eup %6182  ;;  %4960 = vst [vmem:[%s7277_s20] sm:$0xff] %v6181_v42 }
 0x6f0   : > { %v6185_v44 = vpop.eup %6184  ;;  %4962 = vst [vmem:[%s7277_s20 + $0x10] sm:$0xff] %v6183_v43 }
 0x6f1   : > { %v6187_v45 = vpop.eup %6186  ;;  %4961 = vst [vmem:[%s7277_s20 + $0x8] sm:$0xff] %v6185_v44 }
 0x6f2   : > { %v6189_v46 = vpop.eup %6188  ;;  %4963 = vst [vmem:[%s7277_s20 + $0x18] sm:$0xff] %v6187_v45 }
 0x6f3   : > { %v6191_v47 = vpop.eup %6190  ;;  %4984 = vst [vmem:[%s7277_s20 + $0xc0] sm:$0xff] %v6189_v46 }
 0x6f4   : > { %v6193_v48 = vpop.eup %6192  ;;  %4986 = vst [vmem:[%s7277_s20 + $0xd0] sm:$0xff] %v6191_v47 }
 0x6f5   : > { %v6195_v49 = vpop.eup %6194  ;;  %4985 = vst [vmem:[%s7277_s20 + $0xc8] sm:$0xff] %v6193_v48 }
 0x6f6   : > { %4987 = vst [vmem:[%s7277_s20 + $0xd8] sm:$0xff] %v6195_v49 }
 0x701   : > { %v4516_v57 = vpop.f32.mrb[32].mxu0  ;;  %v4559_v58 = vpop.f32.mrb[36].mxu1 }
 0x702   : > { %v4517_v59 = vadd.f32 %v4516_v57, %v3335_v53  ;;  %v4560_v60 = vadd.f32 %v4559_v58, %v3343_v54  ;;  %v4518_v61 = vpop.f32.mrb[33].mxu0  ;;  %v4561_v62 = vpop.f32.mrb[37].mxu1  ;;  %v3379_v57 = vrot.slane %v3311_v23, %v7293_v52 }
 0x703   : > { %v4519_v63 = vadd.f32 %v4518_v61, %v3339_v55  ;;  %v4562_v0 = vadd.f32 %v4561_v62, %v3347_v56  ;;  %v4520_v1 = vpop.f32.mrb[34].mxu0  ;;  %v4563_v2 = vpop.f32.mrb[38].mxu1 }
 0x704   : > { %6196 = vtanh.f32 %v4517_v59  ;;  %v4521_v3 = vadd.f32 %v4520_v1, %v3335_v53  ;;  %v4522_v4 = vpop.f32.mrb[35].mxu0  ;;  %v4565_v5 = vpop.f32.mrb[39].mxu1  ;;  %v4564_v7 = vadd.f32 %v4563_v2, %v3343_v54  ;;  %v3367_v54 = vrot.slane %v3311_v23, %v7287_v50 }
 0x705   : > { %6198 = vtanh.f32 %v4560_v60  ;;  %v4523_v8 = vadd.f32 %v4522_v4, %v3339_v55  ;;  %v4566_v9 = vadd.f32 %v4565_v5, %v3347_v56  ;;  %v3375_v55 = vrot.slane %v3311_v23, %v7289_v51 }
 0x706   : > { %6200 = vtanh.f32 %v4519_v63  ;;  %v3371_v56 = vrot.slane %v3311_v23, %v7291_v6 }
 0x707   : > { %6202 = vtanh.f32 %v4562_v0 }
 0x708   : > { %6204 = vtanh.f32 %v4521_v3 }
 0x709   : > { %6206 = vtanh.f32 %v4564_v7 }
 0x70a   : > { %6208 = vtanh.f32 %v4523_v8 }
 0x70b   : > { %6210 = vtanh.f32 %v4566_v9 }
 0x70e   : > { %v6197_v10 = vpop.eup %6196 }
 0x70f   : > { %v6199_v11 = vpop.eup %6198  ;;  %4964 = vst [vmem:[%s7277_s20 + $0x20] sm:$0xff] %v6197_v10 }
 0x710   : > { %v6201_v12 = vpop.eup %6200  ;;  %4966 = vst [vmem:[%s7277_s20 + $0x30] sm:$0xff] %v6199_v11 }
 0x711   : > { %v6203_v13 = vpop.eup %6202  ;;  %4965 = vst [vmem:[%s7277_s20 + $0x28] sm:$0xff] %v6201_v12 }
 0x712   : > { %v6205_v14 = vpop.eup %6204  ;;  %4967 = vst [vmem:[%s7277_s20 + $0x38] sm:$0xff] %v6203_v13 }
 0x713   : > { %v6207_v15 = vpop.eup %6206  ;;  %4988 = vst [vmem:[%s7277_s20 + $0xe0] sm:$0xff] %v6205_v14 }
 0x714   : > { %v6209_v16 = vpop.eup %6208  ;;  %4990 = vst [vmem:[%s7277_s20 + $0xf0] sm:$0xff] %v6207_v15 }
 0x715   : > { %v6211_v20 = vpop.eup %6210  ;;  %4989 = vst [vmem:[%s7277_s20 + $0xe8] sm:$0xff] %v6209_v16 }
 0x716   : > { %4991 = vst [vmem:[%s7277_s20 + $0xf8] sm:$0xff] %v6211_v20 }
 0x721   : > { %v4602_v27 = vpop.f32.mrb[36].mxu0  ;;  %v4645_v28 = vpop.f32.mrb[40].mxu1 }
 0x722   : > { %v4603_v29 = vadd.f32 %v4602_v27, %v3351_v24  ;;  %v4646_v30 = vadd.f32 %v4645_v28, %v3359_v18  ;;  %v4604_v31 = vpop.f32.mrb[37].mxu0  ;;  %v4647_v32 = vpop.f32.mrb[41].mxu1 }
 0x723   : > { %v4605_v33 = vadd.f32 %v4604_v31, %v3355_v25  ;;  %v4648_v34 = vadd.f32 %v4647_v32, %v3363_v26  ;;  %v4606_v35 = vpop.f32.mrb[38].mxu0  ;;  %v4649_v36 = vpop.f32.mrb[42].mxu1 }
 0x724   : > { %6212 = vtanh.f32 %v4603_v29  ;;  %v4607_v37 = vadd.f32 %v4606_v35, %v3351_v24  ;;  %v4608_v38 = vpop.f32.mrb[39].mxu0  ;;  %v4651_v39 = vpop.f32.mrb[43].mxu1  ;;  %v4650_v40 = vadd.f32 %v4649_v36, %v3359_v18  ;;  %v3312_v24 = vld [vmem:[%s7378_s14 + $0x10] sm:$0xff] }
 0x725   : > { %6214 = vtanh.f32 %v4646_v30  ;;  %v4609_v41 = vadd.f32 %v4608_v38, %v3355_v25  ;;  %v4652_v42 = vadd.f32 %v4651_v39, %v3363_v26  ;;  %v3383_v18 = vrot.slane %v3312_v24, %v7257_v17 }
 0x726   : > { %6216 = vtanh.f32 %v4605_v33  ;;  %v3391_v25 = vrot.slane %v3312_v24, %v7259_v19  ;;  %v3387_v26 = vrot.slane %v3312_v24, %v7264_v21  ;;  %v3395_v27 = vrot.slane %v3312_v24, %v7266_v22 }
 0x727   : > { %6218 = vtanh.f32 %v4648_v34 }
 0x728   : > { %6220 = vtanh.f32 %v4607_v37 }
 0x729   : > { %6222 = vtanh.f32 %v4650_v40 }
 0x72a   : > { %6224 = vtanh.f32 %v4609_v41 }
 0x72b   : > { %6226 = vtanh.f32 %v4652_v42 }
 0x72e   : > { %v6213_v43 = vpop.eup %6212 }
 0x72f   : > { %v6215_v44 = vpop.eup %6214  ;;  %4968 = vst [vmem:[%s7277_s20 + $0x40] sm:$0xff] %v6213_v43 }
 0x730   : > { %v6217_v45 = vpop.eup %6216  ;;  %4970 = vst [vmem:[%s7277_s20 + $0x50] sm:$0xff] %v6215_v44 }
 0x731   : > { %v6219_v46 = vpop.eup %6218  ;;  %4969 = vst [vmem:[%s7277_s20 + $0x48] sm:$0xff] %v6217_v45 }
 0x732   : > { %v6221_v47 = vpop.eup %6220  ;;  %4971 = vst [vmem:[%s7277_s20 + $0x58] sm:$0xff] %v6219_v46 }
 0x733   : > { %v6223_v48 = vpop.eup %6222  ;;  %4992 = vst [vmem:[%s7277_s20 + $0x100] sm:$0xff] %v6221_v47 }
 0x734   : > { %v6225_v49 = vpop.eup %6224  ;;  %4994 = vst [vmem:[%s7277_s20 + $0x110] sm:$0xff] %v6223_v48  ;;  %v3399_v48 = vrot.slane %v3312_v24, %v7287_v50 }
 0x735   : > { %v6227_v53 = vpop.eup %6226  ;;  %4993 = vst [vmem:[%s7277_s20 + $0x108] sm:$0xff] %v6225_v49  ;;  %v3407_v49 = vrot.slane %v3312_v24, %v7289_v51 }
 0x736   : > { %4995 = vst [vmem:[%s7277_s20 + $0x118] sm:$0xff] %v6227_v53  ;;  %v3403_v53 = vrot.slane %v3312_v24, %v7291_v6 }
 0x741   : > { %v4688_v58 = vpop.f32.mrb[40].mxu0  ;;  %v4731_v59 = vpop.f32.mrb[44].mxu1 }
 0x742   : > { %v4689_v60 = vadd.f32 %v4688_v58, %v3367_v54  ;;  %v4732_v61 = vadd.f32 %v4731_v59, %v3375_v55  ;;  %v4690_v62 = vpop.f32.mrb[41].mxu0  ;;  %v4733_v63 = vpop.f32.mrb[45].mxu1 }
 0x743   : > { %v4691_v0 = vadd.f32 %v4690_v62, %v3371_v56  ;;  %v4734_v1 = vadd.f32 %v4733_v63, %v3379_v57  ;;  %v4692_v2 = vpop.f32.mrb[42].mxu0  ;;  %v4735_v3 = vpop.f32.mrb[46].mxu1 }
 0x744   : > { %6228 = vtanh.f32 %v4689_v60  ;;  %v4693_v4 = vadd.f32 %v4692_v2, %v3367_v54  ;;  %v4694_v5 = vpop.f32.mrb[43].mxu0  ;;  %v4737_v7 = vpop.f32.mrb[47].mxu1  ;;  %v4736_v8 = vadd.f32 %v4735_v3, %v3375_v55  ;;  %v3411_v54 = vrot.slane %v3312_v24, %v7293_v52 }
 0x745   : > { %6230 = vtanh.f32 %v4732_v61  ;;  %v4695_v9 = vadd.f32 %v4694_v5, %v3371_v56  ;;  %v4738_v10 = vadd.f32 %v4737_v7, %v3379_v57 }
 0x746   : > { %6232 = vtanh.f32 %v4691_v0 }
 0x747   : > { %6234 = vtanh.f32 %v4734_v1 }
 0x748   : > { %6236 = vtanh.f32 %v4693_v4 }
 0x749   : > { %6238 = vtanh.f32 %v4736_v8 }
 0x74a   : > { %6240 = vtanh.f32 %v4695_v9 }
 0x74b   : > { %6242 = vtanh.f32 %v4738_v10 }
 0x74e   : > { %v6229_v11 = vpop.eup %6228 }
 0x74f   : > { %v6231_v12 = vpop.eup %6230  ;;  %4972 = vst [vmem:[%s7277_s20 + $0x60] sm:$0xff] %v6229_v11 }
 0x750   : > { %v6233_v13 = vpop.eup %6232  ;;  %4974 = vst [vmem:[%s7277_s20 + $0x70] sm:$0xff] %v6231_v12 }
 0x751   : > { %v6235_v14 = vpop.eup %6234  ;;  %4973 = vst [vmem:[%s7277_s20 + $0x68] sm:$0xff] %v6233_v13 }
 0x752   : > { %v6237_v15 = vpop.eup %6236  ;;  %4975 = vst [vmem:[%s7277_s20 + $0x78] sm:$0xff] %v6235_v14 }
 0x753   : > { %v6239_v16 = vpop.eup %6238  ;;  %4996 = vst [vmem:[%s7277_s20 + $0x120] sm:$0xff] %v6237_v15 }
 0x754   : > { %v6241_v20 = vpop.eup %6240  ;;  %4998 = vst [vmem:[%s7277_s20 + $0x130] sm:$0xff] %v6239_v16 }
 0x755   : > { %v6243_v23 = vpop.eup %6242  ;;  %4997 = vst [vmem:[%s7277_s20 + $0x128] sm:$0xff] %v6241_v20 }
 0x756   : > { %4999 = vst [vmem:[%s7277_s20 + $0x138] sm:$0xff] %v6243_v23 }
 0x761   : > { %v4774_v28 = vpop.f32.mrb[44].mxu0  ;;  %v4817_v29 = vpop.f32.mrb[48].mxu1 }
 0x762   : > { %v4775_v30 = vadd.f32 %v4774_v28, %v3383_v18  ;;  %v4818_v31 = vadd.f32 %v4817_v29, %v3391_v25  ;;  %v4776_v32 = vpop.f32.mrb[45].mxu0  ;;  %v4819_v33 = vpop.f32.mrb[49].mxu1 }
 0x763   : > { %v4777_v34 = vadd.f32 %v4776_v32, %v3387_v26  ;;  %v4820_v35 = vadd.f32 %v4819_v33, %v3395_v27  ;;  %v4778_v36 = vpop.f32.mrb[46].mxu0  ;;  %v4821_v37 = vpop.f32.mrb[50].mxu1 }
 0x764   : > { %6244 = vtanh.f32 %v4775_v30  ;;  %v4779_v38 = vadd.f32 %v4778_v36, %v3383_v18  ;;  %v4780_v17 = vpop.f32.mrb[47].mxu0  ;;  %v4823_v19 = vpop.f32.mrb[51].mxu1  ;;  %v4822_v21 = vadd.f32 %v4821_v37, %v3391_v25 }
 0x765   : > { %6246 = vtanh.f32 %v4818_v31  ;;  %v4781_v22 = vadd.f32 %v4780_v17, %v3387_v26  ;;  %v4824_v39 = vadd.f32 %v4823_v19, %v3395_v27 }
 0x766   : > { %6248 = vtanh.f32 %v4777_v34 }
 0x767   : > { %6250 = vtanh.f32 %v4820_v35 }
 0x768   : > { %6252 = vtanh.f32 %v4779_v38 }
 0x769   : > { %6254 = vtanh.f32 %v4822_v21 }
 0x76a   : > { %6256 = vtanh.f32 %v4781_v22 }
 0x76b   : > { %6258 = vtanh.f32 %v4824_v39 }
 0x76e   : > { %v6245_v40 = vpop.eup %6244 }
 0x76f   : > { %v6247_v41 = vpop.eup %6246  ;;  %4976 = vst [vmem:[%s7277_s20 + $0x80] sm:$0xff] %v6245_v40 }
 0x770   : > { %v6249_v42 = vpop.eup %6248  ;;  %4978 = vst [vmem:[%s7277_s20 + $0x90] sm:$0xff] %v6247_v41 }
 0x771   : > { %v6251_v43 = vpop.eup %6250  ;;  %4977 = vst [vmem:[%s7277_s20 + $0x88] sm:$0xff] %v6249_v42 }
 0x772   : > { %v6253_v44 = vpop.eup %6252  ;;  %4979 = vst [vmem:[%s7277_s20 + $0x98] sm:$0xff] %v6251_v43 }
 0x773   : > { %v6255_v45 = vpop.eup %6254  ;;  %5000 = vst [vmem:[%s7277_s20 + $0x140] sm:$0xff] %v6253_v44 }
 0x774   : > { %v6257_v46 = vpop.eup %6256  ;;  %5002 = vst [vmem:[%s7277_s20 + $0x150] sm:$0xff] %v6255_v45 }
 0x775   : > { %v6259_v47 = vpop.eup %6258  ;;  %5001 = vst [vmem:[%s7277_s20 + $0x148] sm:$0xff] %v6257_v46 }
 0x776   : > { %5003 = vst [vmem:[%s7277_s20 + $0x158] sm:$0xff] %v6259_v47 }
 0x781   : > { %v4860_v55 = vpop.f32.mrb[48].mxu0  ;;  %v4903_v56 = vpop.f32.mrb[52].mxu1 }
 0x782   : > { %v4861_v57 = vadd.f32 %v4860_v55, %v3399_v48  ;;  %v4904_v58 = vadd.f32 %v4903_v56, %v3407_v49  ;;  %v4862_v59 = vpop.f32.mrb[49].mxu0  ;;  %v4905_v60 = vpop.f32.mrb[53].mxu1 }
 0x783   : > { %v4863_v61 = vadd.f32 %v4862_v59, %v3403_v53  ;;  %v4906_v62 = vadd.f32 %v4905_v60, %v3411_v54  ;;  %v4864_v63 = vpop.f32.mrb[50].mxu0  ;;  %v4907_v0 = vpop.f32.mrb[54].mxu1 }
 0x784   : > { %6260 = vtanh.f32 %v4861_v57  ;;  %v4865_v1 = vadd.f32 %v4864_v63, %v3399_v48  ;;  %v4866_v50 = vpop.f32.mrb[51].mxu0  ;;  %v4909_v51 = vpop.f32.mrb[55].mxu1  ;;  %v4908_v6 = vadd.f32 %v4907_v0, %v3407_v49 }
 0x785   : > { %6262 = vtanh.f32 %v4904_v58  ;;  %v4867_v52 = vadd.f32 %v4866_v50, %v3403_v53  ;;  %v4910_v2 = vadd.f32 %v4909_v51, %v3411_v54 }
 0x786   : > { %6264 = vtanh.f32 %v4863_v61 }
 0x787   : > { %6266 = vtanh.f32 %v4906_v62 }
 0x788   : > { %6268 = vtanh.f32 %v4865_v1 }
 0x789   : > { %6270 = vtanh.f32 %v4908_v6 }
 0x78a   : > { %6272 = vtanh.f32 %v4867_v52 }
 0x78b   : > { %6274 = vtanh.f32 %v4910_v2 }
 0x78e   : > { %v6261_v3 = vpop.eup %6260 }
 0x78f   : > { %v6263_v4 = vpop.eup %6262  ;;  %4980 = vst [vmem:[%s7277_s20 + $0xa0] sm:$0xff] %v6261_v3 }
 0x790   : > { %v6265_v5 = vpop.eup %6264  ;;  %4982 = vst [vmem:[%s7277_s20 + $0xb0] sm:$0xff] %v6263_v4 }
 0x791   : > { %v6267_v7 = vpop.eup %6266  ;;  %4981 = vst [vmem:[%s7277_s20 + $0xa8] sm:$0xff] %v6265_v5 }
 0x792   : > { %v6269_v8 = vpop.eup %6268  ;;  %4983 = vst [vmem:[%s7277_s20 + $0xb8] sm:$0xff] %v6267_v7 }
 0x793   : > { %v6271_v9 = vpop.eup %6270  ;;  %5004 = vst [vmem:[%s7277_s20 + $0x160] sm:$0xff] %v6269_v8 }
 0x794   : > { %v6273_v10 = vpop.eup %6272  ;;  %5006 = vst [vmem:[%s7277_s20 + $0x170] sm:$0xff] %v6271_v9 }
 0x795   : > { %v6275_v11 = vpop.eup %6274  ;;  %5005 = vst [vmem:[%s7277_s20 + $0x168] sm:$0xff] %v6273_v10 }
 0x796   : > { %5007 = vst [vmem:[%s7277_s20 + $0x178] sm:$0xff] %v6275_v11 }
 0x797 PF: > { %s26_s18 = sadd.s32 1, %s6314_s18  }
 0x798   : > { %p23_p3 = scmp.ge.s32.totalorder %s26_s18, 5  }
 0x79a   :  { %25 = sbr.rel (!%p23_p3) target bundleno = 1 (0x1), region = 115 }
 0x7a1   :  { %5032 = vsyncpa [#allocation3], 1 }
 0x7a2   :  { %5034 = vsyncpa [#allocation3 + $0x1], 1 }

// kernel: fcn_autoencoder_forward.1
= control target key start
LH: loop header
LB: loop body
LE: loop exit
PB: predicated region body
PF: predicated region fallthrough
CT: control target
= control target key end

     0   :  { %20 = vsyncpa [#allocation3], 0  ;;  %s6401_s18 = smov 0   ;;  %s7364_s0 = inlined_call_operand.vmem [shape: f32[48,3072], index: 0, kind: input, shape index: {}]   ;;  %s7365_s1 = inlined_call_operand.vmem [shape: bf16[3072,128], index: 1, kind: input, shape index: {}]   ;;  %s7366_s2 = inlined_call_operand.vmem [shape: f32[1,128], index: 2, kind: input, shape index: {}]   ;;  %s7367_s3 = inlined_call_operand.vmem [shape: f32[128,64], index: 3, kind: input, shape index: {}]   ;;  %s7368_s4 = inlined_call_operand.vmem [shape: f32[1,64], index: 4, kind: input, shape index: {}]   ;;  %s7369_s5 = inlined_call_operand.vmem [shape: f32[64,12], index: 5, kind: input, shape index: {}]   ;;  %s7370_s6 = inlined_call_operand.vmem [shape: f32[1,12], index: 6, kind: input, shape index: {}]   ;;  %s7371_s7 = inlined_call_operand.vmem [shape: f32[12,12], index: 7, kind: input, shape index: {}]   ;;  %s7372_s8 = inlined_call_operand.vmem [shape: f32[1,12], index: 8, kind: input, shape index: {}]   ;;  %s7373_s9 = inlined_call_operand.vmem [shape: f32[12,64], index: 9, kind: input, shape index: {}]   ;;  %s7374_s10 = inlined_call_operand.vmem [shape: f32[1,64], index: 10, kind: input, shape index: {}]   ;;  %s7375_s11 = inlined_call_operand.vmem [shape: f32[64,128], index: 11, kind: input, shape index: {}]   ;;  %s7376_s12 = inlined_call_operand.vmem [shape: f32[1,128], index: 12, kind: input, shape index: {}]   ;;  %s7377_s13 = inlined_call_operand.hbm [shape: bf16[128,3072], index: 13, kind: input, shape index: {}]   ;;  %s7378_s14 = inlined_call_operand.vmem [shape: f32[1,3072], index: 14, kind: input, shape index: {}]   ;;  %s7379_s15 = inlined_call_operand.vmem [shape: f32[48,3072], index: 15, kind: output, shape index: {}]  }
   0x1 LB: > { %s5078_s19 = sadd.s32 4294967295, %s6314_s18   ;;  %p5080_p0 = scmp.ge.s32.totalorder %s6314_s18, 1  ;;  %s6314_s18 = sphi %s6401_s18, %s26_s18  }
   0x2   : > { %p377_p1 = scmp.lt.s32.totalorder %s6314_s18, 4  ;;  %s6316_s20 = smov [#allocation2]  }
   0x3   : > { %s425_s21 = sshll.u32 %s6316_s20, 4  ;;  %p6415_p3 = scmp.eq.s32.totalorder %s5078_s19, 0  ;;  %s426_s21 = int_to_ptr.vmem [resolvable:$true] %s425_s21 }
   0x4   : > { %p6409_p2 = pnand %p5080_p0, %p377_p1  ;;  %s6276_s27 = scalar_lea.hbm %s7377_s13, 24576 }
   0x5   : > { %s7384_s23 = scalar_select %p6415_p3, 1, 0 }
   0x6   : > { %s7383_s22 = scalar_select %p6409_p2, 1, 0 }
   0x7   : > { %p5969_p4 = pneg %p6409_p2  ;;  %p6277_p6 = scmp.ne.s32.totalorder %s7377_s13, %s6276_s27 }
   0x8   : > { %p6283_p10 = scmp.lt.u32.totalorder %s6276_s27, %s7377_s13 }
   0x9   : > { %p6423_p5 = pnand %p6415_p3, %p5969_p4 }
   0xb   : > { %p6278_p7 = pneg %p6423_p5 }
   0xd   : > { %p6279_p8 = pnand %p6278_p7, %p6277_p6 }
   0xf   : > { %p6280_p9 = pneg %p6279_p8 }
  0x11   : > { %p6285_p11 = pnand %p6283_p10, %p6280_p9 }
  0x13   : > { %6288 = shalt.err (!%p6285_p11)
}
  0x14   : > { %s6289_s17 = scalar_lea.vmem %s426_s21, 24576  ;;  %p6297_p1 = scmp.lt.s32.totalorder %s426_s21, %s426_s21 }
  0x15   : > { %p6290_p12 = scmp.ne.s32.totalorder %s426_s21, %s6289_s17  ;;  %p6298_p4 = scmp.lt.s32.totalorder %s6289_s17, %s6289_s17 }
  0x17   : > { %p6292_p13 = pnand %p6290_p12, %p6278_p7  ;;  %p6299_p3 = por %p6298_p4, %p6297_p1 }
  0x19   : > { %p6293_p0 = pneg %p6292_p13 }
  0x1b   : > { %p6300_p2 = pnand %p6299_p3, %p6293_p0 }
  0x1d   : > { %6303 = shalt.err (!%p6300_p2)
}
  0x1e   : > { %s6317_s20 = smov 1536   ;;  %s6318_s25 = smov 96  }
  0x1f   : > { %5972 = dma.hbm_to_vmem [thread:$0]  (!%p6423_p5), %s7377_s13, 24576, %s426_s21, [#allocation3], %s6317_s20, %s6317_s20, %s6318_s25  }
  0x20   : > { %p7386_p6 = scmp.ne.s32.totalorder %s7383_s22, 0 }
  0x21   : > { %p7387_p8 = scmp.ne.s32.totalorder (!%p7386_p6), %s7384_s23, 0 }
  0x22   : > { %454 = sbr.rel (%p7386_p6) target bundleno = 1943 (0x797), region = 80 }
  0x29   : > { %6309 = dma.done.wait (%p7387_p8), [#allocation3], 24576  }
  0x2a   : > { %6311 = vsyncadd (%p7387_p8), [#allocation3], 4294942720  ;;  %v5988_v0 = vld [vmem:[%s7365_s1 + $0x40] sm:$0xff]   ;;  %v5992_v4 = vld [vmem:[%s7365_s1 + $0x48] sm:$0xff]   ;;  %s5085_s24 = sshll.u32 %s5078_s19, 1  ;;  %vm2743_vm0 = vcmask 523264  }
  0x2b   : > { %v5989_v1 = vld [vmem:[%s7365_s1 + $0xc0] sm:$0xff]   ;;  %5491 = vmatprep.subr.bf16.mxu0 %v5988_v0  ;;  %v5993_v5 = vld [vmem:[%s7365_s1 + $0xc8] sm:$0xff]   ;;  %v5996_v8 = vld [vmem:[%s7365_s1 + $0x50] sm:$0xff]   ;;  %p505_p2 = scmp.lt.s32.totalorder %s5085_s24, 5  ;;  %vm2843_vm1 = vcmask 1043456   ;;  %vm6319_vm2 = vmmov 1  }
  0x2c   : > { %v5990_v2 = vld [vmem:[%s7365_s1] sm:$0xff]   ;;  %5513 = vmatprep.subr.bf16.mxu1 %v5989_v1  ;;  %v5994_v6 = vld [vmem:[%s7365_s1 + $0x8] sm:$0xff]   ;;  %v5997_v9 = vld [vmem:[%s7365_s1 + $0xd0] sm:$0xff]   ;;  %vm2836_vm4 = vcmask 97280  }
  0x2d   : > { %v5991_v3 = vld [vmem:[%s7365_s1 + $0x80] sm:$0xff]   ;;  %5492 = vmatpush3.bf16.msra.mxu0 %v5990_v2  ;;  %v5995_v7 = vld [vmem:[%s7365_s1 + $0x88] sm:$0xff]   ;;  %v5998_v10 = vld [vmem:[%s7365_s1 + $0x10] sm:$0xff]   ;;  %s7391_s24 = smov (!%p505_p2, %s5085_s24), 5 }
  0x2e   : > { %5514 = vmatpush3.bf16.msra.mxu1 %v5991_v3  ;;  %5493 = vmatprep.subr.bf16.mxu0 %v5992_v4  ;;  %v5999_v11 = vld [vmem:[%s7365_s1 + $0x90] sm:$0xff]   ;;  %v6000_v12 = vld [vmem:[%s7365_s1 + $0x58] sm:$0xff]   ;;  %v6004_v16 = vld [vmem:[%s7365_s1 + $0x60] sm:$0xff]   ;;  %s5964_s27 = smul.u32 192, %s7391_s24 }
  0x2f   : > { %5515 = vmatprep.subr.bf16.mxu1 %v5993_v5  ;;  %v6001_v13 = vld [vmem:[%s7365_s1 + $0xd8] sm:$0xff]   ;;  %v6005_v17 = vld [vmem:[%s7365_s1 + $0xe0] sm:$0xff]   ;;  %v6008_v20 = vld [vmem:[%s7365_s1 + $0x68] sm:$0xff]  }
  0x30   : > { %v6002_v14 = vld [vmem:[%s7365_s1 + $0x18] sm:$0xff]   ;;  %v6006_v18 = vld [vmem:[%s7365_s1 + $0x20] sm:$0xff]   ;;  %v6009_v21 = vld [vmem:[%s7365_s1 + $0xe8] sm:$0xff]   ;;  %s6549_s28 = scalar_lea.vmem %s7364_s0, %s5964_s27  ;;  %s7277_s20 = scalar_lea.vmem %s7379_s15, %s5964_s27 }
  0x31   : > { %5494 = vmatpush3.bf16.msra.mxu0 %v5994_v6  ;;  %v6003_v15 = vld [vmem:[%s7365_s1 + $0x98] sm:$0xff]   ;;  %v6007_v19 = vld [vmem:[%s7365_s1 + $0xa0] sm:$0xff]   ;;  %v6010_v22 = vld [vmem:[%s7365_s1 + $0x28] sm:$0xff]  }
  0x32   : > { %5516 = vmatpush3.bf16.msra.mxu1 %v5995_v7  ;;  %5495 = vmatprep.subr.bf16.mxu0 %v5996_v8  ;;  %v6011_v23 = vld [vmem:[%s7365_s1 + $0xa8] sm:$0xff]   ;;  %v6012_v24 = vld [vmem:[%s7365_s1 + $0x70] sm:$0xff]   ;;  %v6016_v28 = vld [vmem:[%s7365_s1 + $0x78] sm:$0xff]  }
  0x33   : > { %5517 = vmatprep.subr.bf16.mxu1 %v5997_v9  ;;  %v6013_v25 = vld [vmem:[%s7365_s1 + $0xf0] sm:$0xff]   ;;  %v6017_v29 = vld [vmem:[%s7365_s1 + $0xf8] sm:$0xff]   ;;  %v520_v32 = vld [vmem:[%s6549_s28 + $0x8] sm:$0xff] }
  0x34   : > { %v6014_v26 = vld [vmem:[%s7365_s1 + $0x30] sm:$0xff]   ;;  %v6018_v30 = vld [vmem:[%s7365_s1 + $0x38] sm:$0xff]   ;;  %v544_v33 = vld [vmem:[%s6549_s28 + $0xc8] sm:$0xff] }
  0x35   : > { %5496 = vmatpush3.bf16.msra.mxu0 %v5998_v10  ;;  %v6015_v27 = vld [vmem:[%s7365_s1 + $0xb0] sm:$0xff]   ;;  %v6019_v31 = vld [vmem:[%s7365_s1 + $0xb8] sm:$0xff]   ;;  %v568_v35 = vpack.c.bf16 %v544_v33, %v520_v32  ;;  %v519_v37 = vld [vmem:[%s6549_s28] sm:$0xff] }
  0x36   : > { %5518 = vmatpush3.bf16.msra.mxu1 %v5999_v11  ;;  %5497 = vmatprep.subr.bf16.mxu0 %v6000_v12  ;;  %v522_v34 = vld [vmem:[%s6549_s28 + $0x18] sm:$0xff]  ;;  %v543_v38 = vld [vmem:[%s6549_s28 + $0xc0] sm:$0xff]  ;;  %v521_v41 = vld [vmem:[%s6549_s28 + $0x10] sm:$0xff] }
  0x37   : > { %5519 = vmatprep.subr.bf16.mxu1 %v6001_v13  ;;  %v546_v36 = vld [vmem:[%s6549_s28 + $0xd8] sm:$0xff]  ;;  %v567_v40 = vpack.c.bf16 %v543_v38, %v519_v37  ;;  %v545_v42 = vld [vmem:[%s6549_s28 + $0xd0] sm:$0xff]  ;;  %2166 = vmatprep.mubr.bf16.mxu0 %v568_v35  ;;  %v6020_v44 = vld [vmem:[%s7365_s1 + $0x140] sm:$0xff]  }
  0x38   : > { %v570_v39 = vpack.c.bf16 %v546_v36, %v522_v34  ;;  %v569_v43 = vpack.c.bf16 %v545_v42, %v521_v41  ;;  %v6021_v45 = vld [vmem:[%s7365_s1 + $0x1c0] sm:$0xff]   ;;  %v6024_v48 = vld [vmem:[%s7365_s1 + $0x148] sm:$0xff]   ;;  %v6028_v52 = vld [vmem:[%s7365_s1 + $0x150] sm:$0xff]  }
  0x39   : > { %5498 = vmatpush3.bf16.msra.mxu0 %v6002_v14  ;;  %v6022_v46 = vld [vmem:[%s7365_s1 + $0x100] sm:$0xff]   ;;  %v6025_v49 = vld [vmem:[%s7365_s1 + $0x1c8] sm:$0xff]   ;;  %v6029_v53 = vld [vmem:[%s7365_s1 + $0x1d0] sm:$0xff]  }
  0x3a   : > { %5520 = vmatpush3.bf16.msra.mxu1 %v6003_v15  ;;  %5499 = vmatprep.subr.bf16.mxu0 %v6004_v16  ;;  %v6023_v47 = vld [vmem:[%s7365_s1 + $0x180] sm:$0xff]   ;;  %v6026_v50 = vld [vmem:[%s7365_s1 + $0x108] sm:$0xff]   ;;  %v6030_v54 = vld [vmem:[%s7365_s1 + $0x110] sm:$0xff]  }
  0x3b   : > { %5521 = vmatprep.subr.bf16.mxu1 %v6005_v17  ;;  %2207 = vmatprep.mubr.bf16.mxu1 %v570_v39  ;;  %v6027_v51 = vld [vmem:[%s7365_s1 + $0x188] sm:$0xff]   ;;  %v6031_v55 = vld [vmem:[%s7365_s1 + $0x190] sm:$0xff]   ;;  %v6032_v56 = vld [vmem:[%s7365_s1 + $0x158] sm:$0xff]  }
  0x3c   : > { %v6033_v57 = vld [vmem:[%s7365_s1 + $0x1d8] sm:$0xff]   ;;  %v6036_v60 = vld [vmem:[%s7365_s1 + $0x160] sm:$0xff]   ;;  %v6040_v0 = vld [vmem:[%s7365_s1 + $0x168] sm:$0xff]  }
  0x3d   : > { %5500 = vmatpush3.bf16.msra.mxu0 %v6006_v18  ;;  %v6034_v58 = vld [vmem:[%s7365_s1 + $0x118] sm:$0xff]   ;;  %v6037_v61 = vld [vmem:[%s7365_s1 + $0x1e0] sm:$0xff]   ;;  %v6041_v1 = vld [vmem:[%s7365_s1 + $0x1e8] sm:$0xff]  }
  0x3e   : > { %5522 = vmatpush3.bf16.msra.mxu1 %v6007_v19  ;;  %5501 = vmatprep.subr.bf16.mxu0 %v6008_v20  ;;  %v6035_v59 = vld [vmem:[%s7365_s1 + $0x198] sm:$0xff]   ;;  %v6038_v62 = vld [vmem:[%s7365_s1 + $0x120] sm:$0xff]   ;;  %v6042_v2 = vld [vmem:[%s7365_s1 + $0x128] sm:$0xff]  }
  0x3f   : > { %5523 = vmatprep.subr.bf16.mxu1 %v6009_v21  ;;  %v6039_v63 = vld [vmem:[%s7365_s1 + $0x1a0] sm:$0xff]   ;;  %v6043_v3 = vld [vmem:[%s7365_s1 + $0x1a8] sm:$0xff]   ;;  %v6044_v4 = vld [vmem:[%s7365_s1 + $0x170] sm:$0xff]  }
  0x40   : > { %v6045_v5 = vld [vmem:[%s7365_s1 + $0x1f0] sm:$0xff]   ;;  %v6048_v8 = vld [vmem:[%s7365_s1 + $0x178] sm:$0xff]   ;;  %v524_v12 = vld [vmem:[%s6549_s28 + $0x28] sm:$0xff] }
  0x41   : > { %5502 = vmatpush3.bf16.msra.mxu0 %v6010_v22  ;;  %v6046_v6 = vld [vmem:[%s7365_s1 + $0x130] sm:$0xff]   ;;  %v6049_v9 = vld [vmem:[%s7365_s1 + $0x1f8] sm:$0xff]   ;;  %v548_v13 = vld [vmem:[%s6549_s28 + $0xe8] sm:$0xff] }
  0x42   : > { %5524 = vmatpush3.bf16.msra.mxu1 %v6011_v23  ;;  %5503 = vmatprep.subr.bf16.mxu0 %v6012_v24  ;;  %v6047_v7 = vld [vmem:[%s7365_s1 + $0x1b0] sm:$0xff]   ;;  %v6050_v10 = vld [vmem:[%s7365_s1 + $0x138] sm:$0xff]   ;;  %v572_v16 = vpack.c.bf16 %v548_v13, %v524_v12  ;;  %v523_v18 = vld [vmem:[%s6549_s28 + $0x20] sm:$0xff] }
  0x43   : > { %5525 = vmatprep.subr.bf16.mxu1 %v6013_v25  ;;  %v6051_v11 = vld [vmem:[%s7365_s1 + $0x1b8] sm:$0xff]   ;;  %v547_v19 = vld [vmem:[%s6549_s28 + $0xe0] sm:$0xff]  ;;  %v525_v20 = vld [vmem:[%s6549_s28 + $0x30] sm:$0xff] }
  0x44   : > { %v526_v14 = vld [vmem:[%s6549_s28 + $0x38] sm:$0xff]  ;;  %v571_v21 = vpack.c.bf16 %v547_v19, %v523_v18  ;;  %v549_v22 = vld [vmem:[%s6549_s28 + $0xf0] sm:$0xff]  ;;  %v6052_v24 = vld [vmem:[%s7365_s1 + $0x240] sm:$0xff]  }
  0x45   : > { %5504 = vmatpush3.bf16.msra.mxu0 %v6014_v26  ;;  %v550_v15 = vld [vmem:[%s6549_s28 + $0xf8] sm:$0xff]  ;;  %v573_v23 = vpack.c.bf16 %v549_v22, %v525_v20  ;;  %v6053_v25 = vld [vmem:[%s7365_s1 + $0x2c0] sm:$0xff]   ;;  %v6060_v32 = vld [vmem:[%s7365_s1 + $0x250] sm:$0xff]  }
  0x46   : > { %5526 = vmatpush3.bf16.msra.mxu1 %v6015_v27  ;;  %5505 = vmatprep.subr.bf16.mxu0 %v6016_v28  ;;  %v574_v17 = vpack.c.bf16 %v550_v15, %v526_v14  ;;  %v6054_v26 = vld [vmem:[%s7365_s1 + $0x200] sm:$0xff]   ;;  %v6056_v28 = vld [vmem:[%s7365_s1 + $0x248] sm:$0xff]   ;;  %v6061_v33 = vld [vmem:[%s7365_s1 + $0x2d0] sm:$0xff]  }
  0x47   : > { %5527 = vmatprep.subr.bf16.mxu1 %v6017_v29  ;;  %v6055_v27 = vld [vmem:[%s7365_s1 + $0x280] sm:$0xff]   ;;  %v6057_v29 = vld [vmem:[%s7365_s1 + $0x2c8] sm:$0xff]   ;;  %v6062_v34 = vld [vmem:[%s7365_s1 + $0x210] sm:$0xff]  }
  0x48   : > { %v6063_v35 = vld [vmem:[%s7365_s1 + $0x290] sm:$0xff]   ;;  %v6064_v36 = vld [vmem:[%s7365_s1 + $0x258] sm:$0xff]   ;;  %v6069_v41 = vld [vmem:[%s7365_s1 + $0x2e0] sm:$0xff]  }
  0x49   : > { %5506 = vmatpush3.bf16.msra.mxu0 %v6018_v30  ;;  %v6058_v30 = vld [vmem:[%s7365_s1 + $0x208] sm:$0xff]   ;;  %v6065_v37 = vld [vmem:[%s7365_s1 + $0x2d8] sm:$0xff]   ;;  %v6070_v42 = vld [vmem:[%s7365_s1 + $0x220] sm:$0xff]  }
  0x4a   : > { %5528 = vmatpush3.bf16.msra.mxu1 %v6019_v31  ;;  %5535 = vmatprep.subr.bf16.mxu0 %v6020_v44  ;;  %v6059_v31 = vld [vmem:[%s7365_s1 + $0x288] sm:$0xff]   ;;  %v6066_v38 = vld [vmem:[%s7365_s1 + $0x218] sm:$0xff]   ;;  %v6092_v12 = vld [vmem:[%s7365_s1 + $0x350] sm:$0xff]  }
  0x4b   : > { %5557 = vmatprep.subr.bf16.mxu1 %v6021_v45  ;;  %v6067_v39 = vld [vmem:[%s7365_s1 + $0x298] sm:$0xff]   ;;  %v6072_v44 = vld [vmem:[%s7365_s1 + $0x268] sm:$0xff]   ;;  %v6093_v13 = vld [vmem:[%s7365_s1 + $0x3d0] sm:$0xff]  }
  0x4c   : > { %2167 = vmatmul.mubr.bf16.vlgmr.msra.gmra.mrb[0].mxu0 %v567_v40  ;;  %v6068_v40 = vld [vmem:[%s7365_s1 + $0x260] sm:$0xff]   ;;  %v6073_v45 = vld [vmem:[%s7365_s1 + $0x2e8] sm:$0xff]   ;;  %v6094_v14 = vld [vmem:[%s7365_s1 + $0x310] sm:$0xff]  }
  0x4d   : > { %2208 = vmatmul.mubr.bf16.vlgmr.msra.gmra.mrb[0].mxu1 %v569_v43  ;;  %5536 = vmatpush3.bf16.msra.mxu0 %v6022_v46  ;;  %v6071_v43 = vld [vmem:[%s7365_s1 + $0x2a0] sm:$0xff]   ;;  %v6074_v46 = vld [vmem:[%s7365_s1 + $0x228] sm:$0xff]   ;;  %v6095_v15 = vld [vmem:[%s7365_s1 + $0x390] sm:$0xff]  }
  0x4e   : > { %5558 = vmatpush3.bf16.msra.mxu1 %v6023_v47  ;;  %5537 = vmatprep.subr.bf16.mxu0 %v6024_v48  ;;  %v6075_v47 = vld [vmem:[%s7365_s1 + $0x2a8] sm:$0xff]   ;;  %v6076_v48 = vld [vmem:[%s7365_s1 + $0x270] sm:$0xff]   ;;  %v6098_v18 = vld [vmem:[%s7365_s1 + $0x318] sm:$0xff]  }
  0x4f   : > { %5559 = vmatprep.subr.bf16.mxu1 %v6025_v49  ;;  %2248 = vmatprep.mubr.bf16.mxu0 %v572_v16  ;;  %v6077_v49 = vld [vmem:[%s7365_s1 + $0x2f0] sm:$0xff]   ;;  %v6096_v16 = vld [vmem:[%s7365_s1 + $0x358] sm:$0xff]   ;;  %v6100_v20 = vld [vmem:[%s7365_s1 + $0x360] sm:$0xff]  }
  0x50   : > { %2289 = vmatprep.mubr.bf16.mxu1 %v574_v17  ;;  %v6097_v17 = vld [vmem:[%s7365_s1 + $0x3d8] sm:$0xff]   ;;  %v6102_v22 = vld [vmem:[%s7365_s1 + $0x320] sm:$0xff]   ;;  %vm7171_vm3 = vmpackc.low %vm2843_vm1, %vm6319_vm2 }
  0x51   : > { %5538 = vmatpush3.bf16.msra.mxu0 %v6026_v50  ;;  %v6078_v50 = vld [vmem:[%s7365_s1 + $0x230] sm:$0xff]   ;;  %v6099_v19 = vld [vmem:[%s7365_s1 + $0x398] sm:$0xff]  }
  0x52   : > { %5560 = vmatpush3.bf16.msra.mxu1 %v6027_v51  ;;  %5539 = vmatprep.subr.bf16.mxu0 %v6028_v52  ;;  %v6079_v51 = vld [vmem:[%s7365_s1 + $0x2b0] sm:$0xff]   ;;  %v6080_v52 = vld [vmem:[%s7365_s1 + $0x278] sm:$0xff]  }
  0x53   : > { %5561 = vmatprep.subr.bf16.mxu1 %v6029_v53  ;;  %v6081_v53 = vld [vmem:[%s7365_s1 + $0x2f8] sm:$0xff]  }
  0x55   : > { %5540 = vmatpush3.bf16.msra.mxu0 %v6030_v54  ;;  %v6082_v54 = vld [vmem:[%s7365_s1 + $0x238] sm:$0xff]  }
  0x56   : > { %5562 = vmatpush3.bf16.msra.mxu1 %v6031_v55  ;;  %5541 = vmatprep.subr.bf16.mxu0 %v6032_v56  ;;  %v6083_v55 = vld [vmem:[%s7365_s1 + $0x2b8] sm:$0xff]   ;;  %v528_v56 = vld [vmem:[%s6549_s28 + $0x48] sm:$0xff] }
  0x57   : > { %5563 = vmatprep.subr.bf16.mxu1 %v6033_v57  ;;  %v552_v57 = vld [vmem:[%s6549_s28 + $0x108] sm:$0xff] }
  0x59   : > { %5542 = vmatpush3.bf16.msra.mxu0 %v6034_v58  ;;  %v576_v58 = vpack.c.bf16 %v552_v57, %v528_v56  ;;  %v6124_v56 = vld [vmem:[%s7365_s1 + $0x450] sm:$0xff]  }
  0x5a   : > { %5564 = vmatpush3.bf16.msra.mxu1 %v6035_v59  ;;  %5543 = vmatprep.subr.bf16.mxu0 %v6036_v60  ;;  %v530_v59 = vld [vmem:[%s6549_s28 + $0x58] sm:$0xff]  ;;  %v6125_v57 = vld [vmem:[%s7365_s1 + $0x4d0] sm:$0xff]  }
  0x5b   : > { %5565 = vmatprep.subr.bf16.mxu1 %v6037_v61  ;;  %v554_v60 = vld [vmem:[%s6549_s28 + $0x118] sm:$0xff]  ;;  %v527_v61 = vld [vmem:[%s6549_s28 + $0x40] sm:$0xff] }
  0x5d   : > { %5544 = vmatpush3.bf16.msra.mxu0 %v6038_v62  ;;  %v578_v62 = vpack.c.bf16 %v554_v60, %v530_v59  ;;  %v6127_v59 = vld [vmem:[%s7365_s1 + $0x490] sm:$0xff]   ;;  %v6128_v60 = vld [vmem:[%s7365_s1 + $0x458] sm:$0xff]  }
  0x5e   : > { %5566 = vmatpush3.bf16.msra.mxu1 %v6039_v63  ;;  %5545 = vmatprep.subr.bf16.mxu0 %v6040_v0  ;;  %v551_v63 = vld [vmem:[%s6549_s28 + $0x100] sm:$0xff]  ;;  %v529_v0 = vld [vmem:[%s6549_s28 + $0x50] sm:$0xff] }
  0x5f   : > { %5567 = vmatprep.subr.bf16.mxu1 %v6041_v1  ;;  %v553_v1 = vld [vmem:[%s6549_s28 + $0x110] sm:$0xff] }
  0x61   : > { %5546 = vmatpush3.bf16.msra.mxu0 %v6042_v2  ;;  %v575_v2 = vpack.c.bf16 %v551_v63, %v527_v61  ;;  %v6129_v61 = vld [vmem:[%s7365_s1 + $0x4d8] sm:$0xff]  }
  0x62   : > { %5568 = vmatpush3.bf16.msra.mxu1 %v6043_v3  ;;  %5547 = vmatprep.subr.bf16.mxu0 %v6044_v4  ;;  %v577_v3 = vpack.c.bf16 %v553_v1, %v529_v0  ;;  %v6084_v4 = vld [vmem:[%s7365_s1 + $0x340] sm:$0xff]   ;;  %v6131_v63 = vld [vmem:[%s7365_s1 + $0x498] sm:$0xff]  }
  0x63   : > { %5569 = vmatprep.subr.bf16.mxu1 %v6045_v5  ;;  %v6085_v5 = vld [vmem:[%s7365_s1 + $0x3c0] sm:$0xff]  }
  0x64   : > { %v6132_v0 = vld [vmem:[%s7365_s1 + $0x460] sm:$0xff]  }
  0x65   : > { %5548 = vmatpush3.bf16.msra.mxu0 %v6046_v6  ;;  %v6086_v6 = vld [vmem:[%s7365_s1 + $0x300] sm:$0xff]  }
  0x66   : > { %5570 = vmatpush3.bf16.msra.mxu1 %v6047_v7  ;;  %5549 = vmatprep.subr.bf16.mxu0 %v6048_v8  ;;  %v6087_v7 = vld [vmem:[%s7365_s1 + $0x380] sm:$0xff]   ;;  %v6088_v8 = vld [vmem:[%s7365_s1 + $0x348] sm:$0xff]  }
  0x67   : > { %5571 = vmatprep.subr.bf16.mxu1 %v6049_v9  ;;  %v6089_v9 = vld [vmem:[%s7365_s1 + $0x3c8] sm:$0xff]   ;;  %v6133_v1 = vld [vmem:[%s7365_s1 + $0x4e0] sm:$0xff]  }
  0x69   : > { %5550 = vmatpush3.bf16.msra.mxu0 %v6050_v10  ;;  %v6090_v10 = vld [vmem:[%s7365_s1 + $0x308] sm:$0xff]  }
  0x6a   : > { %5572 = vmatpush3.bf16.msra.mxu1 %v6051_v11  ;;  %5579 = vmatprep.subr.bf16.mxu0 %v6052_v24  ;;  %v6091_v11 = vld [vmem:[%s7365_s1 + $0x388] sm:$0xff]  }
  0x6b   : > { %5601 = vmatprep.subr.bf16.mxu1 %v6053_v25  ;;  %v6104_v24 = vld [vmem:[%s7365_s1 + $0x368] sm:$0xff]  }
  0x6c   : > { %2249 = vmatmul.mubr.bf16.vlgmr.msra.gmra.mrb[4].mxu0 %v571_v21  ;;  %v6101_v21 = vld [vmem:[%s7365_s1 + $0x3e0] sm:$0xff]   ;;  %v6105_v25 = vld [vmem:[%s7365_s1 + $0x3e8] sm:$0xff]  }
  0x6d   : > { %2290 = vmatmul.mubr.bf16.vlgmr.msra.gmra.mrb[4].mxu1 %v573_v23  ;;  %5580 = vmatpush3.bf16.msra.mxu0 %v6054_v26  ;;  %v6103_v23 = vld [vmem:[%s7365_s1 + $0x3a0] sm:$0xff]   ;;  %v6106_v26 = vld [vmem:[%s7365_s1 + $0x328] sm:$0xff]  }
  0x6e   : > { %5602 = vmatpush3.bf16.msra.mxu1 %v6055_v27  ;;  %5581 = vmatprep.subr.bf16.mxu0 %v6056_v28  ;;  %v6107_v27 = vld [vmem:[%s7365_s1 + $0x3a8] sm:$0xff]   ;;  %v6108_v28 = vld [vmem:[%s7365_s1 + $0x370] sm:$0xff]  }
  0x6f   : > { %5603 = vmatprep.subr.bf16.mxu1 %v6057_v29  ;;  %2330 = vmatprep.mubr.bf16.mxu0 %v576_v58  ;;  %v6109_v29 = vld [vmem:[%s7365_s1 + $0x3f0] sm:$0xff]  }
  0x70   : > { %2371 = vmatprep.mubr.bf16.mxu1 %v578_v62  ;;  %v6126_v58 = vld [vmem:[%s7365_s1 + $0x410] sm:$0xff]   ;;  %v6130_v62 = vld [vmem:[%s7365_s1 + $0x418] sm:$0xff]  }
  0x71   : > { %5582 = vmatpush3.bf16.msra.mxu0 %v6058_v30  ;;  %v6110_v30 = vld [vmem:[%s7365_s1 + $0x330] sm:$0xff]  }
  0x72   : > { %5604 = vmatpush3.bf16.msra.mxu1 %v6059_v31  ;;  %5583 = vmatprep.subr.bf16.mxu0 %v6060_v32  ;;  %v6111_v31 = vld [vmem:[%s7365_s1 + $0x3b0] sm:$0xff]   ;;  %v6112_v32 = vld [vmem:[%s7365_s1 + $0x378] sm:$0xff]  }
  0x73   : > { %5605 = vmatprep.subr.bf16.mxu1 %v6061_v33  ;;  %v6113_v33 = vld [vmem:[%s7365_s1 + $0x3f8] sm:$0xff]  }
  0x75   : > { %5584 = vmatpush3.bf16.msra.mxu0 %v6062_v34  ;;  %v6114_v34 = vld [vmem:[%s7365_s1 + $0x338] sm:$0xff]  }
  0x76   : > { %5606 = vmatpush3.bf16.msra.mxu1 %v6063_v35  ;;  %5585 = vmatprep.subr.bf16.mxu0 %v6064_v36  ;;  %v6115_v35 = vld [vmem:[%s7365_s1 + $0x3b8] sm:$0xff]   ;;  %v532_v36 = vld [vmem:[%s6549_s28 + $0x68] sm:$0xff] }
  0x77   : > { %5607 = vmatprep.subr.bf16.mxu1 %v6065_v37  ;;  %v556_v37 = vld [vmem:[%s6549_s28 + $0x128] sm:$0xff] }
  0x79   : > { %5586 = vmatpush3.bf16.msra.mxu0 %v6066_v38  ;;  %v534_v38 = vld [vmem:[%s6549_s28 + $0x78] sm:$0xff] }
  0x7a   : > { %5608 = vmatpush3.bf16.msra.mxu1 %v6067_v39  ;;  %5587 = vmatprep.subr.bf16.mxu0 %v6068_v40  ;;  %v580_v39 = vpack.c.bf16 %v556_v37, %v532_v36  ;;  %v558_v40 = vld [vmem:[%s6549_s28 + $0x138] sm:$0xff]  ;;  %v6156_v36 = vld [vmem:[%s7365_s1 + $0x550] sm:$0xff]  }
  0x7b   : > { %5609 = vmatprep.subr.bf16.mxu1 %v6069_v41  ;;  %v531_v41 = vld [vmem:[%s6549_s28 + $0x60] sm:$0xff]  ;;  %v6157_v37 = vld [vmem:[%s7365_s1 + $0x5d0] sm:$0xff]  }
  0x7d   : > { %5588 = vmatpush3.bf16.msra.mxu0 %v6070_v42  ;;  %v555_v42 = vld [vmem:[%s6549_s28 + $0x120] sm:$0xff] }
  0x7e   : > { %5610 = vmatpush3.bf16.msra.mxu1 %v6071_v43  ;;  %5589 = vmatprep.subr.bf16.mxu0 %v6072_v44  ;;  %v582_v43 = vpack.c.bf16 %v558_v40, %v534_v38  ;;  %v579_v44 = vpack.c.bf16 %v555_v42, %v531_v41  ;;  %v6158_v38 = vld [vmem:[%s7365_s1 + $0x510] sm:$0xff]   ;;  %v6160_v40 = vld [vmem:[%s7365_s1 + $0x558] sm:$0xff]  }
  0x7f   : > { %5611 = vmatprep.subr.bf16.mxu1 %v6073_v45  ;;  %v533_v45 = vld [vmem:[%s6549_s28 + $0x70] sm:$0xff]  ;;  %v6161_v41 = vld [vmem:[%s7365_s1 + $0x5d8] sm:$0xff]  }
  0x80   : > { %v6162_v42 = vld [vmem:[%s7365_s1 + $0x518] sm:$0xff]  }
  0x81   : > { %5590 = vmatpush3.bf16.msra.mxu0 %v6074_v46  ;;  %v557_v46 = vld [vmem:[%s6549_s28 + $0x130] sm:$0xff] }
  0x82   : > { %5612 = vmatpush3.bf16.msra.mxu1 %v6075_v47  ;;  %5591 = vmatprep.subr.bf16.mxu0 %v6076_v48  ;;  %v581_v47 = vpack.c.bf16 %v557_v46, %v533_v45  ;;  %v6116_v48 = vld [vmem:[%s7365_s1 + $0x440] sm:$0xff]  }
  0x83   : > { %5613 = vmatprep.subr.bf16.mxu1 %v6077_v49  ;;  %v6117_v49 = vld [vmem:[%s7365_s1 + $0x4c0] sm:$0xff]  }
  0x84   : > { %v6165_v45 = vld [vmem:[%s7365_s1 + $0x5e0] sm:$0xff]  }
  0x85   : > { %5592 = vmatpush3.bf16.msra.mxu0 %v6078_v50  ;;  %v6118_v50 = vld [vmem:[%s7365_s1 + $0x400] sm:$0xff]  }
  0x86   : > { %5614 = vmatpush3.bf16.msra.mxu1 %v6079_v51  ;;  %5593 = vmatprep.subr.bf16.mxu0 %v6080_v52  ;;  %v6119_v51 = vld [vmem:[%s7365_s1 + $0x480] sm:$0xff]   ;;  %v6120_v52 = vld [vmem:[%s7365_s1 + $0x448] sm:$0xff]  }
  0x87   : > { %5615 = vmatprep.subr.bf16.mxu1 %v6081_v53  ;;  %v6121_v53 = vld [vmem:[%s7365_s1 + $0x4c8] sm:$0xff]   ;;  %v6166_v46 = vld [vmem:[%s7365_s1 + $0x520] sm:$0xff]  }
  0x89   : > { %5594 = vmatpush3.bf16.msra.mxu0 %v6082_v54  ;;  %v6122_v54 = vld [vmem:[%s7365_s1 + $0x408] sm:$0xff]  }
  0x8a   : > { %5616 = vmatpush3.bf16.msra.mxu1 %v6083_v55  ;;  %5623 = vmatprep.subr.bf16.mxu0 %v6084_v4  ;;  %v6123_v55 = vld [vmem:[%s7365_s1 + $0x488] sm:$0xff]  }
  0x8b   : > { %5645 = vmatprep.subr.bf16.mxu1 %v6085_v5  ;;  %v6136_v4 = vld [vmem:[%s7365_s1 + $0x468] sm:$0xff]  }
  0x8c   : > { %2331 = vmatmul.mubr.bf16.vlgmr.msra.gmra.mrb[8].mxu0 %v575_v2  ;;  %v6134_v2 = vld [vmem:[%s7365_s1 + $0x420] sm:$0xff]   ;;  %v6137_v5 = vld [vmem:[%s7365_s1 + $0x4e8] sm:$0xff]  }
  0x8d   : > { %2372 = vmatmul.mubr.bf16.vlgmr.msra.gmra.mrb[8].mxu1 %v577_v3  ;;  %5624 = vmatpush3.bf16.msra.mxu0 %v6086_v6  ;;  %v6135_v3 = vld [vmem:[%s7365_s1 + $0x4a0] sm:$0xff]   ;;  %v6138_v6 = vld [vmem:[%s7365_s1 + $0x428] sm:$0xff]  }
  0x8e   : > { %5646 = vmatpush3.bf16.msra.mxu1 %v6087_v7  ;;  %5625 = vmatprep.subr.bf16.mxu0 %v6088_v8  ;;  %v6139_v7 = vld [vmem:[%s7365_s1 + $0x4a8] sm:$0xff]   ;;  %v6140_v8 = vld [vmem:[%s7365_s1 + $0x470] sm:$0xff]  }
  0x8f   : > { %5647 = vmatprep.subr.bf16.mxu1 %v6089_v9  ;;  %2412 = vmatprep.mubr.bf16.mxu0 %v580_v39  ;;  %v6141_v9 = vld [vmem:[%s7365_s1 + $0x4f0] sm:$0xff]  }
  0x90   : > { %2453 = vmatprep.mubr.bf16.mxu1 %v582_v43  ;;  %v6159_v39 = vld [vmem:[%s7365_s1 + $0x590] sm:$0xff]   ;;  %v6163_v43 = vld [vmem:[%s7365_s1 + $0x598] sm:$0xff]  }
  0x91   : > { %5626 = vmatpush3.bf16.msra.mxu0 %v6090_v10  ;;  %v6142_v10 = vld [vmem:[%s7365_s1 + $0x430] sm:$0xff]  }
  0x92   : > { %5648 = vmatpush3.bf16.msra.mxu1 %v6091_v11  ;;  %5627 = vmatprep.subr.bf16.mxu0 %v6092_v12  ;;  %v6143_v11 = vld [vmem:[%s7365_s1 + $0x4b0] sm:$0xff]   ;;  %v6144_v12 = vld [vmem:[%s7365_s1 + $0x478] sm:$0xff]  }
  0x93   : > { %5649 = vmatprep.subr.bf16.mxu1 %v6093_v13  ;;  %v6145_v13 = vld [vmem:[%s7365_s1 + $0x4f8] sm:$0xff]  }
  0x95   : > { %5628 = vmatpush3.bf16.msra.mxu0 %v6094_v14  ;;  %v6146_v14 = vld [vmem:[%s7365_s1 + $0x438] sm:$0xff]  }
  0x96   : > { %5650 = vmatpush3.bf16.msra.mxu1 %v6095_v15  ;;  %5629 = vmatprep.subr.bf16.mxu0 %v6096_v16  ;;  %v6147_v15 = vld [vmem:[%s7365_s1 + $0x4b8] sm:$0xff]   ;;  %v536_v16 = vld [vmem:[%s6549_s28 + $0x88] sm:$0xff] }
  0x97   : > { %5651 = vmatprep.subr.bf16.mxu1 %v6097_v17  ;;  %v560_v17 = vld [vmem:[%s6549_s28 + $0x148] sm:$0xff] }
  0x99   : > { %5630 = vmatpush3.bf16.msra.mxu0 %v6098_v18  ;;  %v538_v18 = vld [vmem:[%s6549_s28 + $0x98] sm:$0xff] }
  0x9a   : > { %5652 = vmatpush3.bf16.msra.mxu1 %v6099_v19  ;;  %5631 = vmatprep.subr.bf16.mxu0 %v6100_v20  ;;  %v562_v19 = vld [vmem:[%s6549_s28 + $0x158] sm:$0xff]  ;;  %v584_v20 = vpack.c.bf16 %v560_v17, %v536_v16 }
  0x9b   : > { %5653 = vmatprep.subr.bf16.mxu1 %v6101_v21  ;;  %v586_v21 = vpack.c.bf16 %v562_v19, %v538_v18 }
  0x9d   : > { %5632 = vmatpush3.bf16.msra.mxu0 %v6102_v22  ;;  %v535_v22 = vld [vmem:[%s6549_s28 + $0x80] sm:$0xff] }
  0x9e   : > { %5654 = vmatpush3.bf16.msra.mxu1 %v6103_v23  ;;  %5633 = vmatprep.subr.bf16.mxu0 %v6104_v24  ;;  %v559_v23 = vld [vmem:[%s6549_s28 + $0x140] sm:$0xff]  ;;  %v537_v24 = vld [vmem:[%s6549_s28 + $0x90] sm:$0xff] }
  0x9f   : > { %5655 = vmatprep.subr.bf16.mxu1 %v6105_v25  ;;  %v583_v25 = vpack.c.bf16 %v559_v23, %v535_v22 }
  0xa1   : > { %5634 = vmatpush3.bf16.msra.mxu0 %v6106_v26  ;;  %v561_v26 = vld [vmem:[%s6549_s28 + $0x150] sm:$0xff] }
  0xa2   : > { %5656 = vmatpush3.bf16.msra.mxu1 %v6107_v27  ;;  %5635 = vmatprep.subr.bf16.mxu0 %v6108_v28  ;;  %v585_v27 = vpack.c.bf16 %v561_v26, %v537_v24  ;;  %v6148_v28 = vld [vmem:[%s7365_s1 + $0x540] sm:$0xff]   ;;  %v2629_v26 = vld [vmem:[%s7367_s3 + $0x8] sm:$0xff] }
  0xa3   : > { %5657 = vmatprep.subr.bf16.mxu1 %v6109_v29  ;;  %v6149_v29 = vld [vmem:[%s7365_s1 + $0x5c0] sm:$0xff]  }
  0xa5   : > { %5636 = vmatpush3.bf16.msra.mxu0 %v6110_v30  ;;  %v6150_v30 = vld [vmem:[%s7365_s1 + $0x500] sm:$0xff]  }
  0xa6   : > { %5658 = vmatpush3.bf16.msra.mxu1 %v6111_v31  ;;  %5637 = vmatprep.subr.bf16.mxu0 %v6112_v32  ;;  %v6151_v31 = vld [vmem:[%s7365_s1 + $0x580] sm:$0xff]   ;;  %v6152_v32 = vld [vmem:[%s7365_s1 + $0x548] sm:$0xff]  }
  0xa7   : > { %5659 = vmatprep.subr.bf16.mxu1 %v6113_v33  ;;  %v6153_v33 = vld [vmem:[%s7365_s1 + $0x5c8] sm:$0xff]  }
  0xa9   : > { %5638 = vmatpush3.bf16.msra.mxu0 %v6114_v34  ;;  %v6154_v34 = vld [vmem:[%s7365_s1 + $0x508] sm:$0xff]  }
  0xaa   : > { %5660 = vmatpush3.bf16.msra.mxu1 %v6115_v35  ;;  %5667 = vmatprep.subr.bf16.mxu0 %v6116_v48  ;;  %v6155_v35 = vld [vmem:[%s7365_s1 + $0x588] sm:$0xff]  }
  0xab   : > { %5689 = vmatprep.subr.bf16.mxu1 %v6117_v49  ;;  %v6168_v48 = vld [vmem:[%s7365_s1 + $0x568] sm:$0xff]  }
  0xac   : > { %2413 = vmatmul.mubr.bf16.vlgmr.msra.gmra.mrb[12].mxu0 %v579_v44  ;;  %v6164_v44 = vld [vmem:[%s7365_s1 + $0x560] sm:$0xff]   ;;  %v6169_v49 = vld [vmem:[%s7365_s1 + $0x5e8] sm:$0xff]  }
  0xad   : > { %2454 = vmatmul.mubr.bf16.vlgmr.msra.gmra.mrb[12].mxu1 %v581_v47  ;;  %5668 = vmatpush3.bf16.msra.mxu0 %v6118_v50  ;;  %v6167_v47 = vld [vmem:[%s7365_s1 + $0x5a0] sm:$0xff]   ;;  %v6170_v50 = vld [vmem:[%s7365_s1 + $0x528] sm:$0xff]  }
  0xae   : > { %5690 = vmatpush3.bf16.msra.mxu1 %v6119_v51  ;;  %5669 = vmatprep.subr.bf16.mxu0 %v6120_v52  ;;  %v6171_v51 = vld [vmem:[%s7365_s1 + $0x5a8] sm:$0xff]   ;;  %v6172_v52 = vld [vmem:[%s7365_s1 + $0x570] sm:$0xff]  }
  0xaf   : > { %5691 = vmatprep.subr.bf16.mxu1 %v6121_v53  ;;  %2494 = vmatprep.mubr.bf16.mxu0 %v584_v20  ;;  %v6173_v53 = vld [vmem:[%s7365_s1 + $0x5f0] sm:$0xff]  }
  0xb0   : > { %2535 = vmatprep.mubr.bf16.mxu1 %v586_v21 }
  0xb1   : > { %5670 = vmatpush3.bf16.msra.mxu0 %v6122_v54  ;;  %v6174_v54 = vld [vmem:[%s7365_s1 + $0x530] sm:$0xff]  }
  0xb2   : > { %5692 = vmatpush3.bf16.msra.mxu1 %v6123_v55  ;;  %5671 = vmatprep.subr.bf16.mxu0 %v6124_v56  ;;  %v6175_v55 = vld [vmem:[%s7365_s1 + $0x5b0] sm:$0xff]   ;;  %v6176_v56 = vld [vmem:[%s7365_s1 + $0x578] sm:$0xff]  }
  0xb3   : > { %5693 = vmatprep.subr.bf16.mxu1 %v6125_v57  ;;  %v6177_v57 = vld [vmem:[%s7365_s1 + $0x5f8] sm:$0xff]  }
  0xb5   : > { %5672 = vmatpush3.bf16.msra.mxu0 %v6126_v58  ;;  %v6178_v58 = vld [vmem:[%s7365_s1 + $0x538] sm:$0xff]  }
  0xb6   : > { %5694 = vmatpush3.bf16.msra.mxu1 %v6127_v59  ;;  %5673 = vmatprep.subr.bf16.mxu0 %v6128_v60  ;;  %v6179_v59 = vld [vmem:[%s7365_s1 + $0x5b8] sm:$0xff]   ;;  %v540_v60 = vld [vmem:[%s6549_s28 + $0xa8] sm:$0xff] }
  0xb7   : > { %5695 = vmatprep.subr.bf16.mxu1 %v6129_v61  ;;  %v564_v61 = vld [vmem:[%s6549_s28 + $0x168] sm:$0xff] }
  0xb9   : > { %5674 = vmatpush3.bf16.msra.mxu0 %v6130_v62  ;;  %v588_v62 = vpack.c.bf16 %v564_v61, %v540_v60  ;;  %v2641_v60 = vld [vmem:[%s7367_s3 + $0x68] sm:$0xff] }
  0xba   : > { %5696 = vmatpush3.bf16.msra.mxu1 %v6131_v63  ;;  %5675 = vmatprep.subr.bf16.mxu0 %v6132_v0  ;;  %v542_v63 = vld [vmem:[%s6549_s28 + $0xb8] sm:$0xff] }
  0xbb   : > { %5697 = vmatprep.subr.bf16.mxu1 %v6133_v1  ;;  %v566_v0 = vld [vmem:[%s6549_s28 + $0x178] sm:$0xff]  ;;  %v539_v1 = vld [vmem:[%s6549_s28 + $0xa0] sm:$0xff] }
  0xbd   : > { %5676 = vmatpush3.bf16.msra.mxu0 %v6134_v2  ;;  %v590_v2 = vpack.c.bf16 %v566_v0, %v542_v63  ;;  %v2643_v63 = vld [vmem:[%s7367_s3 + $0x78] sm:$0xff] }
  0xbe   : > { %5698 = vmatpush3.bf16.msra.mxu1 %v6135_v3  ;;  %5677 = vmatprep.subr.bf16.mxu0 %v6136_v4  ;;  %v563_v3 = vld [vmem:[%s6549_s28 + $0x160] sm:$0xff]  ;;  %v541_v4 = vld [vmem:[%s6549_s28 + $0xb0] sm:$0xff] }
  0xbf   : > { %5699 = vmatprep.subr.bf16.mxu1 %v6137_v5  ;;  %v565_v5 = vld [vmem:[%s6549_s28 + $0x170] sm:$0xff] }
  0xc1   : > { %5678 = vmatpush3.bf16.msra.mxu0 %v6138_v6  ;;  %v587_v6 = vpack.c.bf16 %v563_v3, %v539_v1  ;;  %v2728_v1 = vld [vmem:[%s7369_s5] sm:$0xff]  ;;  %v2730_v3 = vld [vmem:[%s7369_s5 + $0x10] sm:$0xff] }
  0xc2   : > { %5700 = vmatpush3.bf16.msra.mxu1 %v6139_v7  ;;  %5679 = vmatprep.subr.bf16.mxu0 %v6140_v8  ;;  %v589_v7 = vpack.c.bf16 %v565_v5, %v541_v4  ;;  %v2731_v5 = vld [vmem:[%s7369_s5 + $0x18] sm:$0xff] }
  0xc3   : > { %5701 = vmatprep.subr.bf16.mxu1 %v6141_v9 }
  0xc5   : > { %5680 = vmatpush3.bf16.msra.mxu0 %v6142_v10  ;;  %v5089_v10 = vld [vmem:[%s7366_s2] ss:$0 sm:$0xff] }
  0xc6   : > { %5702 = vmatpush3.bf16.msra.mxu1 %v6143_v11  ;;  %5681 = vmatprep.subr.bf16.mxu0 %v6144_v12 }
  0xc7   : > { %5703 = vmatprep.subr.bf16.mxu1 %v6145_v13 }
  0xc9   : > { %5682 = vmatpush3.bf16.msra.mxu0 %v6146_v14 }
  0xca   : > { %5704 = vmatpush3.bf16.msra.mxu1 %v6147_v15  ;;  %5711 = vmatprep.subr.bf16.mxu0 %v6148_v28 }
  0xcb   : > { %5733 = vmatprep.subr.bf16.mxu1 %v6149_v29  ;;  %v2631_v29 = vld [vmem:[%s7367_s3 + $0x18] sm:$0xff] }
  0xcc   : > { %2495 = vmatmul.mubr.bf16.vlgmr.msra.gmra.mrb[16].mxu0 %v583_v25  ;;  %v2628_v25 = vld [vmem:[%s7367_s3] sm:$0xff] }
  0xcd   : > { %2536 = vmatmul.mubr.bf16.vlgmr.msra.gmra.mrb[16].mxu1 %v585_v27  ;;  %5712 = vmatpush3.bf16.msra.mxu0 %v6150_v30  ;;  %v2630_v27 = vld [vmem:[%s7367_s3 + $0x10] sm:$0xff]  ;;  %v5888_v28 = vpack.c.bf16 %v2629_v26, %v2628_v25 }
  0xce   : > { %5734 = vmatpush3.bf16.msra.mxu1 %v6151_v31  ;;  %5713 = vmatprep.subr.bf16.mxu0 %v6152_v32  ;;  %v5892_v30 = vpack.c.bf16 %v2631_v29, %v2630_v27  ;;  %v2632_v31 = vld [vmem:[%s7367_s3 + $0x20] sm:$0xff]  ;;  %v2633_v32 = vld [vmem:[%s7367_s3 + $0x28] sm:$0xff] }
  0xcf   : > { %5735 = vmatprep.subr.bf16.mxu1 %v6153_v33  ;;  %2576 = vmatprep.mubr.bf16.mxu0 %v588_v62  ;;  %v5896_v33 = vpack.c.bf16 %v2633_v32, %v2632_v31  ;;  %v2642_v62 = vld [vmem:[%s7367_s3 + $0x70] sm:$0xff] }
  0xd0   : > { %2617 = vmatprep.mubr.bf16.mxu1 %v590_v2  ;;  %v5916_v0 = vpack.c.bf16 %v2643_v63, %v2642_v62  ;;  %v2729_v2 = vld [vmem:[%s7369_s5 + $0x8] sm:$0xff] }
  0xd1   : > { %5714 = vmatpush3.bf16.msra.mxu0 %v6154_v34  ;;  %v2634_v34 = vld [vmem:[%s7367_s3 + $0x30] sm:$0xff]  ;;  %v5920_v4 = vpack.c.bf16 %v2729_v2, %v2728_v1 }
  0xd2   : > { %5736 = vmatpush3.bf16.msra.mxu1 %v6155_v35  ;;  %5715 = vmatprep.subr.bf16.mxu0 %v6156_v36  ;;  %v2635_v35 = vld [vmem:[%s7367_s3 + $0x38] sm:$0xff] }
  0xd3   : > { %5737 = vmatprep.subr.bf16.mxu1 %v6157_v37  ;;  %v5900_v36 = vpack.c.bf16 %v2635_v35, %v2634_v34  ;;  %v2636_v37 = vld [vmem:[%s7367_s3 + $0x40] sm:$0xff] }
  0xd5   : > { %5716 = vmatpush3.bf16.msra.mxu0 %v6158_v38  ;;  %v2637_v38 = vld [vmem:[%s7367_s3 + $0x48] sm:$0xff] }
  0xd6   : > { %5738 = vmatpush3.bf16.msra.mxu1 %v6159_v39  ;;  %5717 = vmatprep.subr.bf16.mxu0 %v6160_v40  ;;  %v5904_v39 = vpack.c.bf16 %v2637_v38, %v2636_v37 }
  0xd7   : > { %5739 = vmatprep.subr.bf16.mxu1 %v6161_v41 }
  0xd9   : > { %5718 = vmatpush3.bf16.msra.mxu0 %v6162_v42 }
  0xda   : > { %5740 = vmatpush3.bf16.msra.mxu1 %v6163_v43  ;;  %5719 = vmatprep.subr.bf16.mxu0 %v6164_v44 }
  0xdb   : > { %5741 = vmatprep.subr.bf16.mxu1 %v6165_v45 }
  0xdd   : > { %5720 = vmatpush3.bf16.msra.mxu0 %v6166_v46 }
  0xde   : > { %5742 = vmatpush3.bf16.msra.mxu1 %v6167_v47  ;;  %5721 = vmatprep.subr.bf16.mxu0 %v6168_v48 }
  0xdf   : > { %5743 = vmatprep.subr.bf16.mxu1 %v6169_v49 }
  0xe1   : > { %5722 = vmatpush3.bf16.msra.mxu0 %v6170_v50 }
  0xe2   : > { %5744 = vmatpush3.bf16.msra.mxu1 %v6171_v51  ;;  %5723 = vmatprep.subr.bf16.mxu0 %v6172_v52 }
  0xe3   : > { %5745 = vmatprep.subr.bf16.mxu1 %v6173_v53 }
  0xe5   : > { %5724 = vmatpush3.bf16.msra.mxu0 %v6174_v54 }
  0xe6   : > { %5746 = vmatpush3.bf16.msra.mxu1 %v6175_v55  ;;  %5725 = vmatprep.subr.bf16.mxu0 %v6176_v56  ;;  %v2638_v56 = vld [vmem:[%s7367_s3 + $0x50] sm:$0xff] }
  0xe7   : > { %5747 = vmatprep.subr.bf16.mxu1 %v6177_v57  ;;  %v2639_v57 = vld [vmem:[%s7367_s3 + $0x58] sm:$0xff] }
  0xe9   : > { %5726 = vmatpush3.bf16.msra.mxu0 %v6178_v58  ;;  %v5908_v58 = vpack.c.bf16 %v2639_v57, %v2638_v56 }
  0xea   : > { %5748 = vmatpush3.bf16.msra.mxu1 %v6179_v59  ;;  %5889 = vmatprep.subr.bf16.mxu0 %v5888_v28  ;;  %v2640_v59 = vld [vmem:[%s7367_s3 + $0x60] sm:$0xff] }
  0xeb   : > { %v5912_v61 = vpack.c.bf16 %v2641_v60, %v2640_v59  ;;  %5921 = vmatprep.subr.bf16.mxu1 %v5920_v4 }
  0xec   : > { %2577 = vmatmul.mubr.bf16.vlgmr.msra.gmra.mrb[20].mxu0 %v587_v6  ;;  %v5924_v6 = vpack.c.bf16 %v2731_v5, %v2730_v3 }
  0xed   : > { %2618 = vmatmul.mubr.bf16.vlgmr.msra.gmra.mrb[20].mxu1 %v589_v7  ;;  %5891 = vmatpush3.bf16.msra.mxu0 %v5888_v28  ;;  %v2732_v7 = vld [vmem:[%s7369_s5 + $0x20] sm:$0xff] }
  0xee   : > { %5893 = vmatprep.subr.bf16.mxu0 %v5892_v30  ;;  %5923 = vmatpush3.bf16.msra.mxu1 %v5920_v4 }
  0xef   : > { %5925 = vmatprep.subr.bf16.mxu1 %v5924_v6 }
  0xf1   : > { %5895 = vmatpush3.bf16.msra.mxu0 %v5892_v30 }
  0xf2   : > { %5897 = vmatprep.subr.bf16.mxu0 %v5896_v33  ;;  %5927 = vmatpush3.bf16.msra.mxu1 %v5924_v6 }
  0xf5   : > { %5899 = vmatpush3.bf16.msra.mxu0 %v5896_v33 }
  0xf6   : > { %5901 = vmatprep.subr.bf16.mxu0 %v5900_v36 }
  0xf9   : > { %5903 = vmatpush3.bf16.msra.mxu0 %v5900_v36 }
  0xfa   : > { %5905 = vmatprep.subr.bf16.mxu0 %v5904_v39 }
  0xfd   : > { %5907 = vmatpush3.bf16.msra.mxu0 %v5904_v39 }
  0xfe   : > { %5909 = vmatprep.subr.bf16.mxu0 %v5908_v58 }
 0x101   : > { %5911 = vmatpush3.bf16.msra.mxu0 %v5908_v58 }
 0x102   : > { %5913 = vmatprep.subr.bf16.mxu0 %v5912_v61 }
 0x105   : > { %5915 = vmatpush3.bf16.msra.mxu0 %v5912_v61 }
 0x106   : > { %5917 = vmatprep.subr.bf16.mxu0 %v5916_v0 }
 0x109   : > { %5919 = vmatpush3.bf16.msra.mxu0 %v5916_v0 }
 0x11f   : > { %v5507_v8 = vpop.f32.mrb[0].mxu0 }
 0x120   : > { %v5529_v9 = vpop.f32.mrb[0].mxu1  ;;  %v5508_v11 = vpop.f32.mrb[1].mxu0 }
 0x121   : > { %v5509_v12 = vadd.f32 %v5508_v11, %v5507_v8  ;;  %v5530_v13 = vpop.f32.mrb[1].mxu1  ;;  %v5510_v14 = vpop.f32.mrb[2].mxu0  ;;  %v2733_v8 = vld [vmem:[%s7369_s5 + $0x28] sm:$0xff] }
 0x122   : > { %v5531_v15 = vadd.f32 %v5530_v13, %v5529_v9  ;;  %v5532_v16 = vpop.f32.mrb[2].mxu1  ;;  %v5511_v17 = vpop.f32.mrb[3].mxu0  ;;  %v5928_v9 = vpack.c.bf16 %v2733_v8, %v2732_v7 }
 0x123   : > { %v2169_v18 = vadd.f32 %v5509_v12, %v5089_v10  ;;  %v5512_v19 = vadd.f32 %v5511_v17, %v5510_v14  ;;  %v5533_v20 = vpop.f32.mrb[3].mxu1 }
 0x124   : > { %v5534_v21 = vadd.f32 %v5533_v20, %v5532_v16  ;;  %5929 = vmatprep.subr.bf16.mxu1 %v5928_v9 }
 0x125   : > { %v2210_v22 = vadd.f32 %v5531_v15, %v2169_v18  ;;  %v2172_v23 = vadd.f32 %v5512_v19, %v5089_v10  ;;  %5931 = vmatpush3.bf16.msra.mxu1 %v5928_v9 }
 0x127   : > { %v2213_v24 = vadd.f32 %v5534_v21, %v2172_v23 }
 0x13f   : > { %v5551_v40 = vpop.f32.mrb[4].mxu0 }
 0x140   : > { %v5573_v41 = vpop.f32.mrb[4].mxu1  ;;  %v5552_v42 = vpop.f32.mrb[5].mxu0 }
 0x141   : > { %v5553_v43 = vadd.f32 %v5552_v42, %v5551_v40  ;;  %v5574_v44 = vpop.f32.mrb[5].mxu1  ;;  %v5554_v45 = vpop.f32.mrb[6].mxu0 }
 0x142   : > { %v5575_v46 = vadd.f32 %v5574_v44, %v5573_v41  ;;  %v5576_v47 = vpop.f32.mrb[6].mxu1  ;;  %v5555_v48 = vpop.f32.mrb[7].mxu0 }
 0x143   : > { %v2251_v49 = vadd.f32 %v5553_v43, %v2210_v22  ;;  %v5556_v50 = vadd.f32 %v5555_v48, %v5554_v45  ;;  %v5577_v51 = vpop.f32.mrb[7].mxu1 }
 0x144   : > { %v5578_v52 = vadd.f32 %v5577_v51, %v5576_v47 }
 0x145   : > { %v2292_v53 = vadd.f32 %v5575_v46, %v2251_v49  ;;  %v2254_v54 = vadd.f32 %v5556_v50, %v2213_v24 }
 0x147   : > { %v2295_v55 = vadd.f32 %v5578_v52, %v2254_v54 }
 0x15f   : > { %v5595_v10 = vpop.f32.mrb[8].mxu0 }
 0x160   : > { %v5617_v11 = vpop.f32.mrb[8].mxu1  ;;  %v5596_v12 = vpop.f32.mrb[9].mxu0 }
 0x161   : > { %v5618_v13 = vpop.f32.mrb[9].mxu1  ;;  %v5597_v14 = vadd.f32 %v5596_v12, %v5595_v10  ;;  %v5598_v16 = vpop.f32.mrb[10].mxu0  ;;  %v2734_v12 = vld [vmem:[%s7369_s5 + $0x30] sm:$0xff] }
 0x162   : > { %v5619_v15 = vadd.f32 %v5618_v13, %v5617_v11  ;;  %v5620_v17 = vpop.f32.mrb[10].mxu1  ;;  %v5599_v18 = vpop.f32.mrb[11].mxu0  ;;  %v2735_v13 = vld [vmem:[%s7369_s5 + $0x38] sm:$0xff] }
 0x163   : > { %v5621_v19 = vpop.f32.mrb[11].mxu1  ;;  %v2333_v20 = vadd.f32 %v5597_v14, %v2292_v53  ;;  %v5600_v21 = vadd.f32 %v5599_v18, %v5598_v16  ;;  %v5932_v14 = vpack.c.bf16 %v2735_v13, %v2734_v12  ;;  %v3226_v12 = vld [vmem:[#allocation2 + $0x360] sm:$0xff] }
 0x164   : > { %v5622_v22 = vadd.f32 %v5621_v19, %v5620_v17 }
 0x165   : > { %v2374_v23 = vadd.f32 %v5619_v15, %v2333_v20  ;;  %v2336_v24 = vadd.f32 %v5600_v21, %v2295_v55  ;;  %5933 = vmatprep.subr.bf16.mxu1 %v5932_v14  ;;  %v5282_v15 = vld [vmem:[%s7368_s4] ss:$0 sm:$0xff] }
 0x166   : > { %5935 = vmatpush3.bf16.msra.mxu1 %v5932_v14 }
 0x167   : > { %v2377_v25 = vadd.f32 %v5622_v22, %v2336_v24  ;;  %v2827_v22 = vld [vmem:[%s7371_s7] sm:$0xff] }
 0x17f   : > { %v5639_v26 = vpop.f32.mrb[12].mxu0 }
 0x180   : > { %v5661_v27 = vpop.f32.mrb[12].mxu1  ;;  %v5640_v28 = vpop.f32.mrb[13].mxu0 }
 0x181   : > { %v5641_v29 = vadd.f32 %v5640_v28, %v5639_v26  ;;  %v5662_v30 = vpop.f32.mrb[13].mxu1  ;;  %v5642_v31 = vpop.f32.mrb[14].mxu0  ;;  %v5283_v26 = vld [vmem:[%s7370_s6] ss:$0 sm:$0xff] }
 0x182   : > { %v5663_v32 = vadd.f32 %v5662_v30, %v5661_v27  ;;  %v5664_v33 = vpop.f32.mrb[14].mxu1  ;;  %v5643_v34 = vpop.f32.mrb[15].mxu0 }
 0x183   : > { %v2415_v35 = vadd.f32 %v5641_v29, %v2374_v23  ;;  %v5644_v36 = vadd.f32 %v5643_v34, %v5642_v31  ;;  %v5665_v37 = vpop.f32.mrb[15].mxu1  ;;  %v2828_v23 = vld [vmem:[%s7371_s7 + $0x8] sm:$0xf] }
 0x184   : > { %v5666_v38 = vadd.f32 %v5665_v37, %v5664_v33  ;;  %v5936_v24 = vpack.c.bf16 %v2828_v23, %v2827_v22  ;;  %v2924_v33 = vld [vmem:[%s7373_s9] sm:$0xff]  ;;  %v2925_v34 = vld [vmem:[%s7373_s9 + $0x8] sm:$0xf] }
 0x185   : > { %v2456_v39 = vadd.f32 %v5663_v32, %v2415_v35  ;;  %v2418_v40 = vadd.f32 %v5644_v36, %v2377_v25  ;;  %v5942_v35 = vpack.c.bf16 %v2925_v34, %v2924_v33  ;;  %v3019_v36 = vld [vmem:[%s7375_s11] sm:$0xff]  ;;  %v3020_v37 = vld [vmem:[%s7375_s11 + $0x8] sm:$0xff] }
 0x186   : > { %5938 = vmatprep.subr.msk.bf16.mxu0 %vm7171_vm3, %v5936_v24  ;;  %v5290_v23 = vld [vmem:[%s7374_s10] ss:$0 sm:$0xff]  ;;  %v3167_v33 = vld [vmem:[#allocation2 + $0x188] sm:$0xff] }
 0x187   : > { %v2459_v41 = vadd.f32 %v5666_v38, %v2418_v40  ;;  %5944 = vmatprep.subr.msk.bf16.mxu1 %vm7171_vm3, %v5942_v35  ;;  %v5948_v38 = vpack.c.bf16 %v3020_v37, %v3019_v36  ;;  %v3179_v34 = vld [vmem:[#allocation2 + $0x1e8] sm:$0xff] }
 0x188   : > { %v5348_v36 = vcombine.high %v3167_v33, %v3179_v34  ;;  %v3191_v37 = vld [vmem:[#allocation2 + $0x248] sm:$0xff] }
 0x19f   : > { %v5683_v42 = vpop.f32.mrb[16].mxu0 }
 0x1a0   : > { %v5705_v43 = vpop.f32.mrb[16].mxu1  ;;  %v5684_v44 = vpop.f32.mrb[17].mxu0 }
 0x1a1   : > { %v5685_v45 = vadd.f32 %v5684_v44, %v5683_v42  ;;  %v5706_v46 = vpop.f32.mrb[17].mxu1  ;;  %v5686_v47 = vpop.f32.mrb[18].mxu0  ;;  %v3021_v44 = vld [vmem:[%s7375_s11 + $0x10] sm:$0xff] }
 0x1a2   : > { %v5707_v48 = vadd.f32 %v5706_v46, %v5705_v43  ;;  %v5708_v49 = vpop.f32.mrb[18].mxu1  ;;  %v5687_v50 = vpop.f32.mrb[19].mxu0 }
 0x1a3   : > { %v2497_v51 = vadd.f32 %v5685_v45, %v2456_v39  ;;  %v5688_v52 = vadd.f32 %v5687_v50, %v5686_v47  ;;  %v5709_v53 = vpop.f32.mrb[19].mxu1  ;;  %v5286_v39 = vld [vmem:[%s7372_s8] ss:$0 sm:$0xff]  ;;  %v3022_v45 = vld [vmem:[%s7375_s11 + $0x18] sm:$0xff]  ;;  %v3024_v50 = vld [vmem:[%s7375_s11 + $0x28] sm:$0xff] }
 0x1a4   : > { %v5710_v54 = vadd.f32 %v5709_v53, %v5708_v49  ;;  %v3023_v49 = vld [vmem:[%s7375_s11 + $0x20] sm:$0xff]  ;;  %v3026_v53 = vld [vmem:[%s7375_s11 + $0x38] sm:$0xff] }
 0x1a5   : > { %v2538_v55 = vadd.f32 %v5707_v48, %v2497_v51  ;;  %v2500_v56 = vadd.f32 %v5688_v52, %v2459_v41  ;;  %v5952_v48 = vpack.c.bf16 %v3022_v45, %v3021_v44  ;;  %v5956_v51 = vpack.c.bf16 %v3024_v50, %v3023_v49  ;;  %v3025_v52 = vld [vmem:[%s7375_s11 + $0x30] sm:$0xff]  ;;  %v3239_v45 = vld [vmem:[#allocation2 + $0x3c8] sm:$0xff] }
 0x1a6   : > { %v3263_v49 = vld [vmem:[#allocation2 + $0x488] sm:$0xff] }
 0x1a7   : > { %v2541_v57 = vadd.f32 %v5710_v54, %v2500_v56  ;;  %v5960_v54 = vpack.c.bf16 %v3026_v53, %v3025_v52  ;;  %v3130_v56 = vld [vmem:[#allocation2 + $0x60] sm:$0xff]  ;;  %v3275_v50 = vld [vmem:[#allocation2 + $0x4e8] sm:$0xff] }
 0x1a8   : > { %v5444_v52 = vcombine.high %v3263_v49, %v3275_v50  ;;  %v5443_v53 = vcombine.low %v3263_v49, %v3275_v50 }
 0x1bf   : > { %v5727_v58 = vpop.f32.mrb[20].mxu0 }
 0x1c0   : > { %v5749_v59 = vpop.f32.mrb[20].mxu1  ;;  %v5728_v60 = vpop.f32.mrb[21].mxu0 }
 0x1c1   : > { %v5750_v61 = vpop.f32.mrb[21].mxu1  ;;  %v5729_v62 = vadd.f32 %v5728_v60, %v5727_v58  ;;  %v5730_v0 = vpop.f32.mrb[22].mxu0  ;;  %v3131_v60 = vld [vmem:[#allocation2 + $0x68] sm:$0xff] }
 0x1c2   : > { %v5751_v63 = vadd.f32 %v5750_v61, %v5749_v59  ;;  %v5752_v1 = vpop.f32.mrb[22].mxu1  ;;  %v5731_v2 = vpop.f32.mrb[23].mxu0  ;;  %v3142_v61 = vld [vmem:[#allocation2 + $0xc0] sm:$0xff] }
 0x1c3   : > { %v5753_v3 = vpop.f32.mrb[23].mxu1  ;;  %v2579_v4 = vadd.f32 %v5729_v62, %v2538_v55  ;;  %v5732_v5 = vadd.f32 %v5731_v2, %v5730_v0  ;;  %v3118_v55 = vld [vmem:[#allocation2] sm:$0xff] }
 0x1c4   : > { %v5754_v6 = vadd.f32 %v5753_v3, %v5752_v1  ;;  %v5297_v58 = vcombine.low %v3118_v55, %v3130_v56  ;;  %v5298_v59 = vcombine.high %v3118_v55, %v3130_v56  ;;  %v3154_v62 = vld [vmem:[#allocation2 + $0x120] sm:$0xff] }
 0x1c5   : > { %v2620_v7 = vadd.f32 %v5751_v63, %v2579_v4  ;;  %v2582_v8 = vadd.f32 %v5732_v5, %v2541_v57  ;;  %v3119_v57 = vld [vmem:[#allocation2 + $0x8] sm:$0xff]  ;;  %v5322_v1 = vcombine.high %v3142_v61, %v3154_v62  ;;  %v5321_v2 = vcombine.low %v3142_v61, %v3154_v62  ;;  %v3166_v3 = vld [vmem:[#allocation2 + $0x180] sm:$0xff]  ;;  %v3120_v62 = vld [vmem:[#allocation2 + $0x10] sm:$0xff] }
 0x1c6   : > { %v5299_v63 = vcombine.low %v3119_v57, %v3131_v60  ;;  %v5300_v0 = vcombine.high %v3119_v57, %v3131_v60  ;;  %v3178_v4 = vld [vmem:[#allocation2 + $0x1e0] sm:$0xff]  ;;  %v3287_v57 = vld [vmem:[#allocation2 + $0x548] sm:$0xff] }
 0x1c7   : > { %v2626_v9 = vmax.f32 %v2620_v7, 0.0  ;;  %v2623_v10 = vadd.f32 %v5754_v6, %v2582_v8  ;;  %v5346_v5 = vcombine.high %v3166_v3, %v3178_v4  ;;  %v5345_v6 = vcombine.low %v3166_v3, %v3178_v4  ;;  %v3190_v7 = vld [vmem:[#allocation2 + $0x240] sm:$0xff] }
 0x1c8   : > { %v3202_v8 = vld [vmem:[#allocation2 + $0x2a0] sm:$0xff] }
 0x1c9   : > { %v2627_v11 = vmax.f32 %v2623_v10, 0.0  ;;  %5833 = vmatprep.mubr.f32.mxu0 %v2626_v9  ;;  %v5370_v9 = vcombine.high %v3190_v7, %v3202_v8  ;;  %v5369_v10 = vcombine.low %v3190_v7, %v3202_v8  ;;  %v3298_v55 = vld [vmem:[#allocation2 + $0x5a0] sm:$0xff] }
 0x1ca   : > { %v5294_v7 = vld [vmem:[%s7376_s12] ss:$0 sm:$0xff] }
 0x1cb   : > { %5834 = vmatmul.mubr.f32.vlgmr.msra.gmra.mrb[24].mxu0 %v2627_v11  ;;  %v3214_v11 = vld [vmem:[#allocation2 + $0x300] sm:$0xff] }
 0x1cc   : > { %5941 = vmatpush3.bf16.msk.msra.mxu0 %vm7171_vm3, %v5936_v24  ;;  %v5394_v13 = vcombine.high %v3214_v11, %v3226_v12  ;;  %v5393_v14 = vcombine.low %v3214_v11, %v3226_v12  ;;  %v3144_v12 = vld [vmem:[#allocation2 + $0xd0] sm:$0xff] }
 0x1cd   : > { %4396 = vmatprep.subr.bf16.mxu0 %v5298_v59 }
 0x29e   : > { %v5835_v16 = vpop.f32.mrb[24].mxu0 }
 0x29f   : > { %v2723_v17 = vadd.f32 %v5835_v16, %v5282_v15  ;;  %v2717_v18 = vpop.f32.mrb[25].mxu0  ;;  %v3250_v16 = vld [vmem:[#allocation2 + $0x420] sm:$0xff] }
 0x2a0   : > { %v2718_v19 = vadd.f32 %v5282_v15, %v2717_v18  ;;  %v3238_v15 = vld [vmem:[#allocation2 + $0x3c0] sm:$0xff] }
 0x2a1   : > { %v2727_v21 = vmax.f32 %v2723_v17, 0.0  ;;  %v5418_v17 = vcombine.high %v3238_v15, %v3250_v16  ;;  %v5417_v18 = vcombine.low %v3238_v15, %v3250_v16  ;;  %v3145_v15 = vld [vmem:[#allocation2 + $0xd8] sm:$0xff] }
 0x2a2   : > { %v2726_v20 = vmax.f32 %v2718_v19, 0.0  ;;  %v3262_v19 = vld [vmem:[#allocation2 + $0x480] sm:$0xff]  ;;  %v3157_v16 = vld [vmem:[#allocation2 + $0x138] sm:$0xff] }
 0x2a4   : > { %5852 = vmatprep.mubr.msk.f32.mxu1 %vm2743_vm0, %v2726_v20  ;;  %v3274_v20 = vld [vmem:[#allocation2 + $0x4e0] sm:$0xff] }
 0x2a5   : > { %5853 = vmatmul.mubr.msk.f32.vlgmr.msra.gmra.mrb[24].mxu1 %vm2743_vm0, %v2727_v21  ;;  %v5442_v21 = vcombine.high %v3262_v19, %v3274_v20  ;;  %v5441_v22 = vcombine.low %v3262_v19, %v3274_v20  ;;  %v5328_v20 = vcombine.high %v3145_v15, %v3157_v16 }
 0x2a6   : > { %5947 = vmatpush3.bf16.msk.msra.mxu1 %vm7171_vm3, %v5942_v35 }
 0x2a7   : > { %5949 = vmatprep.subr.bf16.mxu1 %v5948_v38 }
 0x378   : > { %v5854_v27 = vpop.f32.mrb[24].mxu1 }
 0x379   : > { %v2822_v28 = vadd.f32 %v5854_v27, %v5283_v26  ;;  %v2816_v29 = vpop.f32.mrb[25].mxu1 }
 0x37a   : > { %v2817_v30 = vadd.f32 %v5283_v26, %v2816_v29  ;;  %v3155_v29 = vld [vmem:[#allocation2 + $0x128] sm:$0xff] }
 0x37b   : > { %v2826_v32 = vmax.f32 %v2822_v28, 0.0  ;;  %v3143_v28 = vld [vmem:[#allocation2 + $0xc8] sm:$0xff] }
 0x37c   : > { %v2825_v31 = vmax.f32 %v2817_v30, 0.0  ;;  %v5323_v35 = vcombine.low %v3143_v28, %v3155_v29 }
 0x37e   : > { %5859 = vmatprep.mubr.msk.f32.mxu0 %vm2836_vm4, %v2825_v31 }
 0x37f   : > { %5860 = vmatmul.mubr.msk.f32.vlgmr.msra.gmra.mrb[26].mxu0 %vm2836_vm4, %v2826_v32  ;;  %v5324_v32 = vcombine.high %v3143_v28, %v3155_v29  ;;  %v3192_v29 = vld [vmem:[#allocation2 + $0x250] sm:$0xff] }
 0x380   : > { %4397 = vmatpush1.bf16.msra.mxu0 %v5297_v58  ;;  %v3299_v58 = vld [vmem:[#allocation2 + $0x5a8] sm:$0xff] }
 0x381   : > { %4398 = vmatprep.subr.bf16.mxu0 %v5322_v1  ;;  %v5467_v60 = vcombine.low %v3287_v57, %v3299_v58  ;;  %v5468_v61 = vcombine.high %v3287_v57, %v3299_v58 }
 0x384   : > { %4399 = vmatpush1.bf16.msra.mxu0 %v5321_v2  ;;  %v3133_v2 = vld [vmem:[#allocation2 + $0x78] sm:$0xff] }
 0x385   : > { %4400 = vmatprep.subr.bf16.mxu0 %v5346_v5 }
 0x388   : > { %4401 = vmatpush1.bf16.msra.mxu0 %v5345_v6  ;;  %v6320_v6 = vmov 0  }
 0x389   : > { %4402 = vmatprep.subr.bf16.mxu0 %v5370_v9  ;;  %4428 = vmatprep.mubr.bf16.mxu0 %v6320_v6 }
 0x38c   : > { %4403 = vmatpush1.bf16.msra.mxu0 %v5369_v10 }
 0x38d   : > { %4404 = vmatprep.subr.bf16.mxu0 %v5394_v13 }
 0x390   : > { %4405 = vmatpush1.bf16.msra.mxu0 %v5393_v14  ;;  %v3156_v14 = vld [vmem:[#allocation2 + $0x130] sm:$0xff] }
 0x391   : > { %4406 = vmatprep.subr.bf16.mxu0 %v5418_v17  ;;  %v5326_v19 = vcombine.high %v3144_v12, %v3156_v14 }
 0x394   : > { %4407 = vmatpush1.bf16.msra.mxu0 %v5417_v18 }
 0x395   : > { %4408 = vmatprep.subr.bf16.mxu0 %v5442_v21  ;;  %v3168_v21 = vld [vmem:[#allocation2 + $0x190] sm:$0xff] }
 0x398   : > { %4409 = vmatpush1.bf16.msra.mxu0 %v5441_v22  ;;  %v3180_v22 = vld [vmem:[#allocation2 + $0x1f0] sm:$0xff] }
 0x452   : > { %v5861_v40 = vpop.f32.mrb[26].mxu0 }
 0x453   : > { %v2919_v41 = vadd.f32 %v5861_v40, %v5286_v39  ;;  %v2913_v42 = vpop.f32.mrb[27].mxu0 }
 0x454   : > { %v2914_v43 = vadd.f32 %v5286_v39, %v2913_v42  ;;  %v5347_v39 = vcombine.low %v3167_v33, %v3179_v34  ;;  %v3227_v42 = vld [vmem:[#allocation2 + $0x368] sm:$0xff]  ;;  %v5349_v33 = vcombine.low %v3168_v21, %v3180_v22 }
 0x455   : > { %v2923_v47 = vmax.f32 %v2919_v41, 0.0  ;;  %v3215_v41 = vld [vmem:[#allocation2 + $0x308] sm:$0xff] }
 0x456   : > { %v2922_v46 = vmax.f32 %v2914_v43, 0.0  ;;  %v5396_v44 = vcombine.high %v3215_v41, %v3227_v42 }
 0x458   : > { %5866 = vmatprep.mubr.msk.f32.mxu1 %vm2836_vm4, %v2922_v46  ;;  %v3251_v46 = vld [vmem:[#allocation2 + $0x428] sm:$0xff] }
 0x459   : > { %5867 = vmatmul.mubr.msk.f32.vlgmr.msra.gmra.mrb[26].mxu1 %vm2836_vm4, %v2923_v47  ;;  %v5395_v47 = vcombine.low %v3215_v41, %v3227_v42 }
 0x45a   : > { %5951 = vmatpush3.bf16.msra.mxu1 %v5948_v38  ;;  %v3203_v38 = vld [vmem:[#allocation2 + $0x2a8] sm:$0xff] }
 0x45b   : > { %5953 = vmatprep.subr.bf16.mxu1 %v5952_v48  ;;  %v5372_v40 = vcombine.high %v3191_v37, %v3203_v38  ;;  %v5371_v43 = vcombine.low %v3191_v37, %v3203_v38  ;;  %v3216_v37 = vld [vmem:[#allocation2 + $0x310] sm:$0xff] }
 0x45c   : > { %v3228_v38 = vld [vmem:[#allocation2 + $0x370] sm:$0xff] }
 0x45d   : > { %v5397_v49 = vcombine.low %v3216_v37, %v3228_v38 }
 0x45e   : > { %5955 = vmatpush3.bf16.msra.mxu1 %v5952_v48  ;;  %v5420_v48 = vcombine.high %v3239_v45, %v3251_v46 }
 0x45f   : > { %5957 = vmatprep.subr.bf16.mxu1 %v5956_v51 }
 0x462   : > { %5959 = vmatpush3.bf16.msra.mxu1 %v5956_v51  ;;  %v5419_v51 = vcombine.low %v3239_v45, %v3251_v46  ;;  %v3240_v45 = vld [vmem:[#allocation2 + $0x3d0] sm:$0xff] }
 0x463   : > { %5961 = vmatprep.subr.bf16.mxu1 %v5960_v54  ;;  %v3252_v46 = vld [vmem:[#allocation2 + $0x430] sm:$0xff] }
 0x464   : > { %v5421_v57 = vcombine.low %v3240_v45, %v3252_v46 }
 0x466   : > { %5963 = vmatpush3.bf16.msra.mxu1 %v5960_v54  ;;  %v3286_v54 = vld [vmem:[#allocation2 + $0x540] sm:$0xff] }
 0x467   : > { %4439 = vmatprep.subr.bf16.mxu1 %v5300_v0  ;;  %v5466_v56 = vcombine.high %v3286_v54, %v3298_v55  ;;  %v5465_v59 = vcombine.low %v3286_v54, %v3298_v55  ;;  %v3121_v0 = vld [vmem:[#allocation2 + $0x18] sm:$0xff]  ;;  %v3276_v54 = vld [vmem:[#allocation2 + $0x4f0] sm:$0xff] }
 0x468   : > { %v5303_v4 = vcombine.low %v3121_v0, %v3133_v2  ;;  %v5304_v5 = vcombine.high %v3121_v0, %v3133_v2  ;;  %v3265_v55 = vld [vmem:[#allocation2 + $0x498] sm:$0xff] }
 0x469   : > { %4410 = vmatprep.subr.bf16.mxu0 %v5466_v56  ;;  %v3277_v56 = vld [vmem:[#allocation2 + $0x4f8] sm:$0xff] }
 0x46a   : > { %4411 = vmatpush1.bf16.msra.mxu0 %v5465_v59  ;;  %v3301_v0 = vld [vmem:[#allocation2 + $0x5b8] sm:$0xff]  ;;  %v5447_v2 = vcombine.low %v3265_v55, %v3277_v56 }
 0x52c   : > { %v5868_v24 = vpop.f32.mrb[26].mxu1 }
 0x52d   : > { %v3014_v25 = vadd.f32 %v5868_v24, %v5290_v23  ;;  %v3008_v26 = vpop.f32.mrb[27].mxu1  ;;  %v3181_v24 = vld [vmem:[#allocation2 + $0x1f8] sm:$0xff] }
 0x52e   : > { %v3009_v27 = vadd.f32 %v5290_v23, %v3008_v26  ;;  %v3169_v23 = vld [vmem:[#allocation2 + $0x198] sm:$0xff]  ;;  %v5327_v26 = vcombine.low %v3145_v15, %v3157_v16  ;;  %v3158_v15 = vld [vmem:[#allocation2 + $0x140] sm:$0xff]  ;;  %v3147_v16 = vld [vmem:[#allocation2 + $0xe8] sm:$0xff] }
 0x52f   : > { %v3018_v31 = vmax.f32 %v3014_v25, 0.0  ;;  %v5325_v25 = vcombine.low %v3144_v12, %v3156_v14  ;;  %v5352_v28 = vcombine.high %v3169_v23, %v3181_v24  ;;  %v5351_v34 = vcombine.low %v3169_v23, %v3181_v24  ;;  %v3146_v14 = vld [vmem:[#allocation2 + $0xe0] sm:$0xff] }
 0x530   : > { %v3017_v30 = vmax.f32 %v3009_v27, 0.0  ;;  %v5350_v27 = vcombine.high %v3168_v21, %v3180_v22  ;;  %v5330_v21 = vcombine.high %v3146_v14, %v3158_v15  ;;  %v3170_v23 = vld [vmem:[#allocation2 + $0x1a0] sm:$0xff] }
 0x531   : > { %v3182_v24 = vld [vmem:[#allocation2 + $0x200] sm:$0xff] }
 0x532   : > { %5885 = vmatprep.mubr.msk.f32.mxu1 %vm2743_vm0, %v3017_v30  ;;  %v3204_v30 = vld [vmem:[#allocation2 + $0x2b0] sm:$0xff] }
 0x533   : > { %5886 = vmatmul.mubr.msk.f32.vlgmr.msra.gmra.mrb[28].mxu1 %vm2743_vm0, %v3018_v31  ;;  %v3193_v31 = vld [vmem:[#allocation2 + $0x258] sm:$0xff]  ;;  %v5373_v41 = vcombine.low %v3192_v29, %v3204_v30 }
 0x534   : > { %4440 = vmatpush1.bf16.msra.mxu1 %v5299_v63  ;;  %v3132_v63 = vld [vmem:[#allocation2 + $0x70] sm:$0xff]  ;;  %4471 = vmatprep.mubr.bf16.mxu1 %v6320_v6 }
 0x535   : > { %4441 = vmatprep.subr.bf16.mxu1 %v5324_v32  ;;  %v5302_v1 = vcombine.high %v3120_v62, %v3132_v63  ;;  %v5301_v3 = vcombine.low %v3120_v62, %v3132_v63  ;;  %v3205_v32 = vld [vmem:[#allocation2 + $0x2b8] sm:$0xff]  ;;  %v3300_v62 = vld [vmem:[#allocation2 + $0x5b0] sm:$0xff] }
 0x536   : > { %v5375_v42 = vcombine.low %v3193_v31, %v3205_v32  ;;  %v3289_v63 = vld [vmem:[#allocation2 + $0x558] sm:$0xff] }
 0x537   : > { %4482 = vmatprep.subr.bf16.mxu0 %v5302_v1 }
 0x538   : > { %4442 = vmatpush1.bf16.msra.mxu1 %v5323_v35  ;;  %v5374_v35 = vcombine.high %v3192_v29, %v3204_v30  ;;  %v5354_v29 = vcombine.high %v3170_v23, %v3182_v24 }
 0x539   : > { %4443 = vmatprep.subr.bf16.mxu1 %v5348_v36  ;;  %v5376_v36 = vcombine.high %v3193_v31, %v3205_v32  ;;  %v3194_v31 = vld [vmem:[#allocation2 + $0x260] sm:$0xff] }
 0x53a   : > { %v3206_v32 = vld [vmem:[#allocation2 + $0x2c0] sm:$0xff] }
 0x53c   : > { %4444 = vmatpush1.bf16.msra.mxu1 %v5347_v39  ;;  %v3217_v39 = vld [vmem:[#allocation2 + $0x318] sm:$0xff] }
 0x53d   : > { %4445 = vmatprep.subr.bf16.mxu1 %v5372_v40  ;;  %v3229_v40 = vld [vmem:[#allocation2 + $0x378] sm:$0xff] }
 0x53e   : > { %v5399_v50 = vcombine.low %v3217_v39, %v3229_v40 }
 0x540   : > { %4446 = vmatpush1.bf16.msra.mxu1 %v5371_v43  ;;  %v5398_v43 = vcombine.high %v3216_v37, %v3228_v38  ;;  %v5378_v37 = vcombine.high %v3194_v31, %v3206_v32 }
 0x541   : > { %4447 = vmatprep.subr.bf16.mxu1 %v5396_v44  ;;  %v5400_v44 = vcombine.high %v3217_v39, %v3229_v40  ;;  %v3218_v39 = vld [vmem:[#allocation2 + $0x320] sm:$0xff] }
 0x542   : > { %v3230_v40 = vld [vmem:[#allocation2 + $0x380] sm:$0xff] }
 0x544   : > { %4448 = vmatpush1.bf16.msra.mxu1 %v5395_v47  ;;  %v3241_v47 = vld [vmem:[#allocation2 + $0x3d8] sm:$0xff] }
 0x545   : > { %4449 = vmatprep.subr.bf16.mxu1 %v5420_v48  ;;  %v3253_v48 = vld [vmem:[#allocation2 + $0x438] sm:$0xff] }
 0x546   : > { %v5423_v58 = vcombine.low %v3241_v47, %v3253_v48 }
 0x548   : > { %4450 = vmatpush1.bf16.msra.mxu1 %v5419_v51  ;;  %v5422_v51 = vcombine.high %v3240_v45, %v3252_v46  ;;  %v5402_v45 = vcombine.high %v3218_v39, %v3230_v40 }
 0x549   : > { %4451 = vmatprep.subr.bf16.mxu1 %v5444_v52  ;;  %v5424_v52 = vcombine.high %v3241_v47, %v3253_v48  ;;  %v3242_v47 = vld [vmem:[#allocation2 + $0x3e0] sm:$0xff] }
 0x54a   : > { %v3254_v48 = vld [vmem:[#allocation2 + $0x440] sm:$0xff] }
 0x54c   : > { %4452 = vmatpush1.bf16.msra.mxu1 %v5443_v53  ;;  %v3264_v53 = vld [vmem:[#allocation2 + $0x490] sm:$0xff] }
 0x54d   : > { %4453 = vmatprep.subr.bf16.mxu1 %v5468_v61  ;;  %v5446_v59 = vcombine.high %v3264_v53, %v3276_v54  ;;  %v3288_v61 = vld [vmem:[#allocation2 + $0x550] sm:$0xff]  ;;  %v5445_v1 = vcombine.low %v3264_v53, %v3276_v54  ;;  %v5426_v53 = vcombine.high %v3242_v47, %v3254_v48 }
 0x550   : > { %4454 = vmatpush1.bf16.msra.mxu1 %v5467_v60  ;;  %v5448_v60 = vcombine.high %v3265_v55, %v3277_v56  ;;  %v3266_v55 = vld [vmem:[#allocation2 + $0x4a0] sm:$0xff] }
 0x551   : > { %4525 = vmatprep.subr.bf16.mxu1 %v5304_v5  ;;  %v3122_v5 = vld [vmem:[#allocation2 + $0x20] sm:$0xff] }
 0x552   : > { %v3278_v56 = vld [vmem:[#allocation2 + $0x500] sm:$0xff] }
 0x606   : > { %v5887_v8 = vpop.f32.mrb[28].mxu1 }
 0x607   : > { %v3112_v9 = vadd.f32 %v5887_v8, %v5294_v7  ;;  %v3106_v10 = vpop.f32.mrb[29].mxu1  ;;  %v3123_v8 = vld [vmem:[#allocation2 + $0x28] sm:$0xff] }
 0x608   : > { %v3107_v11 = vadd.f32 %v5294_v7, %v3106_v10  ;;  %v3134_v7 = vld [vmem:[#allocation2 + $0x80] sm:$0xff]  ;;  %v5469_v10 = vcombine.low %v3288_v61, %v3300_v62 }
 0x609   : > { %v3116_v13 = vmax.f32 %v3112_v9, 0.0  ;;  %v3135_v9 = vld [vmem:[#allocation2 + $0x88] sm:$0xff]  ;;  %v5306_v12 = vcombine.high %v3122_v5, %v3134_v7 }
 0x60a   : > { %v3115_v17 = vmax.f32 %v3107_v11, 0.0  ;;  %v5471_v11 = vcombine.low %v3289_v63, %v3301_v0 }
 0x60c   : > { %v7233_v18 = vpack.c.bf16 %v3116_v13, %v3115_v17  ;;  %v5308_v13 = vcombine.high %v3123_v8, %v3135_v9  ;;  %v3159_v17 = vld [vmem:[#allocation2 + $0x148] sm:$0xff] }
 0x60d   : > { %v5332_v22 = vcombine.high %v3147_v16, %v3159_v17 }
 0x60e   : > { %4429 = vmatmul.mubr.bf16.vlgmr.msra.gmra.mrb[28].mxu0 %v7233_v18  ;;  %4472 = vmatmul.mubr.bf16.vlgmr.msra.gmra.mrb[32].mxu1 %v7233_v18 }
 0x60f   : > { %4483 = vmatpush1.bf16.msra.mxu0 %v5301_v3  ;;  %4526 = vmatpush1.bf16.msra.mxu1 %v5303_v4  ;;  %v5470_v3 = vcombine.high %v3288_v61, %v3300_v62  ;;  %v5472_v4 = vcombine.high %v3289_v63, %v3301_v0  ;;  %v5450_v61 = vcombine.high %v3266_v55, %v3278_v56  ;;  %v3290_v63 = vld [vmem:[#allocation2 + $0x560] sm:$0xff] }
 0x610   : > { %4484 = vmatprep.subr.bf16.mxu0 %v5326_v19  ;;  %4527 = vmatprep.subr.bf16.mxu1 %v5328_v20  ;;  %v5305_v19 = vcombine.low %v3122_v5, %v3134_v7  ;;  %v5307_v20 = vcombine.low %v3123_v8, %v3135_v9  ;;  %v3302_v0 = vld [vmem:[#allocation2 + $0x5c0] sm:$0xff]  ;;  %v3124_v8 = vld [vmem:[#allocation2 + $0x30] sm:$0xff] }
 0x611   : > { %4514 = vmatprep.mubr.bf16.mxu0 %v6320_v6  ;;  %4557 = vmatprep.mubr.bf16.mxu1 %v6320_v6  ;;  %v5474_v5 = vcombine.high %v3290_v63, %v3302_v0  ;;  %v3136_v9 = vld [vmem:[#allocation2 + $0x90] sm:$0xff] }
 0x613   : > { %4485 = vmatpush1.bf16.msra.mxu0 %v5325_v25  ;;  %4528 = vmatpush1.bf16.msra.mxu1 %v5327_v26  ;;  %v3171_v25 = vld [vmem:[#allocation2 + $0x1a8] sm:$0xff] }
 0x614   : > { %4486 = vmatprep.subr.bf16.mxu0 %v5350_v27  ;;  %4529 = vmatprep.subr.bf16.mxu1 %v5352_v28  ;;  %v3183_v26 = vld [vmem:[#allocation2 + $0x208] sm:$0xff]  ;;  %v5329_v27 = vcombine.low %v3146_v14, %v3158_v15  ;;  %v5331_v28 = vcombine.low %v3147_v16, %v3159_v17  ;;  %v5310_v14 = vcombine.high %v3124_v8, %v3136_v9  ;;  %v3148_v16 = vld [vmem:[#allocation2 + $0xf0] sm:$0xff] }
 0x615   : > { %v5356_v30 = vcombine.high %v3171_v25, %v3183_v26  ;;  %v3160_v17 = vld [vmem:[#allocation2 + $0x150] sm:$0xff] }
 0x617   : > { %4487 = vmatpush1.bf16.msra.mxu0 %v5349_v33  ;;  %4530 = vmatpush1.bf16.msra.mxu1 %v5351_v34  ;;  %v3195_v33 = vld [vmem:[#allocation2 + $0x268] sm:$0xff] }
 0x618   : > { %4488 = vmatprep.subr.bf16.mxu0 %v5374_v35  ;;  %4531 = vmatprep.subr.bf16.mxu1 %v5376_v36  ;;  %v3207_v34 = vld [vmem:[#allocation2 + $0x2c8] sm:$0xff]  ;;  %v5353_v35 = vcombine.low %v3170_v23, %v3182_v24  ;;  %v5355_v36 = vcombine.low %v3171_v25, %v3183_v26  ;;  %v5334_v23 = vcombine.high %v3148_v16, %v3160_v17  ;;  %v3172_v25 = vld [vmem:[#allocation2 + $0x1b0] sm:$0xff] }
 0x619   : > { %v5380_v38 = vcombine.high %v3195_v33, %v3207_v34  ;;  %v3184_v26 = vld [vmem:[#allocation2 + $0x210] sm:$0xff] }
 0x61b   : > { %4489 = vmatpush1.bf16.msra.mxu0 %v5373_v41  ;;  %4532 = vmatpush1.bf16.msra.mxu1 %v5375_v42  ;;  %v3219_v41 = vld [vmem:[#allocation2 + $0x328] sm:$0xff] }
 0x61c   : > { %4490 = vmatprep.subr.bf16.mxu0 %v5398_v43  ;;  %4533 = vmatprep.subr.bf16.mxu1 %v5400_v44  ;;  %v3231_v42 = vld [vmem:[#allocation2 + $0x388] sm:$0xff]  ;;  %v5377_v43 = vcombine.low %v3194_v31, %v3206_v32  ;;  %v5379_v44 = vcombine.low %v3195_v33, %v3207_v34  ;;  %v5358_v31 = vcombine.high %v3172_v25, %v3184_v26  ;;  %v3196_v33 = vld [vmem:[#allocation2 + $0x270] sm:$0xff] }
 0x61d   : > { %v5404_v46 = vcombine.high %v3219_v41, %v3231_v42  ;;  %v3208_v34 = vld [vmem:[#allocation2 + $0x2d0] sm:$0xff] }
 0x61f   : > { %4491 = vmatpush1.bf16.msra.mxu0 %v5397_v49  ;;  %4534 = vmatpush1.bf16.msra.mxu1 %v5399_v50  ;;  %v3243_v49 = vld [vmem:[#allocation2 + $0x3e8] sm:$0xff] }
 0x620   : > { %4492 = vmatprep.subr.bf16.mxu0 %v5422_v51  ;;  %4535 = vmatprep.subr.bf16.mxu1 %v5424_v52  ;;  %v3255_v50 = vld [vmem:[#allocation2 + $0x448] sm:$0xff]  ;;  %v5401_v51 = vcombine.low %v3218_v39, %v3230_v40  ;;  %v5403_v52 = vcombine.low %v3219_v41, %v3231_v42  ;;  %v5382_v39 = vcombine.high %v3196_v33, %v3208_v34  ;;  %v3220_v41 = vld [vmem:[#allocation2 + $0x330] sm:$0xff] }
 0x621   : > { %v5428_v54 = vcombine.high %v3243_v49, %v3255_v50  ;;  %v3232_v42 = vld [vmem:[#allocation2 + $0x390] sm:$0xff] }
 0x623   : > { %4493 = vmatpush1.bf16.msra.mxu0 %v5421_v57  ;;  %4536 = vmatpush1.bf16.msra.mxu1 %v5423_v58  ;;  %v3267_v57 = vld [vmem:[#allocation2 + $0x4a8] sm:$0xff] }
 0x624   : > { %4494 = vmatprep.subr.bf16.mxu0 %v5446_v59  ;;  %4537 = vmatprep.subr.bf16.mxu1 %v5448_v60  ;;  %v3279_v58 = vld [vmem:[#allocation2 + $0x508] sm:$0xff]  ;;  %v5425_v59 = vcombine.low %v3242_v47, %v3254_v48  ;;  %v5427_v60 = vcombine.low %v3243_v49, %v3255_v50  ;;  %v5406_v47 = vcombine.high %v3220_v41, %v3232_v42  ;;  %v3244_v49 = vld [vmem:[#allocation2 + $0x3f0] sm:$0xff] }
 0x625   : > { %v5452_v62 = vcombine.high %v3267_v57, %v3279_v58  ;;  %v3256_v50 = vld [vmem:[#allocation2 + $0x450] sm:$0xff] }
 0x627   : > { %4495 = vmatpush1.bf16.msra.mxu0 %v5445_v1  ;;  %4538 = vmatpush1.bf16.msra.mxu1 %v5447_v2  ;;  %v3291_v1 = vld [vmem:[#allocation2 + $0x568] sm:$0xff] }
 0x628   : > { %4496 = vmatprep.subr.bf16.mxu0 %v5470_v3  ;;  %4539 = vmatprep.subr.bf16.mxu1 %v5472_v4  ;;  %v3303_v2 = vld [vmem:[#allocation2 + $0x5c8] sm:$0xff]  ;;  %v5449_v3 = vcombine.low %v3266_v55, %v3278_v56  ;;  %v5451_v4 = vcombine.low %v3267_v57, %v3279_v58  ;;  %v5430_v55 = vcombine.high %v3244_v49, %v3256_v50  ;;  %v3268_v57 = vld [vmem:[#allocation2 + $0x4b0] sm:$0xff] }
 0x629   : > { %v5476_v7 = vcombine.high %v3291_v1, %v3303_v2  ;;  %v3280_v58 = vld [vmem:[#allocation2 + $0x510] sm:$0xff] }
 0x62b   : > { %4497 = vmatpush1.bf16.msra.mxu0 %v5469_v10  ;;  %4540 = vmatpush1.bf16.msra.mxu1 %v5471_v11  ;;  %v3125_v10 = vld [vmem:[#allocation2 + $0x38] sm:$0xff] }
 0x62c   : > { %4568 = vmatprep.subr.bf16.mxu0 %v5306_v12  ;;  %4611 = vmatprep.subr.bf16.mxu1 %v5308_v13  ;;  %v3137_v11 = vld [vmem:[#allocation2 + $0x98] sm:$0xff]  ;;  %v5473_v12 = vcombine.low %v3290_v63, %v3302_v0  ;;  %v5475_v13 = vcombine.low %v3291_v1, %v3303_v2  ;;  %v5454_v63 = vcombine.high %v3268_v57, %v3280_v58  ;;  %v3292_v1 = vld [vmem:[#allocation2 + $0x570] sm:$0xff] }
 0x62d   : > { %v5312_v15 = vcombine.high %v3125_v10, %v3137_v11  ;;  %v3304_v2 = vld [vmem:[#allocation2 + $0x5d0] sm:$0xff] }
 0x62e   : > { %4515 = vmatmul.mubr.bf16.vlgmr.msra.gmra.mrb[32].mxu0 %v7233_v18  ;;  %4558 = vmatmul.mubr.bf16.vlgmr.msra.gmra.mrb[36].mxu1 %v7233_v18 }
 0x62f   : > { %4569 = vmatpush1.bf16.msra.mxu0 %v5305_v19  ;;  %4612 = vmatpush1.bf16.msra.mxu1 %v5307_v20  ;;  %v3149_v19 = vld [vmem:[#allocation2 + $0xf8] sm:$0xff] }
 0x630   : > { %4570 = vmatprep.subr.bf16.mxu0 %v5330_v21  ;;  %4613 = vmatprep.subr.bf16.mxu1 %v5332_v22  ;;  %v3161_v20 = vld [vmem:[#allocation2 + $0x158] sm:$0xff]  ;;  %v5309_v21 = vcombine.low %v3124_v8, %v3136_v9  ;;  %v5311_v22 = vcombine.low %v3125_v10, %v3137_v11  ;;  %v5478_v8 = vcombine.high %v3292_v1, %v3304_v2  ;;  %v3126_v10 = vld [vmem:[#allocation2 + $0x40] sm:$0xff] }
 0x631   : > { %4600 = vmatprep.mubr.bf16.mxu0 %v6320_v6  ;;  %4643 = vmatprep.mubr.bf16.mxu1 %v6320_v6  ;;  %v5336_v24 = vcombine.high %v3149_v19, %v3161_v20  ;;  %v3138_v11 = vld [vmem:[#allocation2 + $0xa0] sm:$0xff] }
 0x633   : > { %4571 = vmatpush1.bf16.msra.mxu0 %v5329_v27  ;;  %4614 = vmatpush1.bf16.msra.mxu1 %v5331_v28  ;;  %v3173_v27 = vld [vmem:[#allocation2 + $0x1b8] sm:$0xff] }
 0x634   : > { %4572 = vmatprep.subr.bf16.mxu0 %v5354_v29  ;;  %4615 = vmatprep.subr.bf16.mxu1 %v5356_v30  ;;  %v3185_v28 = vld [vmem:[#allocation2 + $0x218] sm:$0xff]  ;;  %v5333_v29 = vcombine.low %v3148_v16, %v3160_v17  ;;  %v5335_v30 = vcombine.low %v3149_v19, %v3161_v20  ;;  %v5314_v16 = vcombine.high %v3126_v10, %v3138_v11  ;;  %v3150_v19 = vld [vmem:[#allocation2 + $0x100] sm:$0xff] }
 0x635   : > { %v5360_v32 = vcombine.high %v3173_v27, %v3185_v28  ;;  %v3162_v20 = vld [vmem:[#allocation2 + $0x160] sm:$0xff] }
 0x637   : > { %4573 = vmatpush1.bf16.msra.mxu0 %v5353_v35  ;;  %4616 = vmatpush1.bf16.msra.mxu1 %v5355_v36  ;;  %v3197_v35 = vld [vmem:[#allocation2 + $0x278] sm:$0xff] }
 0x638   : > { %4574 = vmatprep.subr.bf16.mxu0 %v5378_v37  ;;  %4617 = vmatprep.subr.bf16.mxu1 %v5380_v38  ;;  %v3209_v36 = vld [vmem:[#allocation2 + $0x2d8] sm:$0xff]  ;;  %v5357_v37 = vcombine.low %v3172_v25, %v3184_v26  ;;  %v5359_v38 = vcombine.low %v3173_v27, %v3185_v28  ;;  %v5338_v25 = vcombine.high %v3150_v19, %v3162_v20  ;;  %v3174_v27 = vld [vmem:[#allocation2 + $0x1c0] sm:$0xff] }
 0x639   : > { %v5384_v40 = vcombine.high %v3197_v35, %v3209_v36  ;;  %v3186_v28 = vld [vmem:[#allocation2 + $0x220] sm:$0xff] }
 0x63b   : > { %4575 = vmatpush1.bf16.msra.mxu0 %v5377_v43  ;;  %4618 = vmatpush1.bf16.msra.mxu1 %v5379_v44  ;;  %v3221_v43 = vld [vmem:[#allocation2 + $0x338] sm:$0xff] }
 0x63c   : > { %4576 = vmatprep.subr.bf16.mxu0 %v5402_v45  ;;  %4619 = vmatprep.subr.bf16.mxu1 %v5404_v46  ;;  %v3233_v44 = vld [vmem:[#allocation2 + $0x398] sm:$0xff]  ;;  %v5381_v45 = vcombine.low %v3196_v33, %v3208_v34  ;;  %v5383_v46 = vcombine.low %v3197_v35, %v3209_v36  ;;  %v5362_v33 = vcombine.high %v3174_v27, %v3186_v28  ;;  %v3198_v35 = vld [vmem:[#allocation2 + $0x280] sm:$0xff] }
 0x63d   : > { %v5408_v48 = vcombine.high %v3221_v43, %v3233_v44  ;;  %v3210_v36 = vld [vmem:[#allocation2 + $0x2e0] sm:$0xff] }
 0x63f   : > { %4577 = vmatpush1.bf16.msra.mxu0 %v5401_v51  ;;  %4620 = vmatpush1.bf16.msra.mxu1 %v5403_v52  ;;  %v3245_v51 = vld [vmem:[#allocation2 + $0x3f8] sm:$0xff] }
 0x640   : > { %4578 = vmatprep.subr.bf16.mxu0 %v5426_v53  ;;  %4621 = vmatprep.subr.bf16.mxu1 %v5428_v54  ;;  %v3257_v52 = vld [vmem:[#allocation2 + $0x458] sm:$0xff]  ;;  %v5405_v53 = vcombine.low %v3220_v41, %v3232_v42  ;;  %v5407_v54 = vcombine.low %v3221_v43, %v3233_v44  ;;  %v5386_v41 = vcombine.high %v3198_v35, %v3210_v36  ;;  %v3222_v43 = vld [vmem:[#allocation2 + $0x340] sm:$0xff] }
 0x641   : > { %v5432_v56 = vcombine.high %v3245_v51, %v3257_v52  ;;  %v3234_v44 = vld [vmem:[#allocation2 + $0x3a0] sm:$0xff] }
 0x643   : > { %4579 = vmatpush1.bf16.msra.mxu0 %v5425_v59  ;;  %4622 = vmatpush1.bf16.msra.mxu1 %v5427_v60  ;;  %v3269_v59 = vld [vmem:[#allocation2 + $0x4b8] sm:$0xff] }
 0x644   : > { %4580 = vmatprep.subr.bf16.mxu0 %v5450_v61  ;;  %4623 = vmatprep.subr.bf16.mxu1 %v5452_v62  ;;  %v3281_v60 = vld [vmem:[#allocation2 + $0x518] sm:$0xff]  ;;  %v5429_v61 = vcombine.low %v3244_v49, %v3256_v50  ;;  %v5431_v62 = vcombine.low %v3245_v51, %v3257_v52  ;;  %v5410_v49 = vcombine.high %v3222_v43, %v3234_v44  ;;  %v3246_v51 = vld [vmem:[#allocation2 + $0x400] sm:$0xff] }
 0x645   : > { %v5456_v0 = vcombine.high %v3269_v59, %v3281_v60  ;;  %v3258_v52 = vld [vmem:[#allocation2 + $0x460] sm:$0xff] }
 0x647   : > { %4581 = vmatpush1.bf16.msra.mxu0 %v5449_v3  ;;  %4624 = vmatpush1.bf16.msra.mxu1 %v5451_v4  ;;  %v3293_v3 = vld [vmem:[#allocation2 + $0x578] sm:$0xff] }
 0x648   : > { %4582 = vmatprep.subr.bf16.mxu0 %v5474_v5  ;;  %4625 = vmatprep.subr.bf16.mxu1 %v5476_v7  ;;  %v3305_v4 = vld [vmem:[#allocation2 + $0x5d8] sm:$0xff]  ;;  %v5453_v5 = vcombine.low %v3268_v57, %v3280_v58  ;;  %v5455_v7 = vcombine.low %v3269_v59, %v3281_v60  ;;  %v5434_v57 = vcombine.high %v3246_v51, %v3258_v52  ;;  %v3270_v59 = vld [vmem:[#allocation2 + $0x4c0] sm:$0xff] }
 0x649   : > { %v5480_v9 = vcombine.high %v3293_v3, %v3305_v4  ;;  %v3282_v60 = vld [vmem:[#allocation2 + $0x520] sm:$0xff] }
 0x64b   : > { %4583 = vmatpush1.bf16.msra.mxu0 %v5473_v12  ;;  %4626 = vmatpush1.bf16.msra.mxu1 %v5475_v13  ;;  %v3127_v12 = vld [vmem:[#allocation2 + $0x48] sm:$0xff] }
 0x64c   : > { %4654 = vmatprep.subr.bf16.mxu0 %v5310_v14  ;;  %4697 = vmatprep.subr.bf16.mxu1 %v5312_v15  ;;  %v3139_v13 = vld [vmem:[#allocation2 + $0xa8] sm:$0xff]  ;;  %v5477_v14 = vcombine.low %v3292_v1, %v3304_v2  ;;  %v5479_v15 = vcombine.low %v3293_v3, %v3305_v4  ;;  %v5458_v1 = vcombine.high %v3270_v59, %v3282_v60  ;;  %v3294_v3 = vld [vmem:[#allocation2 + $0x580] sm:$0xff] }
 0x64d   : > { %v5316_v17 = vcombine.high %v3127_v12, %v3139_v13  ;;  %v3306_v4 = vld [vmem:[#allocation2 + $0x5e0] sm:$0xff] }
 0x64e   : > { %4601 = vmatmul.mubr.bf16.vlgmr.msra.gmra.mrb[36].mxu0 %v7233_v18  ;;  %4644 = vmatmul.mubr.bf16.vlgmr.msra.gmra.mrb[40].mxu1 %v7233_v18 }
 0x64f   : > { %4655 = vmatpush1.bf16.msra.mxu0 %v5309_v21  ;;  %4698 = vmatpush1.bf16.msra.mxu1 %v5311_v22  ;;  %v3151_v21 = vld [vmem:[#allocation2 + $0x108] sm:$0xff] }
 0x650   : > { %4656 = vmatprep.subr.bf16.mxu0 %v5334_v23  ;;  %4699 = vmatprep.subr.bf16.mxu1 %v5336_v24  ;;  %v3163_v22 = vld [vmem:[#allocation2 + $0x168] sm:$0xff]  ;;  %v5313_v23 = vcombine.low %v3126_v10, %v3138_v11  ;;  %v5315_v24 = vcombine.low %v3127_v12, %v3139_v13  ;;  %v5482_v10 = vcombine.high %v3294_v3, %v3306_v4  ;;  %v3128_v12 = vld [vmem:[#allocation2 + $0x50] sm:$0xff] }
 0x651   : > { %4686 = vmatprep.mubr.bf16.mxu0 %v6320_v6  ;;  %4729 = vmatprep.mubr.bf16.mxu1 %v6320_v6  ;;  %v5340_v26 = vcombine.high %v3151_v21, %v3163_v22  ;;  %v3140_v13 = vld [vmem:[#allocation2 + $0xb0] sm:$0xff] }
 0x653   : > { %4657 = vmatpush1.bf16.msra.mxu0 %v5333_v29  ;;  %4700 = vmatpush1.bf16.msra.mxu1 %v5335_v30  ;;  %v3175_v29 = vld [vmem:[#allocation2 + $0x1c8] sm:$0xff] }
 0x654   : > { %4658 = vmatprep.subr.bf16.mxu0 %v5358_v31  ;;  %4701 = vmatprep.subr.bf16.mxu1 %v5360_v32  ;;  %v3187_v30 = vld [vmem:[#allocation2 + $0x228] sm:$0xff]  ;;  %v5337_v31 = vcombine.low %v3150_v19, %v3162_v20  ;;  %v5339_v32 = vcombine.low %v3151_v21, %v3163_v22  ;;  %v5318_v19 = vcombine.high %v3128_v12, %v3140_v13  ;;  %v3152_v21 = vld [vmem:[#allocation2 + $0x110] sm:$0xff] }
 0x655   : > { %v5364_v34 = vcombine.high %v3175_v29, %v3187_v30  ;;  %v3164_v22 = vld [vmem:[#allocation2 + $0x170] sm:$0xff] }
 0x657   : > { %4659 = vmatpush1.bf16.msra.mxu0 %v5357_v37  ;;  %4702 = vmatpush1.bf16.msra.mxu1 %v5359_v38  ;;  %v3199_v37 = vld [vmem:[#allocation2 + $0x288] sm:$0xff] }
 0x658   : > { %4660 = vmatprep.subr.bf16.mxu0 %v5382_v39  ;;  %4703 = vmatprep.subr.bf16.mxu1 %v5384_v40  ;;  %v3211_v38 = vld [vmem:[#allocation2 + $0x2e8] sm:$0xff]  ;;  %v5361_v39 = vcombine.low %v3174_v27, %v3186_v28  ;;  %v5363_v40 = vcombine.low %v3175_v29, %v3187_v30  ;;  %v5342_v27 = vcombine.high %v3152_v21, %v3164_v22  ;;  %v3176_v29 = vld [vmem:[#allocation2 + $0x1d0] sm:$0xff] }
 0x659   : > { %v5388_v42 = vcombine.high %v3199_v37, %v3211_v38  ;;  %v3188_v30 = vld [vmem:[#allocation2 + $0x230] sm:$0xff] }
 0x65b   : > { %4661 = vmatpush1.bf16.msra.mxu0 %v5381_v45  ;;  %4704 = vmatpush1.bf16.msra.mxu1 %v5383_v46  ;;  %v3223_v45 = vld [vmem:[#allocation2 + $0x348] sm:$0xff] }
 0x65c   : > { %4662 = vmatprep.subr.bf16.mxu0 %v5406_v47  ;;  %4705 = vmatprep.subr.bf16.mxu1 %v5408_v48  ;;  %v3235_v46 = vld [vmem:[#allocation2 + $0x3a8] sm:$0xff]  ;;  %v5385_v47 = vcombine.low %v3198_v35, %v3210_v36  ;;  %v5387_v48 = vcombine.low %v3199_v37, %v3211_v38  ;;  %v5366_v35 = vcombine.high %v3176_v29, %v3188_v30  ;;  %v3200_v37 = vld [vmem:[#allocation2 + $0x290] sm:$0xff] }
 0x65d   : > { %v5412_v50 = vcombine.high %v3223_v45, %v3235_v46  ;;  %v3212_v38 = vld [vmem:[#allocation2 + $0x2f0] sm:$0xff] }
 0x65f   : > { %4663 = vmatpush1.bf16.msra.mxu0 %v5405_v53  ;;  %4706 = vmatpush1.bf16.msra.mxu1 %v5407_v54  ;;  %v3247_v53 = vld [vmem:[#allocation2 + $0x408] sm:$0xff] }
 0x660   : > { %4664 = vmatprep.subr.bf16.mxu0 %v5430_v55  ;;  %4707 = vmatprep.subr.bf16.mxu1 %v5432_v56  ;;  %v3259_v54 = vld [vmem:[#allocation2 + $0x468] sm:$0xff]  ;;  %v5409_v55 = vcombine.low %v3222_v43, %v3234_v44  ;;  %v5411_v56 = vcombine.low %v3223_v45, %v3235_v46  ;;  %v5390_v43 = vcombine.high %v3200_v37, %v3212_v38  ;;  %v3224_v45 = vld [vmem:[#allocation2 + $0x350] sm:$0xff] }
 0x661   : > { %v5436_v58 = vcombine.high %v3247_v53, %v3259_v54  ;;  %v3236_v46 = vld [vmem:[#allocation2 + $0x3b0] sm:$0xff] }
 0x663   : > { %4665 = vmatpush1.bf16.msra.mxu0 %v5429_v61  ;;  %4708 = vmatpush1.bf16.msra.mxu1 %v5431_v62  ;;  %v3271_v61 = vld [vmem:[#allocation2 + $0x4c8] sm:$0xff] }
 0x664   : > { %4666 = vmatprep.subr.bf16.mxu0 %v5454_v63  ;;  %4709 = vmatprep.subr.bf16.mxu1 %v5456_v0  ;;  %v3283_v62 = vld [vmem:[#allocation2 + $0x528] sm:$0xff]  ;;  %v5433_v63 = vcombine.low %v3246_v51, %v3258_v52  ;;  %v5435_v0 = vcombine.low %v3247_v53, %v3259_v54  ;;  %v5414_v51 = vcombine.high %v3224_v45, %v3236_v46  ;;  %v3248_v52 = vld [vmem:[#allocation2 + $0x410] sm:$0xff]  ;;  %v3249_v54 = vld [vmem:[#allocation2 + $0x418] sm:$0xff] }
 0x665   : > { %v5460_v2 = vcombine.high %v3271_v61, %v3283_v62  ;;  %v3260_v53 = vld [vmem:[#allocation2 + $0x470] sm:$0xff] }
 0x667   : > { %4667 = vmatpush1.bf16.msra.mxu0 %v5453_v5  ;;  %4710 = vmatpush1.bf16.msra.mxu1 %v5455_v7  ;;  %v3295_v5 = vld [vmem:[#allocation2 + $0x588] sm:$0xff] }
 0x668   : > { %4668 = vmatprep.subr.bf16.mxu0 %v5478_v8  ;;  %4711 = vmatprep.subr.bf16.mxu1 %v5480_v9  ;;  %v3307_v7 = vld [vmem:[#allocation2 + $0x5e8] sm:$0xff]  ;;  %v5457_v8 = vcombine.low %v3270_v59, %v3282_v60  ;;  %v5459_v9 = vcombine.low %v3271_v61, %v3283_v62  ;;  %v3272_v60 = vld [vmem:[#allocation2 + $0x4d0] sm:$0xff]  ;;  %v3273_v62 = vld [vmem:[#allocation2 + $0x4d8] sm:$0xff] }
 0x669   : > { %v5484_v11 = vcombine.high %v3295_v5, %v3307_v7  ;;  %v3284_v61 = vld [vmem:[#allocation2 + $0x530] sm:$0xff] }
 0x66b   : > { %4669 = vmatpush1.bf16.msra.mxu0 %v5477_v14  ;;  %4712 = vmatpush1.bf16.msra.mxu1 %v5479_v15  ;;  %v3129_v14 = vld [vmem:[#allocation2 + $0x58] sm:$0xff] }
 0x66c   : > { %4740 = vmatprep.subr.bf16.mxu0 %v5314_v16  ;;  %4783 = vmatprep.subr.bf16.mxu1 %v5316_v17  ;;  %v3141_v15 = vld [vmem:[#allocation2 + $0xb8] sm:$0xff]  ;;  %v5481_v16 = vcombine.low %v3294_v3, %v3306_v4  ;;  %v5483_v17 = vcombine.low %v3295_v5, %v3307_v7  ;;  %v3296_v4 = vld [vmem:[#allocation2 + $0x590] sm:$0xff] }
 0x66d   : > { %v5320_v20 = vcombine.high %v3129_v14, %v3141_v15  ;;  %v3308_v5 = vld [vmem:[#allocation2 + $0x5f0] sm:$0xff]  ;;  %v3297_v7 = vld [vmem:[#allocation2 + $0x598] sm:$0xff] }
 0x66e   : > { %4687 = vmatmul.mubr.bf16.vlgmr.msra.gmra.mrb[40].mxu0 %v7233_v18  ;;  %4730 = vmatmul.mubr.bf16.vlgmr.msra.gmra.mrb[44].mxu1 %v7233_v18 }
 0x66f   : > { %4741 = vmatpush1.bf16.msra.mxu0 %v5313_v23  ;;  %4784 = vmatpush1.bf16.msra.mxu1 %v5315_v24  ;;  %v3153_v23 = vld [vmem:[#allocation2 + $0x118] sm:$0xff] }
 0x670   : > { %4742 = vmatprep.subr.bf16.mxu0 %v5338_v25  ;;  %4785 = vmatprep.subr.bf16.mxu1 %v5340_v26  ;;  %v3165_v24 = vld [vmem:[#allocation2 + $0x178] sm:$0xff]  ;;  %v5317_v25 = vcombine.low %v3128_v12, %v3140_v13  ;;  %v5319_v26 = vcombine.low %v3129_v14, %v3141_v15  ;;  %v5485_v13 = vcombine.low %v3296_v4, %v3308_v5  ;;  %v3316_v15 = vlaneseq }
 0x671   : > { %4772 = vmatprep.mubr.bf16.mxu0 %v6320_v6  ;;  %4815 = vmatprep.mubr.bf16.mxu1 %v6320_v6  ;;  %v5344_v28 = vcombine.high %v3153_v23, %v3165_v24 }
 0x673   : > { %4743 = vmatpush1.bf16.msra.mxu0 %v5337_v31  ;;  %4786 = vmatpush1.bf16.msra.mxu1 %v5339_v32  ;;  %v3177_v31 = vld [vmem:[#allocation2 + $0x1d8] sm:$0xff] }
 0x674   : > { %4744 = vmatprep.subr.bf16.mxu0 %v5362_v33  ;;  %4787 = vmatprep.subr.bf16.mxu1 %v5364_v34  ;;  %v3189_v32 = vld [vmem:[#allocation2 + $0x238] sm:$0xff]  ;;  %v5341_v33 = vcombine.low %v3152_v21, %v3164_v22  ;;  %v5343_v34 = vcombine.low %v3153_v23, %v3165_v24 }
 0x675   : > { %v5368_v36 = vcombine.high %v3177_v31, %v3189_v32 }
 0x677   : > { %4745 = vmatpush1.bf16.msra.mxu0 %v5361_v39  ;;  %4788 = vmatpush1.bf16.msra.mxu1 %v5363_v40  ;;  %v3201_v39 = vld [vmem:[#allocation2 + $0x298] sm:$0xff] }
 0x678   : > { %4746 = vmatprep.subr.bf16.mxu0 %v5386_v41  ;;  %4789 = vmatprep.subr.bf16.mxu1 %v5388_v42  ;;  %v3213_v40 = vld [vmem:[#allocation2 + $0x2f8] sm:$0xff]  ;;  %v5365_v41 = vcombine.low %v3176_v29, %v3188_v30  ;;  %v5367_v42 = vcombine.low %v3177_v31, %v3189_v32 }
 0x679   : > { %v5392_v44 = vcombine.high %v3201_v39, %v3213_v40 }
 0x67b   : > { %4747 = vmatpush1.bf16.msra.mxu0 %v5385_v47  ;;  %4790 = vmatpush1.bf16.msra.mxu1 %v5387_v48  ;;  %v3225_v47 = vld [vmem:[#allocation2 + $0x358] sm:$0xff] }
 0x67c   : > { %4748 = vmatprep.subr.bf16.mxu0 %v5410_v49  ;;  %4791 = vmatprep.subr.bf16.mxu1 %v5412_v50  ;;  %v3237_v48 = vld [vmem:[#allocation2 + $0x3b8] sm:$0xff]  ;;  %v5389_v49 = vcombine.low %v3200_v37, %v3212_v38  ;;  %v5391_v50 = vcombine.low %v3201_v39, %v3213_v40 }
 0x67f   : > { %4749 = vmatpush1.bf16.msra.mxu0 %v5409_v55  ;;  %4792 = vmatpush1.bf16.msra.mxu1 %v5411_v56  ;;  %v3261_v55 = vld [vmem:[#allocation2 + $0x478] sm:$0xff]  ;;  %v5413_v56 = vcombine.low %v3224_v45, %v3236_v46 }
 0x680   : > { %4750 = vmatprep.subr.bf16.mxu0 %v5434_v57  ;;  %4793 = vmatprep.subr.bf16.mxu1 %v5436_v58  ;;  %v5415_v57 = vcombine.low %v3225_v47, %v3237_v48  ;;  %v5438_v58 = vcombine.high %v3248_v52, %v3260_v53  ;;  %v5440_v59 = vcombine.high %v3249_v54, %v3261_v55 }
 0x683   : > { %4751 = vmatpush1.bf16.msra.mxu0 %v5433_v63  ;;  %4794 = vmatpush1.bf16.msra.mxu1 %v5435_v0  ;;  %v3285_v63 = vld [vmem:[#allocation2 + $0x538] sm:$0xff]  ;;  %v5437_v0 = vcombine.low %v3248_v52, %v3260_v53 }
 0x684   : > { %4752 = vmatprep.subr.bf16.mxu0 %v5458_v1  ;;  %4795 = vmatprep.subr.bf16.mxu1 %v5460_v2  ;;  %v5439_v1 = vcombine.low %v3249_v54, %v3261_v55  ;;  %v5462_v2 = vcombine.high %v3272_v60, %v3284_v61  ;;  %v5464_v3 = vcombine.high %v3273_v62, %v3285_v63 }
 0x687   : > { %4753 = vmatpush1.bf16.msra.mxu0 %v5457_v8  ;;  %4796 = vmatpush1.bf16.msra.mxu1 %v5459_v9  ;;  %v3309_v8 = vld [vmem:[#allocation2 + $0x5f8] sm:$0xff]  ;;  %v5461_v9 = vcombine.low %v3272_v60, %v3284_v61 }
 0x688   : > { %4754 = vmatprep.subr.bf16.mxu0 %v5482_v10  ;;  %4797 = vmatprep.subr.bf16.mxu1 %v5484_v11  ;;  %v5463_v10 = vcombine.low %v3273_v62, %v3285_v63  ;;  %v5486_v11 = vcombine.high %v3296_v4, %v3308_v5  ;;  %v5488_v12 = vcombine.high %v3297_v7, %v3309_v8 }
 0x689   : > { %v5487_v14 = vcombine.low %v3297_v7, %v3309_v8 }
 0x68b   : > { %4755 = vmatpush1.bf16.msra.mxu0 %v5481_v16  ;;  %4798 = vmatpush1.bf16.msra.mxu1 %v5483_v17  ;;  %v3317_v16 = vshrl.u32 %v3316_v15, 7 }
 0x68c   : > { %4826 = vmatprep.subr.bf16.mxu0 %v5318_v19  ;;  %4869 = vmatprep.subr.bf16.mxu1 %v5320_v20  ;;  %v3310_v20 = vld [vmem:[%s7378_s14] sm:$0xff] }
 0x68d   : > { %v7257_v17 = vsub.s32 0, %v3317_v16  ;;  %v7259_v19 = vsub.s32 2, %v3317_v16  ;;  %v7264_v21 = vsub.s32 1, %v3317_v16  ;;  %v7266_v22 = vsub.s32 3, %v3317_v16 }
 0x68e   : > { %4773 = vmatmul.mubr.bf16.vlgmr.msra.gmra.mrb[44].mxu0 %v7233_v18  ;;  %4816 = vmatmul.mubr.bf16.vlgmr.msra.gmra.mrb[48].mxu1 %v7233_v18  ;;  %v7293_v52 = vsub.s32 7, %v3317_v16 }
 0x68f   : > { %4827 = vmatpush1.bf16.msra.mxu0 %v5317_v25  ;;  %4870 = vmatpush1.bf16.msra.mxu1 %v5319_v26  ;;  %v3319_v23 = vrot.slane %v3310_v20, %v7257_v17  ;;  %v3327_v24 = vrot.slane %v3310_v20, %v7259_v19  ;;  %v3331_v25 = vrot.slane %v3310_v20, %v7266_v22 }
 0x690   : > { %4828 = vmatprep.subr.bf16.mxu0 %v5342_v27  ;;  %4871 = vmatprep.subr.bf16.mxu1 %v5344_v28 }
 0x691   : > { %4858 = vmatprep.mubr.bf16.mxu0 %v6320_v6  ;;  %4901 = vmatprep.mubr.bf16.mxu1 %v6320_v6  ;;  %v5416_v6 = vcombine.high %v3225_v47, %v3237_v48 }
 0x693   : > { %4829 = vmatpush1.bf16.msra.mxu0 %v5341_v33  ;;  %4872 = vmatpush1.bf16.msra.mxu1 %v5343_v34 }
 0x694   : > { %4830 = vmatprep.subr.bf16.mxu0 %v5366_v35  ;;  %4873 = vmatprep.subr.bf16.mxu1 %v5368_v36 }
 0x697   : > { %4831 = vmatpush1.bf16.msra.mxu0 %v5365_v41  ;;  %4874 = vmatpush1.bf16.msra.mxu1 %v5367_v42 }
 0x698   : > { %4832 = vmatprep.subr.bf16.mxu0 %v5390_v43  ;;  %4875 = vmatprep.subr.bf16.mxu1 %v5392_v44 }
 0x69b   : > { %4833 = vmatpush1.bf16.msra.mxu0 %v5389_v49  ;;  %4876 = vmatpush1.bf16.msra.mxu1 %v5391_v50  ;;  %v7287_v50 = vsub.s32 4, %v3317_v16 }
 0x69c   : > { %4834 = vmatprep.subr.bf16.mxu0 %v5414_v51  ;;  %4877 = vmatprep.subr.bf16.mxu1 %v5416_v6  ;;  %v7289_v51 = vsub.s32 6, %v3317_v16  ;;  %v7291_v6 = vsub.s32 5, %v3317_v16 }
 0x69d   : > { %v3335_v53 = vrot.slane %v3310_v20, %v7287_v50 }
 0x69e   : > { %v3343_v54 = vrot.slane %v3310_v20, %v7289_v51  ;;  %v3339_v55 = vrot.slane %v3310_v20, %v7291_v6 }
 0x69f   : > { %4835 = vmatpush1.bf16.msra.mxu0 %v5413_v56  ;;  %4878 = vmatpush1.bf16.msra.mxu1 %v5415_v57  ;;  %v3347_v56 = vrot.slane %v3310_v20, %v7293_v52 }
 0x6a0   : > { %4836 = vmatprep.subr.bf16.mxu0 %v5438_v58  ;;  %4879 = vmatprep.subr.bf16.mxu1 %v5440_v59 }
 0x6a3   : > { %4837 = vmatpush1.bf16.msra.mxu0 %v5437_v0  ;;  %4880 = vmatpush1.bf16.msra.mxu1 %v5439_v1 }
 0x6a4   : > { %4838 = vmatprep.subr.bf16.mxu0 %v5462_v2  ;;  %4881 = vmatprep.subr.bf16.mxu1 %v5464_v3 }
 0x6a7   : > { %4839 = vmatpush1.bf16.msra.mxu0 %v5461_v9  ;;  %4882 = vmatpush1.bf16.msra.mxu1 %v5463_v10 }
 0x6a8   : > { %4840 = vmatprep.subr.bf16.mxu0 %v5486_v11  ;;  %4883 = vmatprep.subr.bf16.mxu1 %v5488_v12 }
 0x6ab   : > { %4841 = vmatpush1.bf16.msra.mxu0 %v5485_v13  ;;  %4884 = vmatpush1.bf16.msra.mxu1 %v5487_v14 }
 0x6ae   : > { %4859 = vmatmul.mubr.bf16.vlgmr.msra.gmra.mrb[48].mxu0 %v7233_v18  ;;  %4902 = vmatmul.mubr.bf16.vlgmr.msra.gmra.mrb[52].mxu1 %v7233_v18  ;;  %v3323_v18 = vrot.slane %v3310_v20, %v7264_v21 }
 0x6e1   : > { %v4430_v26 = vpop.f32.mrb[28].mxu0  ;;  %v4473_v27 = vpop.f32.mrb[32].mxu1 }
 0x6e2   : > { %v4431_v28 = vadd.f32 %v4430_v26, %v3319_v23  ;;  %v4474_v29 = vadd.f32 %v4473_v27, %v3327_v24  ;;  %v4432_v30 = vpop.f32.mrb[29].mxu0  ;;  %v4475_v31 = vpop.f32.mrb[33].mxu1 }
 0x6e3   : > { %v4433_v32 = vadd.f32 %v4432_v30, %v3323_v18  ;;  %v4476_v33 = vadd.f32 %v4475_v31, %v3331_v25  ;;  %v4434_v34 = vpop.f32.mrb[30].mxu0  ;;  %v4477_v35 = vpop.f32.mrb[34].mxu1 }
 0x6e4   : > { %6180 = vtanh.f32 %v4431_v28  ;;  %v4435_v36 = vadd.f32 %v4434_v34, %v3319_v23  ;;  %v4436_v37 = vpop.f32.mrb[31].mxu0  ;;  %v4479_v38 = vpop.f32.mrb[35].mxu1  ;;  %v4478_v39 = vadd.f32 %v4477_v35, %v3327_v24  ;;  %v3311_v23 = vld [vmem:[%s7378_s14 + $0x8] sm:$0xff] }
 0x6e5   : > { %6182 = vtanh.f32 %v4474_v29  ;;  %v4437_v40 = vadd.f32 %v4436_v37, %v3323_v18  ;;  %v4480_v41 = vadd.f32 %v4479_v38, %v3331_v25  ;;  %v3351_v24 = vrot.slane %v3311_v23, %v7257_v17 }
 0x6e6   : > { %6184 = vtanh.f32 %v4433_v32  ;;  %v3359_v18 = vrot.slane %v3311_v23, %v7259_v19  ;;  %v3355_v25 = vrot.slane %v3311_v23, %v7264_v21  ;;  %v3363_v26 = vrot.slane %v3311_v23, %v7266_v22 }
 0x6e7   : > { %6186 = vtanh.f32 %v4476_v33 }
 0x6e8   : > { %6188 = vtanh.f32 %v4435_v36 }
 0x6e9   : > { %6190 = vtanh.f32 %v4478_v39 }
 0x6ea   : > { %6192 = vtanh.f32 %v4437_v40 }
 0x6eb   : > { %6194 = vtanh.f32 %v4480_v41 }
 0x6ee   : > { %v6181_v42 = vpop.eup %6180 }
 0x6ef   : > { %v6183_v43 = vpop.eup %6182  ;;  %4960 = vst [vmem:[%s7277_s20] sm:$0xff] %v6181_v42 }
 0x6f0   : > { %v6185_v44 = vpop.eup %6184  ;;  %4962 = vst [vmem:[%s7277_s20 + $0x10] sm:$0xff] %v6183_v43 }
 0x6f1   : > { %v6187_v45 = vpop.eup %6186  ;;  %4961 = vst [vmem:[%s7277_s20 + $0x8] sm:$0xff] %v6185_v44 }
 0x6f2   : > { %v6189_v46 = vpop.eup %6188  ;;  %4963 = vst [vmem:[%s7277_s20 + $0x18] sm:$0xff] %v6187_v45 }
 0x6f3   : > { %v6191_v47 = vpop.eup %6190  ;;  %4984 = vst [vmem:[%s7277_s20 + $0xc0] sm:$0xff] %v6189_v46 }
 0x6f4   : > { %v6193_v48 = vpop.eup %6192  ;;  %4986 = vst [vmem:[%s7277_s20 + $0xd0] sm:$0xff] %v6191_v47 }
 0x6f5   : > { %v6195_v49 = vpop.eup %6194  ;;  %4985 = vst [vmem:[%s7277_s20 + $0xc8] sm:$0xff] %v6193_v48 }
 0x6f6   : > { %4987 = vst [vmem:[%s7277_s20 + $0xd8] sm:$0xff] %v6195_v49 }
 0x701   : > { %v4516_v57 = vpop.f32.mrb[32].mxu0  ;;  %v4559_v58 = vpop.f32.mrb[36].mxu1 }
 0x702   : > { %v4517_v59 = vadd.f32 %v4516_v57, %v3335_v53  ;;  %v4560_v60 = vadd.f32 %v4559_v58, %v3343_v54  ;;  %v4518_v61 = vpop.f32.mrb[33].mxu0  ;;  %v4561_v62 = vpop.f32.mrb[37].mxu1  ;;  %v3379_v57 = vrot.slane %v3311_v23, %v7293_v52 }
 0x703   : > { %v4519_v63 = vadd.f32 %v4518_v61, %v3339_v55  ;;  %v4562_v0 = vadd.f32 %v4561_v62, %v3347_v56  ;;  %v4520_v1 = vpop.f32.mrb[34].mxu0  ;;  %v4563_v2 = vpop.f32.mrb[38].mxu1 }
 0x704   : > { %6196 = vtanh.f32 %v4517_v59  ;;  %v4521_v3 = vadd.f32 %v4520_v1, %v3335_v53  ;;  %v4522_v4 = vpop.f32.mrb[35].mxu0  ;;  %v4565_v5 = vpop.f32.mrb[39].mxu1  ;;  %v4564_v7 = vadd.f32 %v4563_v2, %v3343_v54  ;;  %v3367_v54 = vrot.slane %v3311_v23, %v7287_v50 }
 0x705   : > { %6198 = vtanh.f32 %v4560_v60  ;;  %v4523_v8 = vadd.f32 %v4522_v4, %v3339_v55  ;;  %v4566_v9 = vadd.f32 %v4565_v5, %v3347_v56  ;;  %v3375_v55 = vrot.slane %v3311_v23, %v7289_v51 }
 0x706   : > { %6200 = vtanh.f32 %v4519_v63  ;;  %v3371_v56 = vrot.slane %v3311_v23, %v7291_v6 }
 0x707   : > { %6202 = vtanh.f32 %v4562_v0 }
 0x708   : > { %6204 = vtanh.f32 %v4521_v3 }
 0x709   : > { %6206 = vtanh.f32 %v4564_v7 }
 0x70a   : > { %6208 = vtanh.f32 %v4523_v8 }
 0x70b   : > { %6210 = vtanh.f32 %v4566_v9 }
 0x70e   : > { %v6197_v10 = vpop.eup %6196 }
 0x70f   : > { %v6199_v11 = vpop.eup %6198  ;;  %4964 = vst [vmem:[%s7277_s20 + $0x20] sm:$0xff] %v6197_v10 }
 0x710   : > { %v6201_v12 = vpop.eup %6200  ;;  %4966 = vst [vmem:[%s7277_s20 + $0x30] sm:$0xff] %v6199_v11 }
 0x711   : > { %v6203_v13 = vpop.eup %6202  ;;  %4965 = vst [vmem:[%s7277_s20 + $0x28] sm:$0xff] %v6201_v12 }
 0x712   : > { %v6205_v14 = vpop.eup %6204  ;;  %4967 = vst [vmem:[%s7277_s20 + $0x38] sm:$0xff] %v6203_v13 }
 0x713   : > { %v6207_v15 = vpop.eup %6206  ;;  %4988 = vst [vmem:[%s7277_s20 + $0xe0] sm:$0xff] %v6205_v14 }
 0x714   : > { %v6209_v16 = vpop.eup %6208  ;;  %4990 = vst [vmem:[%s7277_s20 + $0xf0] sm:$0xff] %v6207_v15 }
 0x715   : > { %v6211_v20 = vpop.eup %6210  ;;  %4989 = vst [vmem:[%s7277_s20 + $0xe8] sm:$0xff] %v6209_v16 }
 0x716   : > { %4991 = vst [vmem:[%s7277_s20 + $0xf8] sm:$0xff] %v6211_v20 }
 0x721   : > { %v4602_v27 = vpop.f32.mrb[36].mxu0  ;;  %v4645_v28 = vpop.f32.mrb[40].mxu1 }
 0x722   : > { %v4603_v29 = vadd.f32 %v4602_v27, %v3351_v24  ;;  %v4646_v30 = vadd.f32 %v4645_v28, %v3359_v18  ;;  %v4604_v31 = vpop.f32.mrb[37].mxu0  ;;  %v4647_v32 = vpop.f32.mrb[41].mxu1 }
 0x723   : > { %v4605_v33 = vadd.f32 %v4604_v31, %v3355_v25  ;;  %v4648_v34 = vadd.f32 %v4647_v32, %v3363_v26  ;;  %v4606_v35 = vpop.f32.mrb[38].mxu0  ;;  %v4649_v36 = vpop.f32.mrb[42].mxu1 }
 0x724   : > { %6212 = vtanh.f32 %v4603_v29  ;;  %v4607_v37 = vadd.f32 %v4606_v35, %v3351_v24  ;;  %v4608_v38 = vpop.f32.mrb[39].mxu0  ;;  %v4651_v39 = vpop.f32.mrb[43].mxu1  ;;  %v4650_v40 = vadd.f32 %v4649_v36, %v3359_v18  ;;  %v3312_v24 = vld [vmem:[%s7378_s14 + $0x10] sm:$0xff] }
 0x725   : > { %6214 = vtanh.f32 %v4646_v30  ;;  %v4609_v41 = vadd.f32 %v4608_v38, %v3355_v25  ;;  %v4652_v42 = vadd.f32 %v4651_v39, %v3363_v26  ;;  %v3383_v18 = vrot.slane %v3312_v24, %v7257_v17 }
 0x726   : > { %6216 = vtanh.f32 %v4605_v33  ;;  %v3391_v25 = vrot.slane %v3312_v24, %v7259_v19  ;;  %v3387_v26 = vrot.slane %v3312_v24, %v7264_v21  ;;  %v3395_v27 = vrot.slane %v3312_v24, %v7266_v22 }
 0x727   : > { %6218 = vtanh.f32 %v4648_v34 }
 0x728   : > { %6220 = vtanh.f32 %v4607_v37 }
 0x729   : > { %6222 = vtanh.f32 %v4650_v40 }
 0x72a   : > { %6224 = vtanh.f32 %v4609_v41 }
 0x72b   : > { %6226 = vtanh.f32 %v4652_v42 }
 0x72e   : > { %v6213_v43 = vpop.eup %6212 }
 0x72f   : > { %v6215_v44 = vpop.eup %6214  ;;  %4968 = vst [vmem:[%s7277_s20 + $0x40] sm:$0xff] %v6213_v43 }
 0x730   : > { %v6217_v45 = vpop.eup %6216  ;;  %4970 = vst [vmem:[%s7277_s20 + $0x50] sm:$0xff] %v6215_v44 }
 0x731   : > { %v6219_v46 = vpop.eup %6218  ;;  %4969 = vst [vmem:[%s7277_s20 + $0x48] sm:$0xff] %v6217_v45 }
 0x732   : > { %v6221_v47 = vpop.eup %6220  ;;  %4971 = vst [vmem:[%s7277_s20 + $0x58] sm:$0xff] %v6219_v46 }
 0x733   : > { %v6223_v48 = vpop.eup %6222  ;;  %4992 = vst [vmem:[%s7277_s20 + $0x100] sm:$0xff] %v6221_v47 }
 0x734   : > { %v6225_v49 = vpop.eup %6224  ;;  %4994 = vst [vmem:[%s7277_s20 + $0x110] sm:$0xff] %v6223_v48  ;;  %v3399_v48 = vrot.slane %v3312_v24, %v7287_v50 }
 0x735   : > { %v6227_v53 = vpop.eup %6226  ;;  %4993 = vst [vmem:[%s7277_s20 + $0x108] sm:$0xff] %v6225_v49  ;;  %v3407_v49 = vrot.slane %v3312_v24, %v7289_v51 }
 0x736   : > { %4995 = vst [vmem:[%s7277_s20 + $0x118] sm:$0xff] %v6227_v53  ;;  %v3403_v53 = vrot.slane %v3312_v24, %v7291_v6 }
 0x741   : > { %v4688_v58 = vpop.f32.mrb[40].mxu0  ;;  %v4731_v59 = vpop.f32.mrb[44].mxu1 }
 0x742   : > { %v4689_v60 = vadd.f32 %v4688_v58, %v3367_v54  ;;  %v4732_v61 = vadd.f32 %v4731_v59, %v3375_v55  ;;  %v4690_v62 = vpop.f32.mrb[41].mxu0  ;;  %v4733_v63 = vpop.f32.mrb[45].mxu1 }
 0x743   : > { %v4691_v0 = vadd.f32 %v4690_v62, %v3371_v56  ;;  %v4734_v1 = vadd.f32 %v4733_v63, %v3379_v57  ;;  %v4692_v2 = vpop.f32.mrb[42].mxu0  ;;  %v4735_v3 = vpop.f32.mrb[46].mxu1 }
 0x744   : > { %6228 = vtanh.f32 %v4689_v60  ;;  %v4693_v4 = vadd.f32 %v4692_v2, %v3367_v54  ;;  %v4694_v5 = vpop.f32.mrb[43].mxu0  ;;  %v4737_v7 = vpop.f32.mrb[47].mxu1  ;;  %v4736_v8 = vadd.f32 %v4735_v3, %v3375_v55  ;;  %v3411_v54 = vrot.slane %v3312_v24, %v7293_v52 }
 0x745   : > { %6230 = vtanh.f32 %v4732_v61  ;;  %v4695_v9 = vadd.f32 %v4694_v5, %v3371_v56  ;;  %v4738_v10 = vadd.f32 %v4737_v7, %v3379_v57 }
 0x746   : > { %6232 = vtanh.f32 %v4691_v0 }
 0x747   : > { %6234 = vtanh.f32 %v4734_v1 }
 0x748   : > { %6236 = vtanh.f32 %v4693_v4 }
 0x749   : > { %6238 = vtanh.f32 %v4736_v8 }
 0x74a   : > { %6240 = vtanh.f32 %v4695_v9 }
 0x74b   : > { %6242 = vtanh.f32 %v4738_v10 }
 0x74e   : > { %v6229_v11 = vpop.eup %6228 }
 0x74f   : > { %v6231_v12 = vpop.eup %6230  ;;  %4972 = vst [vmem:[%s7277_s20 + $0x60] sm:$0xff] %v6229_v11 }
 0x750   : > { %v6233_v13 = vpop.eup %6232  ;;  %4974 = vst [vmem:[%s7277_s20 + $0x70] sm:$0xff] %v6231_v12 }
 0x751   : > { %v6235_v14 = vpop.eup %6234  ;;  %4973 = vst [vmem:[%s7277_s20 + $0x68] sm:$0xff] %v6233_v13 }
 0x752   : > { %v6237_v15 = vpop.eup %6236  ;;  %4975 = vst [vmem:[%s7277_s20 + $0x78] sm:$0xff] %v6235_v14 }
 0x753   : > { %v6239_v16 = vpop.eup %6238  ;;  %4996 = vst [vmem:[%s7277_s20 + $0x120] sm:$0xff] %v6237_v15 }
 0x754   : > { %v6241_v20 = vpop.eup %6240  ;;  %4998 = vst [vmem:[%s7277_s20 + $0x130] sm:$0xff] %v6239_v16 }
 0x755   : > { %v6243_v23 = vpop.eup %6242  ;;  %4997 = vst [vmem:[%s7277_s20 + $0x128] sm:$0xff] %v6241_v20 }
 0x756   : > { %4999 = vst [vmem:[%s7277_s20 + $0x138] sm:$0xff] %v6243_v23 }
 0x761   : > { %v4774_v28 = vpop.f32.mrb[44].mxu0  ;;  %v4817_v29 = vpop.f32.mrb[48].mxu1 }
 0x762   : > { %v4775_v30 = vadd.f32 %v4774_v28, %v3383_v18  ;;  %v4818_v31 = vadd.f32 %v4817_v29, %v3391_v25  ;;  %v4776_v32 = vpop.f32.mrb[45].mxu0  ;;  %v4819_v33 = vpop.f32.mrb[49].mxu1 }
 0x763   : > { %v4777_v34 = vadd.f32 %v4776_v32, %v3387_v26  ;;  %v4820_v35 = vadd.f32 %v4819_v33, %v3395_v27  ;;  %v4778_v36 = vpop.f32.mrb[46].mxu0  ;;  %v4821_v37 = vpop.f32.mrb[50].mxu1 }
 0x764   : > { %6244 = vtanh.f32 %v4775_v30  ;;  %v4779_v38 = vadd.f32 %v4778_v36, %v3383_v18  ;;  %v4780_v17 = vpop.f32.mrb[47].mxu0  ;;  %v4823_v19 = vpop.f32.mrb[51].mxu1  ;;  %v4822_v21 = vadd.f32 %v4821_v37, %v3391_v25 }
 0x765   : > { %6246 = vtanh.f32 %v4818_v31  ;;  %v4781_v22 = vadd.f32 %v4780_v17, %v3387_v26  ;;  %v4824_v39 = vadd.f32 %v4823_v19, %v3395_v27 }
 0x766   : > { %6248 = vtanh.f32 %v4777_v34 }
 0x767   : > { %6250 = vtanh.f32 %v4820_v35 }
 0x768   : > { %6252 = vtanh.f32 %v4779_v38 }
 0x769   : > { %6254 = vtanh.f32 %v4822_v21 }
 0x76a   : > { %6256 = vtanh.f32 %v4781_v22 }
 0x76b   : > { %6258 = vtanh.f32 %v4824_v39 }
 0x76e   : > { %v6245_v40 = vpop.eup %6244 }
 0x76f   : > { %v6247_v41 = vpop.eup %6246  ;;  %4976 = vst [vmem:[%s7277_s20 + $0x80] sm:$0xff] %v6245_v40 }
 0x770   : > { %v6249_v42 = vpop.eup %6248  ;;  %4978 = vst [vmem:[%s7277_s20 + $0x90] sm:$0xff] %v6247_v41 }
 0x771   : > { %v6251_v43 = vpop.eup %6250  ;;  %4977 = vst [vmem:[%s7277_s20 + $0x88] sm:$0xff] %v6249_v42 }
 0x772   : > { %v6253_v44 = vpop.eup %6252  ;;  %4979 = vst [vmem:[%s7277_s20 + $0x98] sm:$0xff] %v6251_v43 }
 0x773   : > { %v6255_v45 = vpop.eup %6254  ;;  %5000 = vst [vmem:[%s7277_s20 + $0x140] sm:$0xff] %v6253_v44 }
 0x774   : > { %v6257_v46 = vpop.eup %6256  ;;  %5002 = vst [vmem:[%s7277_s20 + $0x150] sm:$0xff] %v6255_v45 }
 0x775   : > { %v6259_v47 = vpop.eup %6258  ;;  %5001 = vst [vmem:[%s7277_s20 + $0x148] sm:$0xff] %v6257_v46 }
 0x776   : > { %5003 = vst [vmem:[%s7277_s20 + $0x158] sm:$0xff] %v6259_v47 }
 0x781   : > { %v4860_v55 = vpop.f32.mrb[48].mxu0  ;;  %v4903_v56 = vpop.f32.mrb[52].mxu1 }
 0x782   : > { %v4861_v57 = vadd.f32 %v4860_v55, %v3399_v48  ;;  %v4904_v58 = vadd.f32 %v4903_v56, %v3407_v49  ;;  %v4862_v59 = vpop.f32.mrb[49].mxu0  ;;  %v4905_v60 = vpop.f32.mrb[53].mxu1 }
 0x783   : > { %v4863_v61 = vadd.f32 %v4862_v59, %v3403_v53  ;;  %v4906_v62 = vadd.f32 %v4905_v60, %v3411_v54  ;;  %v4864_v63 = vpop.f32.mrb[50].mxu0  ;;  %v4907_v0 = vpop.f32.mrb[54].mxu1 }
 0x784   : > { %6260 = vtanh.f32 %v4861_v57  ;;  %v4865_v1 = vadd.f32 %v4864_v63, %v3399_v48  ;;  %v4866_v50 = vpop.f32.mrb[51].mxu0  ;;  %v4909_v51 = vpop.f32.mrb[55].mxu1  ;;  %v4908_v6 = vadd.f32 %v4907_v0, %v3407_v49 }
 0x785   : > { %6262 = vtanh.f32 %v4904_v58  ;;  %v4867_v52 = vadd.f32 %v4866_v50, %v3403_v53  ;;  %v4910_v2 = vadd.f32 %v4909_v51, %v3411_v54 }
 0x786   : > { %6264 = vtanh.f32 %v4863_v61 }
 0x787   : > { %6266 = vtanh.f32 %v4906_v62 }
 0x788   : > { %6268 = vtanh.f32 %v4865_v1 }
 0x789   : > { %6270 = vtanh.f32 %v4908_v6 }
 0x78a   : > { %6272 = vtanh.f32 %v4867_v52 }
 0x78b   : > { %6274 = vtanh.f32 %v4910_v2 }
 0x78e   : > { %v6261_v3 = vpop.eup %6260 }
 0x78f   : > { %v6263_v4 = vpop.eup %6262  ;;  %4980 = vst [vmem:[%s7277_s20 + $0xa0] sm:$0xff] %v6261_v3 }
 0x790   : > { %v6265_v5 = vpop.eup %6264  ;;  %4982 = vst [vmem:[%s7277_s20 + $0xb0] sm:$0xff] %v6263_v4 }
 0x791   : > { %v6267_v7 = vpop.eup %6266  ;;  %4981 = vst [vmem:[%s7277_s20 + $0xa8] sm:$0xff] %v6265_v5 }
 0x792   : > { %v6269_v8 = vpop.eup %6268  ;;  %4983 = vst [vmem:[%s7277_s20 + $0xb8] sm:$0xff] %v6267_v7 }
 0x793   : > { %v6271_v9 = vpop.eup %6270  ;;  %5004 = vst [vmem:[%s7277_s20 + $0x160] sm:$0xff] %v6269_v8 }
 0x794   : > { %v6273_v10 = vpop.eup %6272  ;;  %5006 = vst [vmem:[%s7277_s20 + $0x170] sm:$0xff] %v6271_v9 }
 0x795   : > { %v6275_v11 = vpop.eup %6274  ;;  %5005 = vst [vmem:[%s7277_s20 + $0x168] sm:$0xff] %v6273_v10 }
 0x796   : > { %5007 = vst [vmem:[%s7277_s20 + $0x178] sm:$0xff] %v6275_v11 }
 0x797 PF: > { %s26_s18 = sadd.s32 1, %s6314_s18  }
 0x798   : > { %p23_p3 = scmp.ge.s32.totalorder %s26_s18, 5  }
 0x79a   :  { %25 = sbr.rel (!%p23_p3) target bundleno = 1 (0x1), region = 115 }
 0x7a1   :  { %5032 = vsyncpa [#allocation3], 1 }
 0x7a2   :  { %5034 = vsyncpa [#allocation3 + $0x1], 1 }

</bundles_post_ra>
